<compile_context>
chip_gen: v7x
topology: tpu7x:2x2x1
jax: 0.10.0
libtpu: 0.0.40
codegen_flags: <defaults>
</compile_context>

<pallas_src>
import functools

import jax
import jax.numpy as jnp
from jax.experimental import pallas as pl
from jax.experimental.pallas import tpu as pltpu

D_MODEL = 32
N_HEAD = 4
HEAD_DIM = D_MODEL // N_HEAD
DIM_FF = 64
NUM_LAYERS = 3                      # must be odd
NUM_BLOCK = (NUM_LAYERS - 1) // 2   # input / output blocks per side
LN_EPS = 1e-5
NEG_INF = -1e30

# MXU operand dtype.  bf16 costs ~1/3 of the MXU passes of f32 on all of
# v5e/v6e/v7x; accumulation stays f32.  Set to jnp.float32 to recover ~1e-3
# agreement with the f32 reference (bf16 lands around 1e-3 .. 2e-2).
MXU_DTYPE = jnp.bfloat16

_SLAB_LANES = 128                   # lane-dense parameter slabs


# ----------------------------------------------------------------------------
# Static parameter-slab layout (weights: bf16 slab; vectors: f32 slab)
# ----------------------------------------------------------------------------
def _build_weight_layout():
    layout = {}
    off = 0

    def add(name, rows, cols):
        nonlocal off
        layout[name] = (off, rows, cols)
        off += rows

    for li in range(NUM_LAYERS):
        add(f"wqkv{li}", 3 * D_MODEL, 3 * D_MODEL)   # fused [q|k|v] projection
        add(f"wo{li}", D_MODEL, D_MODEL)
        add(f"w1{li}", D_MODEL, DIM_FF)
        add(f"w2{li}", DIM_FF, D_MODEL)
    for bi in range(NUM_BLOCK):
        add(f"wskip{bi}", 2 * D_MODEL, D_MODEL)      # cat([x, skip]) @ W
    total = ((off + 7) // 8) * 8
    return layout, total


_W_LAYOUT, _W_ROWS = _build_weight_layout()

# vector slab: 8 rows per layer + one 8-row tail block (skip biases, final norm)
_V_ROWS_PER_LAYER = 8
_V_TAIL_OFF = NUM_LAYERS * _V_ROWS_PER_LAYER
_V_ROWS = _V_TAIL_OFF + 8


# ----------------------------------------------------------------------------
# The single fused Pallas kernel (whole network)
# ----------------------------------------------------------------------------
def _fused_skip_encoder_kernel(x_ref, cs_ref, abias_ref, wslab_ref, vslab_ref,
                               o_ref, *, batch, seq):
    DM, NH, HD, FF = D_MODEL, N_HEAD, HEAD_DIM, DIM_FF
    R = batch * seq

    x = x_ref[...]                    # (R, DM) f32, batch-major rows
    cos = cs_ref[:, 0:DM]             # (R, DM)
    sin = cs_ref[:, DM:2 * DM]        # (R, DM)
    abias = abias_ref[...]            # (NH*R, NH*R) additive block-diag mask

    def _w(name):
        off, r, c = _W_LAYOUT[name]
        return wslab_ref[off:off + r, 0:c]            # bf16 weight tile

    def _dot(a, b):
        return jnp.dot(a.astype(MXU_DTYPE), b.astype(MXU_DTYPE),
                       preferred_element_type=jnp.float32)

    def _layer_norm(y, g, b):
        mu = jnp.mean(y, axis=-1, keepdims=True)
        d = y - mu
        var = jnp.mean(d * d, axis=-1, keepdims=True)
        return d * jax.lax.rsqrt(var + LN_EPS) * g + b

    def _encoder_layer(li, x):
        vb = vslab_ref[li * _V_ROWS_PER_LAYER:(li + 1) * _V_ROWS_PER_LAYER, :]
        # RoPE folded into the fused qkv weight:
        #   rope(x) @ W == (x*cos) @ W + (x*sin) @ (Rot @ W)
        # One full-width matmul computes q, k, v for all heads at once.
        xcat = jnp.concatenate([x * cos, x * sin, x], axis=1)        # (R, 3*DM) f32
        qkv = _dot(xcat, _w(f"wqkv{li}")) + vb[0:1, 0:3 * DM]        # (R, 3*DM)
        q = qkv[:, 0:DM]
        k = qkv[:, DM:2 * DM]
        v = qkv[:, 2 * DM:3 * DM]

        # Pack the heads along the sublane axis -> single score matmul,
        # single softmax, single p@v for all (head, batch) blocks.
        def stack_heads(t):                                          # (R,DM)->(NH*R,HD)
            return jnp.concatenate([t[:, h * HD:(h + 1) * HD] for h in range(NH)],
                                   axis=0)

        q_s = stack_heads(q)
        k_s = stack_heads(k)
        v_s = stack_heads(v)
        s = jax.lax.dot_general(q_s.astype(MXU_DTYPE), k_s.astype(MXU_DTYPE),
                                (((1,), (1,)), ((), ())),
                                preferred_element_type=jnp.float32) + abias
        m = jnp.max(s, axis=-1, keepdims=True)
        e = jnp.exp(s - m)
        p = e * pl.reciprocal(jnp.sum(e, axis=-1, keepdims=True), approx=True)
        o_s = _dot(p, v_s)                                           # (NH*R, HD)
        # un-stack heads back to lanes
        o = jnp.concatenate([o_s[h * R:(h + 1) * R, :] for h in range(NH)], axis=1)
        attn = _dot(o, _w(f"wo{li}")) + vb[1:2, 0:DM]

        x = _layer_norm(x + attn, vb[2:3, 0:DM], vb[3:4, 0:DM])
        ff = jnp.maximum(_dot(x, _w(f"w1{li}")) + vb[4:5, 0:FF], 0.0)
        ff = _dot(ff, _w(f"w2{li}")) + vb[5:6, 0:DM]
        return _layer_norm(x + ff, vb[6:7, 0:DM], vb[7:8, 0:DM])

    tail = vslab_ref[_V_TAIL_OFF:_V_TAIL_OFF + 8, :]

    skips = []
    li = 0
    for _ in range(NUM_BLOCK):                        # input blocks
        x = _encoder_layer(li, x)
        skips.append(x)
        li += 1
    x = _encoder_layer(li, x)                         # middle block
    li += 1
    for bi in range(NUM_BLOCK):                       # output blocks + skip linears
        skip = skips.pop()
        # cat([x, skip], -1) @ Wl  -- single matmul, no weight split needed
        xin = jnp.concatenate([x, skip], axis=1)
        x = _dot(xin, _w(f"wskip{bi}")) + tail[bi:bi + 1, 0:DM]
        x = _encoder_layer(li, x)
        li += 1

    out = _layer_norm(x, tail[NUM_BLOCK:NUM_BLOCK + 1, 0:DM],
                      tail[NUM_BLOCK + 1:NUM_BLOCK + 2, 0:DM])   # (R, DM) batch-major
    # Emit in (seq, batch*DM) order so the wrapper reshape to (S, B, DM) is free.
    for b in range(batch):
        o_ref[:, b * DM:(b + 1) * DM] = out[b * seq:(b + 1) * seq, :]


# ----------------------------------------------------------------------------
# pallas_call wrapper
# ----------------------------------------------------------------------------
def _full_spec(shape):
    n = len(shape)
    return pl.BlockSpec(shape, lambda i, _n=n: (0,) * _n)


def skip_transformer_forward(prep, x_bsd):
    B, S, D = x_bsd.shape
    kernel = functools.partial(_fused_skip_encoder_kernel, batch=B, seq=S)
    args = (x_bsd.reshape(B * S, D),        # free reshape: rows stay batch-major
            prep["cs"], prep["abias"], prep["wslab"], prep["vslab"])
    out = pl.pallas_call(
        kernel,
        out_shape=jax.ShapeDtypeStruct((S, B * D), jnp.float32),
        grid=(1,),
        in_specs=[_full_spec(a.shape) for a in args],
        out_specs=_full_spec((S, B * D)),
        compiler_params=pltpu.CompilerParams(dimension_semantics=("arbitrary",)),
    )(*args)
    return out.reshape(S, B, D)             # free reshape, no transpose op


# ----------------------------------------------------------------------------
# RoPE tables / parameter preparation (done ONCE, outside the kernel / jit)
# ----------------------------------------------------------------------------
def _rope_tables(S, nframes, D):
    inv_freq = 1.0 / (10000.0 ** (jnp.arange(0, D, 2, dtype=jnp.float32) / D))
    # first segment: positions 0..S-nframes-1 ; last segment restarts at 0
    pos = jnp.concatenate([
        jnp.arange(S - nframes, dtype=jnp.float32),
        jnp.arange(nframes, dtype=jnp.float32),
    ])
    freqs = pos[:, None] * inv_freq[None, :]      # (S, D//2)
    freqs = jnp.repeat(freqs, 2, axis=-1)         # interleaved -> (S, D)
    return jnp.cos(freqs), jnp.sin(freqs)


def _rotate_half_matrix(D):
    # interleaved rotate_half as a +-1 pair-swap matrix: (x @ R)[2i]=-x[2i+1], [2i+1]=x[2i]
    r = jnp.zeros((D, D), jnp.float32)
    idx = jnp.arange(0, D, 2)
    r = r.at[idx + 1, idx].set(-1.0)
    r = r.at[idx, idx + 1].set(1.0)
    return r


def prepare_inputs(params, B, S, nframes):
    D, H, Dh = D_MODEL, N_HEAD, HEAD_DIM
    R = B * S
    cos, sin = _rope_tables(S, nframes, D)
    rmat = _rotate_half_matrix(D)
    scale = 1.0 / (Dh ** 0.5)

    layers = (list(params["input_blocks"]) + [params["middle_block"]]
              + list(params["output_blocks"]))

    # ----- bf16 weight slab (static row layout, 128 lanes) -----
    wslab = jnp.zeros((_W_ROWS, _SLAB_LANES), jnp.float32)

    def put(slab, name, arr):
        off, r, c = _W_LAYOUT[name]
        return slab.at[off:off + r, 0:c].set(arr)

    for li, p in enumerate(layers):
        wq_s = p["wq"] * scale                       # 1/sqrt(Dh) folded into q
        wqkv = jnp.zeros((3 * D, 3 * D), jnp.float32)
        wqkv = wqkv.at[0:D, 0:D].set(wq_s)           # q: (x*cos) part
        wqkv = wqkv.at[D:2 * D, 0:D].set(rmat @ wq_s)        # q: (x*sin) part (RoPE fold)
        wqkv = wqkv.at[0:D, D:2 * D].set(p["wk"])
        wqkv = wqkv.at[D:2 * D, D:2 * D].set(rmat @ p["wk"])
        wqkv = wqkv.at[2 * D:3 * D, 2 * D:3 * D].set(p["wv"])  # v: raw x part
        wslab = put(wslab, f"wqkv{li}", wqkv)
        wslab = put(wslab, f"wo{li}", p["wo"])
        wslab = put(wslab, f"w1{li}", p["w1"])
        wslab = put(wslab, f"w2{li}", p["w2"])
    for bi, lb in enumerate(params["linear_blocks"]):
        wslab = put(wslab, f"wskip{bi}", lb["w"])
    wslab = wslab.astype(jnp.bfloat16)

    # ----- f32 bias / LayerNorm slab -----
    vslab = jnp.zeros((_V_ROWS, _SLAB_LANES), jnp.float32)

    def vput(slab, row, arr):
        return slab.at[row, 0:arr.shape[0]].set(arr)

    for li, p in enumerate(layers):
        r0 = li * _V_ROWS_PER_LAYER
        vslab = vput(vslab, r0 + 0, jnp.concatenate([p["bq"] * scale, p["bk"], p["bv"]]))
        vslab = vput(vslab, r0 + 1, p["bo"])
        vslab = vput(vslab, r0 + 2, p["ln1_g"])
        vslab = vput(vslab, r0 + 3, p["ln1_b"])
        vslab = vput(vslab, r0 + 4, p["b1"])
        vslab = vput(vslab, r0 + 5, p["b2"])
        vslab = vput(vslab, r0 + 6, p["ln2_g"])
        vslab = vput(vslab, r0 + 7, p["ln2_b"])
    for bi, lb in enumerate(params["linear_blocks"]):
        vslab = vput(vslab, _V_TAIL_OFF + bi, lb["b"])
    vslab = vput(vslab, _V_TAIL_OFF + NUM_BLOCK, params["norm_g"])
    vslab = vput(vslab, _V_TAIL_OFF + NUM_BLOCK + 1, params["norm_b"])

    # ----- RoPE tables (batch-major rows) packed as [cos | sin] -----
    cs = jnp.tile(jnp.concatenate([cos, sin], axis=1), (B, 1))    # (R, 2D)

    # ----- packed-head attention mask: stacked row i = h*R + b*S + s, so
    #       i // S uniquely identifies the (head, batch) block -----
    gid = jnp.arange(H * R, dtype=jnp.int32) // S
    abias = jnp.where(gid[:, None] == gid[None, :], 0.0, NEG_INF).astype(jnp.float32)

    return dict(cs=cs, abias=abias, wslab=wslab, vslab=vslab)


# ----------------------------------------------------------------------------
# Deterministic parameter init (xavier-uniform weights, zero biases)
# ----------------------------------------------------------------------------
def init_params(key, d=D_MODEL, ff=DIM_FF, num_layers=NUM_LAYERS):
    assert num_layers % 2 == 1
    num_block = (num_layers - 1) // 2
    keys = iter(jax.random.split(key, 256))

    def dense(shape):
        fan_in, fan_out = shape
        limit = (6.0 / (fan_in + fan_out)) ** 0.5
        return jax.random.uniform(next(keys), shape, jnp.float32, -limit, limit)

    def layer():
        return dict(
            wq=dense((d, d)), bq=jnp.zeros((d,), jnp.float32),
            wk=dense((d, d)), bk=jnp.zeros((d,), jnp.float32),
            wv=dense((d, d)), bv=jnp.zeros((d,), jnp.float32),
            wo=dense((d, d)), bo=jnp.zeros((d,), jnp.float32),
            ln1_g=jnp.ones((d,), jnp.float32), ln1_b=jnp.zeros((d,), jnp.float32),
            w1=dense((d, ff)), b1=jnp.zeros((ff,), jnp.float32),
            w2=dense((ff, d)), b2=jnp.zeros((d,), jnp.float32),
            ln2_g=jnp.ones((d,), jnp.float32), ln2_b=jnp.zeros((d,), jnp.float32),
        )

    return dict(
        input_blocks=[layer() for _ in range(num_block)],
        middle_block=layer(),
        output_blocks=[layer() for _ in range(num_block)],
        linear_blocks=[
            dict(w=dense((2 * d, d)), b=jnp.zeros((d,), jnp.float32))
            for _ in range(num_block)
        ],
        norm_g=jnp.ones((d,), jnp.float32),
        norm_b=jnp.zeros((d,), jnp.float32),
    )


# ----------------------------------------------------------------------------
# Pure-JAX f32 reference of the same (assumed) semantics, for a sanity diff
# ----------------------------------------------------------------------------
def reference_forward(params, x_bsd, nframes):
    B, S, D = x_bsd.shape
    H, Dh = N_HEAD, HEAD_DIM
    cos, sin = _rope_tables(S, nframes, D)
    rmat = _rotate_half_matrix(D)
    scale = 1.0 / (Dh ** 0.5)

    def rope(t):
        return t * cos[None] + (t @ rmat) * sin[None]

    def ln(y, g, b):
        mu = y.mean(-1, keepdims=True)
        d = y - mu
        var = (d * d).mean(-1, keepdims=True)
        return d * jax.lax.rsqrt(var + LN_EPS) * g + b

    def layer(p, x):
        q_in = rope(x)
        qp = q_in @ p["wq"] + p["bq"]
        kp = q_in @ p["wk"] + p["bk"]
        vp = x @ p["wv"] + p["bv"]
        qh = qp.reshape(B, S, H, Dh).transpose(0, 2, 1, 3)
        kh = kp.reshape(B, S, H, Dh).transpose(0, 2, 1, 3)
        vh = vp.reshape(B, S, H, Dh).transpose(0, 2, 1, 3)
        s = jnp.einsum("bhqd,bhkd->bhqk", qh, kh) * scale
        w = jax.nn.softmax(s, axis=-1)
        o = jnp.einsum("bhqk,bhkd->bhqd", w, vh).transpose(0, 2, 1, 3).reshape(B, S, D)
        a = o @ p["wo"] + p["bo"]
        x = ln(x + a, p["ln1_g"], p["ln1_b"])
        f = jnp.maximum(x @ p["w1"] + p["b1"], 0.0) @ p["w2"] + p["b2"]
        return ln(x + f, p["ln2_g"], p["ln2_b"])

    xs = []
    x = x_bsd
    for p in params["input_blocks"]:
        x = layer(p, x)
        xs.append(x)
    x = layer(params["middle_block"], x)
    for p, lb in zip(params["output_blocks"], params["linear_blocks"]):
        x = jnp.concatenate([x, xs.pop()], axis=-1) @ lb["w"] + lb["b"]
        x = layer(p, x)
    x = ln(x, params["norm_g"], params["norm_b"])
    return jnp.transpose(x, (1, 0, 2))          # (S, B, D)


# ----------------------------------------------------------------------------
if __name__ == "__main__":
    key = jax.random.PRNGKey(0)
    pkey, xkey = jax.random.split(key)
    params = init_params(pkey)

    B, S = 2, 8
    nframes = 3
    x = jax.random.normal(xkey, (B, S, D_MODEL), jnp.float32)

    # RoPE tables + fused/packed weight slabs are prepared once, outside the kernel.
    prep = prepare_inputs(params, B, S, nframes)

    fwd = jax.jit(skip_transformer_forward)
    out = fwd(prep, x)
    jax.block_until_ready(out)

    assert out.shape == (S, B, D_MODEL), out.shape
    assert bool(jnp.all(jnp.isfinite(out)))

    ref = reference_forward(params, x, nframes)
    max_diff = float(jnp.max(jnp.abs(out - ref)))
    # bf16 MXU operands + approximate softmax reciprocal typically give
    # ~1e-3 .. 2e-2 max abs error vs the f32 reference (MXU_DTYPE=float32 -> ~1e-3).
    assert max_diff < 1e-1, max_diff

    print("KERNEL_OK")
</pallas_src>

<mosaic_0001>
module attributes {stable_mosaic.version = 11 : i64} {
  func.func @_fused_skip_encoder_kernel(%arg0: i32, %arg1: memref<16x32xf32, #tpu.memory_space<vmem>>, %arg2: memref<16x64xf32, #tpu.memory_space<vmem>>, %arg3: memref<64x64xf32, #tpu.memory_space<vmem>>, %arg4: memref<736x128xbf16, #tpu.memory_space<vmem>>, %arg5: memref<32x128xf32, #tpu.memory_space<vmem>>, %arg6: memref<8x64xf32, #tpu.memory_space<vmem>>) attributes {dimension_semantics = [#tpu.dimension_semantics<arbitrary>], iteration_bounds = array<i64: 1>, scalar_prefetch = 0 : i64, scratch_operands = 0 : i64, tpu.core_type = #tpu.core_type<tc>, window_params = [{pipeline_mode = #tpu.pipeline_mode<synchronous>, transform_indices = @transform_0, window_bounds = array<i64: 16, 32>}, {pipeline_mode = #tpu.pipeline_mode<synchronous>, transform_indices = @transform_1, window_bounds = array<i64: 16, 64>}, {pipeline_mode = #tpu.pipeline_mode<synchronous>, transform_indices = @transform_2, window_bounds = array<i64: 64, 64>}, {pipeline_mode = #tpu.pipeline_mode<synchronous>, transform_indices = @transform_3, window_bounds = array<i64: 736, 128>}, {pipeline_mode = #tpu.pipeline_mode<synchronous>, transform_indices = @transform_4, window_bounds = array<i64: 32, 128>}, {pipeline_mode = #tpu.pipeline_mode<synchronous>, transform_indices = @transform_5, window_bounds = array<i64: 8, 64>}]} {
    %c0 = arith.constant 0 : index
    %c0_0 = arith.constant 0 : index
    %0 = vector.load %arg1[%c0, %c0_0] : memref<16x32xf32, #tpu.memory_space<vmem>>, vector<16x32xf32>
    %c0_1 = arith.constant 0 : index
    %c0_2 = arith.constant 0 : index
    %1 = vector.load %arg2[%c0_1, %c0_2] : memref<16x64xf32, #tpu.memory_space<vmem>>, vector<16x32xf32>
    %c0_3 = arith.constant 0 : index
    %c32 = arith.constant 32 : index
    %2 = vector.load %arg2[%c0_3, %c32] : memref<16x64xf32, #tpu.memory_space<vmem>>, vector<16x32xf32>
    %c0_4 = arith.constant 0 : index
    %c0_5 = arith.constant 0 : index
    %3 = vector.load %arg3[%c0_4, %c0_5] : memref<64x64xf32, #tpu.memory_space<vmem>>, vector<64x64xf32>
    %c24 = arith.constant 24 : index
    %c0_6 = arith.constant 0 : index
    %4 = vector.load %arg5[%c24, %c0_6] : memref<32x128xf32, #tpu.memory_space<vmem>>, vector<8x128xf32>
    %c0_7 = arith.constant 0 : index
    %c0_8 = arith.constant 0 : index
    %5 = vector.load %arg5[%c0_7, %c0_8] : memref<32x128xf32, #tpu.memory_space<vmem>>, vector<8x128xf32>
    %6 = arith.mulf %0, %1 : vector<16x32xf32>
    %7 = arith.mulf %0, %2 : vector<16x32xf32>
    %8 = tpu.concatenate %6, %7, %0 in 1 : vector<16x32xf32>, vector<16x32xf32>, vector<16x32xf32> -> vector<16x96xf32>
    %c0_9 = arith.constant 0 : index
    %c0_10 = arith.constant 0 : index
    %9 = vector.load %arg4[%c0_9, %c0_10] : memref<736x128xbf16, #tpu.memory_space<vmem>>, vector<96x96xbf16>
    %10 = arith.truncf %8 : vector<16x96xf32> to vector<16x96xbf16>
    %cst = arith.constant dense<0.000000e+00> : vector<16x96xf32>
    %11 = tpu.matmul %10, %9, %cst {dimension_numbers = #tpu.dot_dimension_numbers<[1], [0], [0], [1], [0, 0, 1, 1], [], []>} : vector<16x96xbf16>, vector<96x96xbf16>, vector<16x96xf32> -> vector<16x96xf32>
    %12 = vector.extract_strided_slice %5 {offsets = [0, 0], sizes = [1, 96], strides = [1, 1]} : vector<8x128xf32> to vector<1x96xf32>
    %13 = vector.broadcast %12 : vector<1x96xf32> to vector<16x96xf32>
    %14 = arith.addf %11, %13 : vector<16x96xf32>
    %15 = vector.extract_strided_slice %14 {offsets = [0, 0], sizes = [16, 32], strides = [1, 1]} : vector<16x96xf32> to vector<16x32xf32>
    %16 = vector.extract_strided_slice %14 {offsets = [0, 32], sizes = [16, 32], strides = [1, 1]} : vector<16x96xf32> to vector<16x32xf32>
    %17 = vector.extract_strided_slice %14 {offsets = [0, 64], sizes = [16, 32], strides = [1, 1]} : vector<16x96xf32> to vector<16x32xf32>
    %18 = vector.extract_strided_slice %15 {offsets = [0, 0], sizes = [16, 8], strides = [1, 1]} : vector<16x32xf32> to vector<16x8xf32>
    %19 = vector.extract_strided_slice %15 {offsets = [0, 8], sizes = [16, 8], strides = [1, 1]} : vector<16x32xf32> to vector<16x8xf32>
    %20 = vector.extract_strided_slice %15 {offsets = [0, 16], sizes = [16, 8], strides = [1, 1]} : vector<16x32xf32> to vector<16x8xf32>
    %21 = vector.extract_strided_slice %15 {offsets = [0, 24], sizes = [16, 8], strides = [1, 1]} : vector<16x32xf32> to vector<16x8xf32>
    %22 = tpu.concatenate %18, %19, %20, %21 in 0 : vector<16x8xf32>, vector<16x8xf32>, vector<16x8xf32>, vector<16x8xf32> -> vector<64x8xf32>
    %23 = vector.extract_strided_slice %16 {offsets = [0, 0], sizes = [16, 8], strides = [1, 1]} : vector<16x32xf32> to vector<16x8xf32>
    %24 = vector.extract_strided_slice %16 {offsets = [0, 8], sizes = [16, 8], strides = [1, 1]} : vector<16x32xf32> to vector<16x8xf32>
    %25 = vector.extract_strided_slice %16 {offsets = [0, 16], sizes = [16, 8], strides = [1, 1]} : vector<16x32xf32> to vector<16x8xf32>
    %26 = vector.extract_strided_slice %16 {offsets = [0, 24], sizes = [16, 8], strides = [1, 1]} : vector<16x32xf32> to vector<16x8xf32>
    %27 = tpu.concatenate %23, %24, %25, %26 in 0 : vector<16x8xf32>, vector<16x8xf32>, vector<16x8xf32>, vector<16x8xf32> -> vector<64x8xf32>
    %28 = vector.extract_strided_slice %17 {offsets = [0, 0], sizes = [16, 8], strides = [1, 1]} : vector<16x32xf32> to vector<16x8xf32>
    %29 = vector.extract_strided_slice %17 {offsets = [0, 8], sizes = [16, 8], strides = [1, 1]} : vector<16x32xf32> to vector<16x8xf32>
    %30 = vector.extract_strided_slice %17 {offsets = [0, 16], sizes = [16, 8], strides = [1, 1]} : vector<16x32xf32> to vector<16x8xf32>
    %31 = vector.extract_strided_slice %17 {offsets = [0, 24], sizes = [16, 8], strides = [1, 1]} : vector<16x32xf32> to vector<16x8xf32>
    %32 = tpu.concatenate %28, %29, %30, %31 in 0 : vector<16x8xf32>, vector<16x8xf32>, vector<16x8xf32>, vector<16x8xf32> -> vector<64x8xf32>
    %33 = arith.truncf %22 : vector<64x8xf32> to vector<64x8xbf16>
    %34 = arith.truncf %27 : vector<64x8xf32> to vector<64x8xbf16>
    %cst_11 = arith.constant dense<0.000000e+00> : vector<64x64xf32>
    %35 = tpu.matmul %33, %34, %cst_11 {dimension_numbers = #tpu.dot_dimension_numbers<[1], [1], [0], [0], [0, 0, 1, 0], [], []>} : vector<64x8xbf16>, vector<64x8xbf16>, vector<64x64xf32> -> vector<64x64xf32>
    %36 = arith.addf %35, %3 : vector<64x64xf32>
    %cst_12 = arith.constant dense<0xFF800000> : vector<64xf32>
    %37 = vector.multi_reduction <maximumf>, %36, %cst_12 [1] : vector<64x64xf32> to vector<64xf32>
    %38 = vector.shape_cast %37 : vector<64xf32> to vector<64x1xf32>
    %39 = vector.broadcast %38 : vector<64x1xf32> to vector<64x64xf32>
    %40 = arith.subf %36, %39 : vector<64x64xf32>
    %41 = math.exp %40 : vector<64x64xf32>
    %cst_13 = arith.constant dense<0.000000e+00> : vector<64xf32>
    %42 = vector.multi_reduction <add>, %41, %cst_13 [1] : vector<64x64xf32> to vector<64xf32>
    %43 = vector.shape_cast %42 : vector<64xf32> to vector<64x1xf32>
    %44 = tpu.reciprocal %43 {approx = true} : vector<64x1xf32> -> vector<64x1xf32>
    %45 = vector.broadcast %44 : vector<64x1xf32> to vector<64x64xf32>
    %46 = arith.mulf %41, %45 : vector<64x64xf32>
    %47 = arith.truncf %46 : vector<64x64xf32> to vector<64x64xbf16>
    %48 = arith.truncf %32 : vector<64x8xf32> to vector<64x8xbf16>
    %cst_14 = arith.constant dense<0.000000e+00> : vector<64x8xf32>
    %49 = tpu.matmul %47, %48, %cst_14 {dimension_numbers = #tpu.dot_dimension_numbers<[1], [0], [0], [1], [0, 0, 1, 1], [], []>} : vector<64x64xbf16>, vector<64x8xbf16>, vector<64x8xf32> -> vector<64x8xf32>
    %50 = vector.extract_strided_slice %49 {offsets = [0, 0], sizes = [16, 8], strides = [1, 1]} : vector<64x8xf32> to vector<16x8xf32>
    %51 = vector.extract_strided_slice %49 {offsets = [16, 0], sizes = [16, 8], strides = [1, 1]} : vector<64x8xf32> to vector<16x8xf32>
    %52 = vector.extract_strided_slice %49 {offsets = [32, 0], sizes = [16, 8], strides = [1, 1]} : vector<64x8xf32> to vector<16x8xf32>
    %53 = vector.extract_strided_slice %49 {offsets = [48, 0], sizes = [16, 8], strides = [1, 1]} : vector<64x8xf32> to vector<16x8xf32>
    %54 = tpu.concatenate %50, %51, %52, %53 in 1 : vector<16x8xf32>, vector<16x8xf32>, vector<16x8xf32>, vector<16x8xf32> -> vector<16x32xf32>
    %c96 = arith.constant 96 : index
    %c0_15 = arith.constant 0 : index
    %55 = vector.load %arg4[%c96, %c0_15] : memref<736x128xbf16, #tpu.memory_space<vmem>>, vector<32x32xbf16>
    %56 = arith.truncf %54 : vector<16x32xf32> to vector<16x32xbf16>
    %cst_16 = arith.constant dense<0.000000e+00> : vector<16x32xf32>
    %57 = tpu.matmul %56, %55, %cst_16 {dimension_numbers = #tpu.dot_dimension_numbers<[1], [0], [0], [1], [0, 0, 1, 1], [], []>} : vector<16x32xbf16>, vector<32x32xbf16>, vector<16x32xf32> -> vector<16x32xf32>
    %58 = vector.extract_strided_slice %5 {offsets = [1, 0], sizes = [1, 32], strides = [1, 1]} : vector<8x128xf32> to vector<1x32xf32>
    %59 = vector.broadcast %58 : vector<1x32xf32> to vector<16x32xf32>
    %60 = arith.addf %57, %59 : vector<16x32xf32>
    %61 = arith.addf %0, %60 : vector<16x32xf32>
    %62 = vector.extract_strided_slice %5 {offsets = [2, 0], sizes = [1, 32], strides = [1, 1]} : vector<8x128xf32> to vector<1x32xf32>
    %63 = vector.extract_strided_slice %5 {offsets = [3, 0], sizes = [1, 32], strides = [1, 1]} : vector<8x128xf32> to vector<1x32xf32>
    %cst_17 = arith.constant dense<0.000000e+00> : vector<16xf32>
    %64 = vector.multi_reduction <add>, %61, %cst_17 [1] : vector<16x32xf32> to vector<16xf32>
    %65 = vector.shape_cast %64 : vector<16xf32> to vector<16x1xf32>
    %cst_18 = arith.constant 3.200000e+01 : f32
    %66 = vector.broadcast %cst_18 : f32 to vector<16x1xf32>
    %67 = arith.divf %65, %66 : vector<16x1xf32>
    %68 = vector.broadcast %67 : vector<16x1xf32> to vector<16x32xf32>
    %69 = arith.subf %61, %68 : vector<16x32xf32>
    %70 = arith.mulf %69, %69 : vector<16x32xf32>
    %cst_19 = arith.constant dense<0.000000e+00> : vector<16xf32>
    %71 = vector.multi_reduction <add>, %70, %cst_19 [1] : vector<16x32xf32> to vector<16xf32>
    %72 = vector.shape_cast %71 : vector<16xf32> to vector<16x1xf32>
    %cst_20 = arith.constant 3.200000e+01 : f32
    %73 = vector.broadcast %cst_20 : f32 to vector<16x1xf32>
    %74 = arith.divf %72, %73 : vector<16x1xf32>
    %cst_21 = arith.constant 9.99999974E-6 : f32
    %75 = vector.broadcast %cst_21 : f32 to vector<16x1xf32>
    %76 = arith.addf %74, %75 : vector<16x1xf32>
    %77 = math.rsqrt %76 : vector<16x1xf32>
    %78 = vector.broadcast %77 : vector<16x1xf32> to vector<16x32xf32>
    %79 = arith.mulf %69, %78 : vector<16x32xf32>
    %80 = vector.broadcast %62 : vector<1x32xf32> to vector<16x32xf32>
    %81 = arith.mulf %79, %80 : vector<16x32xf32>
    %82 = vector.broadcast %63 : vector<1x32xf32> to vector<16x32xf32>
    %83 = arith.addf %81, %82 : vector<16x32xf32>
    %c128 = arith.constant 128 : index
    %c0_22 = arith.constant 0 : index
    %84 = vector.load %arg4[%c128, %c0_22] : memref<736x128xbf16, #tpu.memory_space<vmem>>, vector<32x64xbf16>
    %85 = arith.truncf %83 : vector<16x32xf32> to vector<16x32xbf16>
    %cst_23 = arith.constant dense<0.000000e+00> : vector<16x64xf32>
    %86 = tpu.matmul %85, %84, %cst_23 {dimension_numbers = #tpu.dot_dimension_numbers<[1], [0], [0], [1], [0, 0, 1, 1], [], []>} : vector<16x32xbf16>, vector<32x64xbf16>, vector<16x64xf32> -> vector<16x64xf32>
    %87 = vector.extract_strided_slice %5 {offsets = [4, 0], sizes = [1, 64], strides = [1, 1]} : vector<8x128xf32> to vector<1x64xf32>
    %88 = vector.broadcast %87 : vector<1x64xf32> to vector<16x64xf32>
    %89 = arith.addf %86, %88 : vector<16x64xf32>
    %cst_24 = arith.constant 0.000000e+00 : f32
    %90 = vector.broadcast %cst_24 : f32 to vector<16x64xf32>
    %91 = arith.maximumf %89, %90 : vector<16x64xf32>
    %c160 = arith.constant 160 : index
    %c0_25 = arith.constant 0 : index
    %92 = vector.load %arg4[%c160, %c0_25] : memref<736x128xbf16, #tpu.memory_space<vmem>>, vector<64x32xbf16>
    %93 = arith.truncf %91 : vector<16x64xf32> to vector<16x64xbf16>
    %cst_26 = arith.constant dense<0.000000e+00> : vector<16x32xf32>
    %94 = tpu.matmul %93, %92, %cst_26 {dimension_numbers = #tpu.dot_dimension_numbers<[1], [0], [0], [1], [0, 0, 1, 1], [], []>} : vector<16x64xbf16>, vector<64x32xbf16>, vector<16x32xf32> -> vector<16x32xf32>
    %95 = vector.extract_strided_slice %5 {offsets = [5, 0], sizes = [1, 32], strides = [1, 1]} : vector<8x128xf32> to vector<1x32xf32>
    %96 = vector.broadcast %95 : vector<1x32xf32> to vector<16x32xf32>
    %97 = arith.addf %94, %96 : vector<16x32xf32>
    %98 = arith.addf %83, %97 : vector<16x32xf32>
    %99 = vector.extract_strided_slice %5 {offsets = [6, 0], sizes = [1, 32], strides = [1, 1]} : vector<8x128xf32> to vector<1x32xf32>
    %100 = vector.extract_strided_slice %5 {offsets = [7, 0], sizes = [1, 32], strides = [1, 1]} : vector<8x128xf32> to vector<1x32xf32>
    %cst_27 = arith.constant dense<0.000000e+00> : vector<16xf32>
    %101 = vector.multi_reduction <add>, %98, %cst_27 [1] : vector<16x32xf32> to vector<16xf32>
    %102 = vector.shape_cast %101 : vector<16xf32> to vector<16x1xf32>
    %cst_28 = arith.constant 3.200000e+01 : f32
    %103 = vector.broadcast %cst_28 : f32 to vector<16x1xf32>
    %104 = arith.divf %102, %103 : vector<16x1xf32>
    %105 = vector.broadcast %104 : vector<16x1xf32> to vector<16x32xf32>
    %106 = arith.subf %98, %105 : vector<16x32xf32>
    %107 = arith.mulf %106, %106 : vector<16x32xf32>
    %cst_29 = arith.constant dense<0.000000e+00> : vector<16xf32>
    %108 = vector.multi_reduction <add>, %107, %cst_29 [1] : vector<16x32xf32> to vector<16xf32>
    %109 = vector.shape_cast %108 : vector<16xf32> to vector<16x1xf32>
    %cst_30 = arith.constant 3.200000e+01 : f32
    %110 = vector.broadcast %cst_30 : f32 to vector<16x1xf32>
    %111 = arith.divf %109, %110 : vector<16x1xf32>
    %cst_31 = arith.constant 9.99999974E-6 : f32
    %112 = vector.broadcast %cst_31 : f32 to vector<16x1xf32>
    %113 = arith.addf %111, %112 : vector<16x1xf32>
    %114 = math.rsqrt %113 : vector<16x1xf32>
    %115 = vector.broadcast %114 : vector<16x1xf32> to vector<16x32xf32>
    %116 = arith.mulf %106, %115 : vector<16x32xf32>
    %117 = vector.broadcast %99 : vector<1x32xf32> to vector<16x32xf32>
    %118 = arith.mulf %116, %117 : vector<16x32xf32>
    %119 = vector.broadcast %100 : vector<1x32xf32> to vector<16x32xf32>
    %120 = arith.addf %118, %119 : vector<16x32xf32>
    %c8 = arith.constant 8 : index
    %c0_32 = arith.constant 0 : index
    %121 = vector.load %arg5[%c8, %c0_32] : memref<32x128xf32, #tpu.memory_space<vmem>>, vector<8x128xf32>
    %122 = arith.mulf %120, %1 : vector<16x32xf32>
    %123 = arith.mulf %120, %2 : vector<16x32xf32>
    %124 = tpu.concatenate %122, %123, %120 in 1 : vector<16x32xf32>, vector<16x32xf32>, vector<16x32xf32> -> vector<16x96xf32>
    %c224 = arith.constant 224 : index
    %c0_33 = arith.constant 0 : index
    %125 = vector.load %arg4[%c224, %c0_33] : memref<736x128xbf16, #tpu.memory_space<vmem>>, vector<96x96xbf16>
    %126 = arith.truncf %124 : vector<16x96xf32> to vector<16x96xbf16>
    %cst_34 = arith.constant dense<0.000000e+00> : vector<16x96xf32>
    %127 = tpu.matmul %126, %125, %cst_34 {dimension_numbers = #tpu.dot_dimension_numbers<[1], [0], [0], [1], [0, 0, 1, 1], [], []>} : vector<16x96xbf16>, vector<96x96xbf16>, vector<16x96xf32> -> vector<16x96xf32>
    %128 = vector.extract_strided_slice %121 {offsets = [0, 0], sizes = [1, 96], strides = [1, 1]} : vector<8x128xf32> to vector<1x96xf32>
    %129 = vector.broadcast %128 : vector<1x96xf32> to vector<16x96xf32>
    %130 = arith.addf %127, %129 : vector<16x96xf32>
    %131 = vector.extract_strided_slice %130 {offsets = [0, 0], sizes = [16, 32], strides = [1, 1]} : vector<16x96xf32> to vector<16x32xf32>
    %132 = vector.extract_strided_slice %130 {offsets = [0, 32], sizes = [16, 32], strides = [1, 1]} : vector<16x96xf32> to vector<16x32xf32>
    %133 = vector.extract_strided_slice %130 {offsets = [0, 64], sizes = [16, 32], strides = [1, 1]} : vector<16x96xf32> to vector<16x32xf32>
    %134 = vector.extract_strided_slice %131 {offsets = [0, 0], sizes = [16, 8], strides = [1, 1]} : vector<16x32xf32> to vector<16x8xf32>
    %135 = vector.extract_strided_slice %131 {offsets = [0, 8], sizes = [16, 8], strides = [1, 1]} : vector<16x32xf32> to vector<16x8xf32>
    %136 = vector.extract_strided_slice %131 {offsets = [0, 16], sizes = [16, 8], strides = [1, 1]} : vector<16x32xf32> to vector<16x8xf32>
    %137 = vector.extract_strided_slice %131 {offsets = [0, 24], sizes = [16, 8], strides = [1, 1]} : vector<16x32xf32> to vector<16x8xf32>
    %138 = tpu.concatenate %134, %135, %136, %137 in 0 : vector<16x8xf32>, vector<16x8xf32>, vector<16x8xf32>, vector<16x8xf32> -> vector<64x8xf32>
    %139 = vector.extract_strided_slice %132 {offsets = [0, 0], sizes = [16, 8], strides = [1, 1]} : vector<16x32xf32> to vector<16x8xf32>
    %140 = vector.extract_strided_slice %132 {offsets = [0, 8], sizes = [16, 8], strides = [1, 1]} : vector<16x32xf32> to vector<16x8xf32>
    %141 = vector.extract_strided_slice %132 {offsets = [0, 16], sizes = [16, 8], strides = [1, 1]} : vector<16x32xf32> to vector<16x8xf32>
    %142 = vector.extract_strided_slice %132 {offsets = [0, 24], sizes = [16, 8], strides = [1, 1]} : vector<16x32xf32> to vector<16x8xf32>
    %143 = tpu.concatenate %139, %140, %141, %142 in 0 : vector<16x8xf32>, vector<16x8xf32>, vector<16x8xf32>, vector<16x8xf32> -> vector<64x8xf32>
    %144 = vector.extract_strided_slice %133 {offsets = [0, 0], sizes = [16, 8], strides = [1, 1]} : vector<16x32xf32> to vector<16x8xf32>
    %145 = vector.extract_strided_slice %133 {offsets = [0, 8], sizes = [16, 8], strides = [1, 1]} : vector<16x32xf32> to vector<16x8xf32>
    %146 = vector.extract_strided_slice %133 {offsets = [0, 16], sizes = [16, 8], strides = [1, 1]} : vector<16x32xf32> to vector<16x8xf32>
    %147 = vector.extract_strided_slice %133 {offsets = [0, 24], sizes = [16, 8], strides = [1, 1]} : vector<16x32xf32> to vector<16x8xf32>
    %148 = tpu.concatenate %144, %145, %146, %147 in 0 : vector<16x8xf32>, vector<16x8xf32>, vector<16x8xf32>, vector<16x8xf32> -> vector<64x8xf32>
    %149 = arith.truncf %138 : vector<64x8xf32> to vector<64x8xbf16>
    %150 = arith.truncf %143 : vector<64x8xf32> to vector<64x8xbf16>
    %cst_35 = arith.constant dense<0.000000e+00> : vector<64x64xf32>
    %151 = tpu.matmul %149, %150, %cst_35 {dimension_numbers = #tpu.dot_dimension_numbers<[1], [1], [0], [0], [0, 0, 1, 0], [], []>} : vector<64x8xbf16>, vector<64x8xbf16>, vector<64x64xf32> -> vector<64x64xf32>
    %152 = arith.addf %151, %3 : vector<64x64xf32>
    %cst_36 = arith.constant dense<0xFF800000> : vector<64xf32>
    %153 = vector.multi_reduction <maximumf>, %152, %cst_36 [1] : vector<64x64xf32> to vector<64xf32>
    %154 = vector.shape_cast %153 : vector<64xf32> to vector<64x1xf32>
    %155 = vector.broadcast %154 : vector<64x1xf32> to vector<64x64xf32>
    %156 = arith.subf %152, %155 : vector<64x64xf32>
    %157 = math.exp %156 : vector<64x64xf32>
    %cst_37 = arith.constant dense<0.000000e+00> : vector<64xf32>
    %158 = vector.multi_reduction <add>, %157, %cst_37 [1] : vector<64x64xf32> to vector<64xf32>
    %159 = vector.shape_cast %158 : vector<64xf32> to vector<64x1xf32>
    %160 = tpu.reciprocal %159 {approx = true} : vector<64x1xf32> -> vector<64x1xf32>
    %161 = vector.broadcast %160 : vector<64x1xf32> to vector<64x64xf32>
    %162 = arith.mulf %157, %161 : vector<64x64xf32>
    %163 = arith.truncf %162 : vector<64x64xf32> to vector<64x64xbf16>
    %164 = arith.truncf %148 : vector<64x8xf32> to vector<64x8xbf16>
    %cst_38 = arith.constant dense<0.000000e+00> : vector<64x8xf32>
    %165 = tpu.matmul %163, %164, %cst_38 {dimension_numbers = #tpu.dot_dimension_numbers<[1], [0], [0], [1], [0, 0, 1, 1], [], []>} : vector<64x64xbf16>, vector<64x8xbf16>, vector<64x8xf32> -> vector<64x8xf32>
    %166 = vector.extract_strided_slice %165 {offsets = [0, 0], sizes = [16, 8], strides = [1, 1]} : vector<64x8xf32> to vector<16x8xf32>
    %167 = vector.extract_strided_slice %165 {offsets = [16, 0], sizes = [16, 8], strides = [1, 1]} : vector<64x8xf32> to vector<16x8xf32>
    %168 = vector.extract_strided_slice %165 {offsets = [32, 0], sizes = [16, 8], strides = [1, 1]} : vector<64x8xf32> to vector<16x8xf32>
    %169 = vector.extract_strided_slice %165 {offsets = [48, 0], sizes = [16, 8], strides = [1, 1]} : vector<64x8xf32> to vector<16x8xf32>
    %170 = tpu.concatenate %166, %167, %168, %169 in 1 : vector<16x8xf32>, vector<16x8xf32>, vector<16x8xf32>, vector<16x8xf32> -> vector<16x32xf32>
    %c320 = arith.constant 320 : index
    %c0_39 = arith.constant 0 : index
    %171 = vector.load %arg4[%c320, %c0_39] : memref<736x128xbf16, #tpu.memory_space<vmem>>, vector<32x32xbf16>
    %172 = arith.truncf %170 : vector<16x32xf32> to vector<16x32xbf16>
    %cst_40 = arith.constant dense<0.000000e+00> : vector<16x32xf32>
    %173 = tpu.matmul %172, %171, %cst_40 {dimension_numbers = #tpu.dot_dimension_numbers<[1], [0], [0], [1], [0, 0, 1, 1], [], []>} : vector<16x32xbf16>, vector<32x32xbf16>, vector<16x32xf32> -> vector<16x32xf32>
    %174 = vector.extract_strided_slice %121 {offsets = [1, 0], sizes = [1, 32], strides = [1, 1]} : vector<8x128xf32> to vector<1x32xf32>
    %175 = vector.broadcast %174 : vector<1x32xf32> to vector<16x32xf32>
    %176 = arith.addf %173, %175 : vector<16x32xf32>
    %177 = arith.addf %120, %176 : vector<16x32xf32>
    %178 = vector.extract_strided_slice %121 {offsets = [2, 0], sizes = [1, 32], strides = [1, 1]} : vector<8x128xf32> to vector<1x32xf32>
    %179 = vector.extract_strided_slice %121 {offsets = [3, 0], sizes = [1, 32], strides = [1, 1]} : vector<8x128xf32> to vector<1x32xf32>
    %cst_41 = arith.constant dense<0.000000e+00> : vector<16xf32>
    %180 = vector.multi_reduction <add>, %177, %cst_41 [1] : vector<16x32xf32> to vector<16xf32>
    %181 = vector.shape_cast %180 : vector<16xf32> to vector<16x1xf32>
    %cst_42 = arith.constant 3.200000e+01 : f32
    %182 = vector.broadcast %cst_42 : f32 to vector<16x1xf32>
    %183 = arith.divf %181, %182 : vector<16x1xf32>
    %184 = vector.broadcast %183 : vector<16x1xf32> to vector<16x32xf32>
    %185 = arith.subf %177, %184 : vector<16x32xf32>
    %186 = arith.mulf %185, %185 : vector<16x32xf32>
    %cst_43 = arith.constant dense<0.000000e+00> : vector<16xf32>
    %187 = vector.multi_reduction <add>, %186, %cst_43 [1] : vector<16x32xf32> to vector<16xf32>
    %188 = vector.shape_cast %187 : vector<16xf32> to vector<16x1xf32>
    %cst_44 = arith.constant 3.200000e+01 : f32
    %189 = vector.broadcast %cst_44 : f32 to vector<16x1xf32>
    %190 = arith.divf %188, %189 : vector<16x1xf32>
    %cst_45 = arith.constant 9.99999974E-6 : f32
    %191 = vector.broadcast %cst_45 : f32 to vector<16x1xf32>
    %192 = arith.addf %190, %191 : vector<16x1xf32>
    %193 = math.rsqrt %192 : vector<16x1xf32>
    %194 = vector.broadcast %193 : vector<16x1xf32> to vector<16x32xf32>
    %195 = arith.mulf %185, %194 : vector<16x32xf32>
    %196 = vector.broadcast %178 : vector<1x32xf32> to vector<16x32xf32>
    %197 = arith.mulf %195, %196 : vector<16x32xf32>
    %198 = vector.broadcast %179 : vector<1x32xf32> to vector<16x32xf32>
    %199 = arith.addf %197, %198 : vector<16x32xf32>
    %c352 = arith.constant 352 : index
    %c0_46 = arith.constant 0 : index
    %200 = vector.load %arg4[%c352, %c0_46] : memref<736x128xbf16, #tpu.memory_space<vmem>>, vector<32x64xbf16>
    %201 = arith.truncf %199 : vector<16x32xf32> to vector<16x32xbf16>
    %cst_47 = arith.constant dense<0.000000e+00> : vector<16x64xf32>
    %202 = tpu.matmul %201, %200, %cst_47 {dimension_numbers = #tpu.dot_dimension_numbers<[1], [0], [0], [1], [0, 0, 1, 1], [], []>} : vector<16x32xbf16>, vector<32x64xbf16>, vector<16x64xf32> -> vector<16x64xf32>
    %203 = vector.extract_strided_slice %121 {offsets = [4, 0], sizes = [1, 64], strides = [1, 1]} : vector<8x128xf32> to vector<1x64xf32>
    %204 = vector.broadcast %203 : vector<1x64xf32> to vector<16x64xf32>
    %205 = arith.addf %202, %204 : vector<16x64xf32>
    %cst_48 = arith.constant 0.000000e+00 : f32
    %206 = vector.broadcast %cst_48 : f32 to vector<16x64xf32>
    %207 = arith.maximumf %205, %206 : vector<16x64xf32>
    %c384 = arith.constant 384 : index
    %c0_49 = arith.constant 0 : index
    %208 = vector.load %arg4[%c384, %c0_49] : memref<736x128xbf16, #tpu.memory_space<vmem>>, vector<64x32xbf16>
    %209 = arith.truncf %207 : vector<16x64xf32> to vector<16x64xbf16>
    %cst_50 = arith.constant dense<0.000000e+00> : vector<16x32xf32>
    %210 = tpu.matmul %209, %208, %cst_50 {dimension_numbers = #tpu.dot_dimension_numbers<[1], [0], [0], [1], [0, 0, 1, 1], [], []>} : vector<16x64xbf16>, vector<64x32xbf16>, vector<16x32xf32> -> vector<16x32xf32>
    %211 = vector.extract_strided_slice %121 {offsets = [5, 0], sizes = [1, 32], strides = [1, 1]} : vector<8x128xf32> to vector<1x32xf32>
    %212 = vector.broadcast %211 : vector<1x32xf32> to vector<16x32xf32>
    %213 = arith.addf %210, %212 : vector<16x32xf32>
    %214 = arith.addf %199, %213 : vector<16x32xf32>
    %215 = vector.extract_strided_slice %121 {offsets = [6, 0], sizes = [1, 32], strides = [1, 1]} : vector<8x128xf32> to vector<1x32xf32>
    %216 = vector.extract_strided_slice %121 {offsets = [7, 0], sizes = [1, 32], strides = [1, 1]} : vector<8x128xf32> to vector<1x32xf32>
    %cst_51 = arith.constant dense<0.000000e+00> : vector<16xf32>
    %217 = vector.multi_reduction <add>, %214, %cst_51 [1] : vector<16x32xf32> to vector<16xf32>
    %218 = vector.shape_cast %217 : vector<16xf32> to vector<16x1xf32>
    %cst_52 = arith.constant 3.200000e+01 : f32
    %219 = vector.broadcast %cst_52 : f32 to vector<16x1xf32>
    %220 = arith.divf %218, %219 : vector<16x1xf32>
    %221 = vector.broadcast %220 : vector<16x1xf32> to vector<16x32xf32>
    %222 = arith.subf %214, %221 : vector<16x32xf32>
    %223 = arith.mulf %222, %222 : vector<16x32xf32>
    %cst_53 = arith.constant dense<0.000000e+00> : vector<16xf32>
    %224 = vector.multi_reduction <add>, %223, %cst_53 [1] : vector<16x32xf32> to vector<16xf32>
    %225 = vector.shape_cast %224 : vector<16xf32> to vector<16x1xf32>
    %cst_54 = arith.constant 3.200000e+01 : f32
    %226 = vector.broadcast %cst_54 : f32 to vector<16x1xf32>
    %227 = arith.divf %225, %226 : vector<16x1xf32>
    %cst_55 = arith.constant 9.99999974E-6 : f32
    %228 = vector.broadcast %cst_55 : f32 to vector<16x1xf32>
    %229 = arith.addf %227, %228 : vector<16x1xf32>
    %230 = math.rsqrt %229 : vector<16x1xf32>
    %231 = vector.broadcast %230 : vector<16x1xf32> to vector<16x32xf32>
    %232 = arith.mulf %222, %231 : vector<16x32xf32>
    %233 = vector.broadcast %215 : vector<1x32xf32> to vector<16x32xf32>
    %234 = arith.mulf %232, %233 : vector<16x32xf32>
    %235 = vector.broadcast %216 : vector<1x32xf32> to vector<16x32xf32>
    %236 = arith.addf %234, %235 : vector<16x32xf32>
    %237 = tpu.concatenate %236, %120 in 1 : vector<16x32xf32>, vector<16x32xf32> -> vector<16x64xf32>
    %c672 = arith.constant 672 : index
    %c0_56 = arith.constant 0 : index
    %238 = vector.load %arg4[%c672, %c0_56] : memref<736x128xbf16, #tpu.memory_space<vmem>>, vector<64x32xbf16>
    %239 = arith.truncf %237 : vector<16x64xf32> to vector<16x64xbf16>
    %cst_57 = arith.constant dense<0.000000e+00> : vector<16x32xf32>
    %240 = tpu.matmul %239, %238, %cst_57 {dimension_numbers = #tpu.dot_dimension_numbers<[1], [0], [0], [1], [0, 0, 1, 1], [], []>} : vector<16x64xbf16>, vector<64x32xbf16>, vector<16x32xf32> -> vector<16x32xf32>
    %241 = vector.extract_strided_slice %4 {offsets = [0, 0], sizes = [1, 32], strides = [1, 1]} : vector<8x128xf32> to vector<1x32xf32>
    %242 = vector.broadcast %241 : vector<1x32xf32> to vector<16x32xf32>
    %243 = arith.addf %240, %242 : vector<16x32xf32>
    %c16 = arith.constant 16 : index
    %c0_58 = arith.constant 0 : index
    %244 = vector.load %arg5[%c16, %c0_58] : memref<32x128xf32, #tpu.memory_space<vmem>>, vector<8x128xf32>
    %245 = arith.mulf %243, %1 : vector<16x32xf32>
    %246 = arith.mulf %243, %2 : vector<16x32xf32>
    %247 = tpu.concatenate %245, %246, %243 in 1 : vector<16x32xf32>, vector<16x32xf32>, vector<16x32xf32> -> vector<16x96xf32>
    %c448 = arith.constant 448 : index
    %c0_59 = arith.constant 0 : index
    %248 = vector.load %arg4[%c448, %c0_59] : memref<736x128xbf16, #tpu.memory_space<vmem>>, vector<96x96xbf16>
    %249 = arith.truncf %247 : vector<16x96xf32> to vector<16x96xbf16>
    %cst_60 = arith.constant dense<0.000000e+00> : vector<16x96xf32>
    %250 = tpu.matmul %249, %248, %cst_60 {dimension_numbers = #tpu.dot_dimension_numbers<[1], [0], [0], [1], [0, 0, 1, 1], [], []>} : vector<16x96xbf16>, vector<96x96xbf16>, vector<16x96xf32> -> vector<16x96xf32>
    %251 = vector.extract_strided_slice %244 {offsets = [0, 0], sizes = [1, 96], strides = [1, 1]} : vector<8x128xf32> to vector<1x96xf32>
    %252 = vector.broadcast %251 : vector<1x96xf32> to vector<16x96xf32>
    %253 = arith.addf %250, %252 : vector<16x96xf32>
    %254 = vector.extract_strided_slice %253 {offsets = [0, 0], sizes = [16, 32], strides = [1, 1]} : vector<16x96xf32> to vector<16x32xf32>
    %255 = vector.extract_strided_slice %253 {offsets = [0, 32], sizes = [16, 32], strides = [1, 1]} : vector<16x96xf32> to vector<16x32xf32>
    %256 = vector.extract_strided_slice %253 {offsets = [0, 64], sizes = [16, 32], strides = [1, 1]} : vector<16x96xf32> to vector<16x32xf32>
    %257 = vector.extract_strided_slice %254 {offsets = [0, 0], sizes = [16, 8], strides = [1, 1]} : vector<16x32xf32> to vector<16x8xf32>
    %258 = vector.extract_strided_slice %254 {offsets = [0, 8], sizes = [16, 8], strides = [1, 1]} : vector<16x32xf32> to vector<16x8xf32>
    %259 = vector.extract_strided_slice %254 {offsets = [0, 16], sizes = [16, 8], strides = [1, 1]} : vector<16x32xf32> to vector<16x8xf32>
    %260 = vector.extract_strided_slice %254 {offsets = [0, 24], sizes = [16, 8], strides = [1, 1]} : vector<16x32xf32> to vector<16x8xf32>
    %261 = tpu.concatenate %257, %258, %259, %260 in 0 : vector<16x8xf32>, vector<16x8xf32>, vector<16x8xf32>, vector<16x8xf32> -> vector<64x8xf32>
    %262 = vector.extract_strided_slice %255 {offsets = [0, 0], sizes = [16, 8], strides = [1, 1]} : vector<16x32xf32> to vector<16x8xf32>
    %263 = vector.extract_strided_slice %255 {offsets = [0, 8], sizes = [16, 8], strides = [1, 1]} : vector<16x32xf32> to vector<16x8xf32>
    %264 = vector.extract_strided_slice %255 {offsets = [0, 16], sizes = [16, 8], strides = [1, 1]} : vector<16x32xf32> to vector<16x8xf32>
    %265 = vector.extract_strided_slice %255 {offsets = [0, 24], sizes = [16, 8], strides = [1, 1]} : vector<16x32xf32> to vector<16x8xf32>
    %266 = tpu.concatenate %262, %263, %264, %265 in 0 : vector<16x8xf32>, vector<16x8xf32>, vector<16x8xf32>, vector<16x8xf32> -> vector<64x8xf32>
    %267 = vector.extract_strided_slice %256 {offsets = [0, 0], sizes = [16, 8], strides = [1, 1]} : vector<16x32xf32> to vector<16x8xf32>
    %268 = vector.extract_strided_slice %256 {offsets = [0, 8], sizes = [16, 8], strides = [1, 1]} : vector<16x32xf32> to vector<16x8xf32>
    %269 = vector.extract_strided_slice %256 {offsets = [0, 16], sizes = [16, 8], strides = [1, 1]} : vector<16x32xf32> to vector<16x8xf32>
    %270 = vector.extract_strided_slice %256 {offsets = [0, 24], sizes = [16, 8], strides = [1, 1]} : vector<16x32xf32> to vector<16x8xf32>
    %271 = tpu.concatenate %267, %268, %269, %270 in 0 : vector<16x8xf32>, vector<16x8xf32>, vector<16x8xf32>, vector<16x8xf32> -> vector<64x8xf32>
    %272 = arith.truncf %261 : vector<64x8xf32> to vector<64x8xbf16>
    %273 = arith.truncf %266 : vector<64x8xf32> to vector<64x8xbf16>
    %cst_61 = arith.constant dense<0.000000e+00> : vector<64x64xf32>
    %274 = tpu.matmul %272, %273, %cst_61 {dimension_numbers = #tpu.dot_dimension_numbers<[1], [1], [0], [0], [0, 0, 1, 0], [], []>} : vector<64x8xbf16>, vector<64x8xbf16>, vector<64x64xf32> -> vector<64x64xf32>
    %275 = arith.addf %274, %3 : vector<64x64xf32>
    %cst_62 = arith.constant dense<0xFF800000> : vector<64xf32>
    %276 = vector.multi_reduction <maximumf>, %275, %cst_62 [1] : vector<64x64xf32> to vector<64xf32>
    %277 = vector.shape_cast %276 : vector<64xf32> to vector<64x1xf32>
    %278 = vector.broadcast %277 : vector<64x1xf32> to vector<64x64xf32>
    %279 = arith.subf %275, %278 : vector<64x64xf32>
    %280 = math.exp %279 : vector<64x64xf32>
    %cst_63 = arith.constant dense<0.000000e+00> : vector<64xf32>
    %281 = vector.multi_reduction <add>, %280, %cst_63 [1] : vector<64x64xf32> to vector<64xf32>
    %282 = vector.shape_cast %281 : vector<64xf32> to vector<64x1xf32>
    %283 = tpu.reciprocal %282 {approx = true} : vector<64x1xf32> -> vector<64x1xf32>
    %284 = vector.broadcast %283 : vector<64x1xf32> to vector<64x64xf32>
    %285 = arith.mulf %280, %284 : vector<64x64xf32>
    %286 = arith.truncf %285 : vector<64x64xf32> to vector<64x64xbf16>
    %287 = arith.truncf %271 : vector<64x8xf32> to vector<64x8xbf16>
    %cst_64 = arith.constant dense<0.000000e+00> : vector<64x8xf32>
    %288 = tpu.matmul %286, %287, %cst_64 {dimension_numbers = #tpu.dot_dimension_numbers<[1], [0], [0], [1], [0, 0, 1, 1], [], []>} : vector<64x64xbf16>, vector<64x8xbf16>, vector<64x8xf32> -> vector<64x8xf32>
    %289 = vector.extract_strided_slice %288 {offsets = [0, 0], sizes = [16, 8], strides = [1, 1]} : vector<64x8xf32> to vector<16x8xf32>
    %290 = vector.extract_strided_slice %288 {offsets = [16, 0], sizes = [16, 8], strides = [1, 1]} : vector<64x8xf32> to vector<16x8xf32>
    %291 = vector.extract_strided_slice %288 {offsets = [32, 0], sizes = [16, 8], strides = [1, 1]} : vector<64x8xf32> to vector<16x8xf32>
    %292 = vector.extract_strided_slice %288 {offsets = [48, 0], sizes = [16, 8], strides = [1, 1]} : vector<64x8xf32> to vector<16x8xf32>
    %293 = tpu.concatenate %289, %290, %291, %292 in 1 : vector<16x8xf32>, vector<16x8xf32>, vector<16x8xf32>, vector<16x8xf32> -> vector<16x32xf32>
    %c544 = arith.constant 544 : index
    %c0_65 = arith.constant 0 : index
    %294 = vector.load %arg4[%c544, %c0_65] : memref<736x128xbf16, #tpu.memory_space<vmem>>, vector<32x32xbf16>
    %295 = arith.truncf %293 : vector<16x32xf32> to vector<16x32xbf16>
    %cst_66 = arith.constant dense<0.000000e+00> : vector<16x32xf32>
    %296 = tpu.matmul %295, %294, %cst_66 {dimension_numbers = #tpu.dot_dimension_numbers<[1], [0], [0], [1], [0, 0, 1, 1], [], []>} : vector<16x32xbf16>, vector<32x32xbf16>, vector<16x32xf32> -> vector<16x32xf32>
    %297 = vector.extract_strided_slice %244 {offsets = [1, 0], sizes = [1, 32], strides = [1, 1]} : vector<8x128xf32> to vector<1x32xf32>
    %298 = vector.broadcast %297 : vector<1x32xf32> to vector<16x32xf32>
    %299 = arith.addf %296, %298 : vector<16x32xf32>
    %300 = arith.addf %243, %299 : vector<16x32xf32>
    %301 = vector.extract_strided_slice %244 {offsets = [2, 0], sizes = [1, 32], strides = [1, 1]} : vector<8x128xf32> to vector<1x32xf32>
    %302 = vector.extract_strided_slice %244 {offsets = [3, 0], sizes = [1, 32], strides = [1, 1]} : vector<8x128xf32> to vector<1x32xf32>
    %cst_67 = arith.constant dense<0.000000e+00> : vector<16xf32>
    %303 = vector.multi_reduction <add>, %300, %cst_67 [1] : vector<16x32xf32> to vector<16xf32>
    %304 = vector.shape_cast %303 : vector<16xf32> to vector<16x1xf32>
    %cst_68 = arith.constant 3.200000e+01 : f32
    %305 = vector.broadcast %cst_68 : f32 to vector<16x1xf32>
    %306 = arith.divf %304, %305 : vector<16x1xf32>
    %307 = vector.broadcast %306 : vector<16x1xf32> to vector<16x32xf32>
    %308 = arith.subf %300, %307 : vector<16x32xf32>
    %309 = arith.mulf %308, %308 : vector<16x32xf32>
    %cst_69 = arith.constant dense<0.000000e+00> : vector<16xf32>
    %310 = vector.multi_reduction <add>, %309, %cst_69 [1] : vector<16x32xf32> to vector<16xf32>
    %311 = vector.shape_cast %310 : vector<16xf32> to vector<16x1xf32>
    %cst_70 = arith.constant 3.200000e+01 : f32
    %312 = vector.broadcast %cst_70 : f32 to vector<16x1xf32>
    %313 = arith.divf %311, %312 : vector<16x1xf32>
    %cst_71 = arith.constant 9.99999974E-6 : f32
    %314 = vector.broadcast %cst_71 : f32 to vector<16x1xf32>
    %315 = arith.addf %313, %314 : vector<16x1xf32>
    %316 = math.rsqrt %315 : vector<16x1xf32>
    %317 = vector.broadcast %316 : vector<16x1xf32> to vector<16x32xf32>
    %318 = arith.mulf %308, %317 : vector<16x32xf32>
    %319 = vector.broadcast %301 : vector<1x32xf32> to vector<16x32xf32>
    %320 = arith.mulf %318, %319 : vector<16x32xf32>
    %321 = vector.broadcast %302 : vector<1x32xf32> to vector<16x32xf32>
    %322 = arith.addf %320, %321 : vector<16x32xf32>
    %c576 = arith.constant 576 : index
    %c0_72 = arith.constant 0 : index
    %323 = vector.load %arg4[%c576, %c0_72] : memref<736x128xbf16, #tpu.memory_space<vmem>>, vector<32x64xbf16>
    %324 = arith.truncf %322 : vector<16x32xf32> to vector<16x32xbf16>
    %cst_73 = arith.constant dense<0.000000e+00> : vector<16x64xf32>
    %325 = tpu.matmul %324, %323, %cst_73 {dimension_numbers = #tpu.dot_dimension_numbers<[1], [0], [0], [1], [0, 0, 1, 1], [], []>} : vector<16x32xbf16>, vector<32x64xbf16>, vector<16x64xf32> -> vector<16x64xf32>
    %326 = vector.extract_strided_slice %244 {offsets = [4, 0], sizes = [1, 64], strides = [1, 1]} : vector<8x128xf32> to vector<1x64xf32>
    %327 = vector.broadcast %326 : vector<1x64xf32> to vector<16x64xf32>
    %328 = arith.addf %325, %327 : vector<16x64xf32>
    %cst_74 = arith.constant 0.000000e+00 : f32
    %329 = vector.broadcast %cst_74 : f32 to vector<16x64xf32>
    %330 = arith.maximumf %328, %329 : vector<16x64xf32>
    %c608 = arith.constant 608 : index
    %c0_75 = arith.constant 0 : index
    %331 = vector.load %arg4[%c608, %c0_75] : memref<736x128xbf16, #tpu.memory_space<vmem>>, vector<64x32xbf16>
    %332 = arith.truncf %330 : vector<16x64xf32> to vector<16x64xbf16>
    %cst_76 = arith.constant dense<0.000000e+00> : vector<16x32xf32>
    %333 = tpu.matmul %332, %331, %cst_76 {dimension_numbers = #tpu.dot_dimension_numbers<[1], [0], [0], [1], [0, 0, 1, 1], [], []>} : vector<16x64xbf16>, vector<64x32xbf16>, vector<16x32xf32> -> vector<16x32xf32>
    %334 = vector.extract_strided_slice %244 {offsets = [5, 0], sizes = [1, 32], strides = [1, 1]} : vector<8x128xf32> to vector<1x32xf32>
    %335 = vector.broadcast %334 : vector<1x32xf32> to vector<16x32xf32>
    %336 = arith.addf %333, %335 : vector<16x32xf32>
    %337 = arith.addf %322, %336 : vector<16x32xf32>
    %338 = vector.extract_strided_slice %244 {offsets = [6, 0], sizes = [1, 32], strides = [1, 1]} : vector<8x128xf32> to vector<1x32xf32>
    %339 = vector.extract_strided_slice %244 {offsets = [7, 0], sizes = [1, 32], strides = [1, 1]} : vector<8x128xf32> to vector<1x32xf32>
    %cst_77 = arith.constant dense<0.000000e+00> : vector<16xf32>
    %340 = vector.multi_reduction <add>, %337, %cst_77 [1] : vector<16x32xf32> to vector<16xf32>
    %341 = vector.shape_cast %340 : vector<16xf32> to vector<16x1xf32>
    %cst_78 = arith.constant 3.200000e+01 : f32
    %342 = vector.broadcast %cst_78 : f32 to vector<16x1xf32>
    %343 = arith.divf %341, %342 : vector<16x1xf32>
    %344 = vector.broadcast %343 : vector<16x1xf32> to vector<16x32xf32>
    %345 = arith.subf %337, %344 : vector<16x32xf32>
    %346 = arith.mulf %345, %345 : vector<16x32xf32>
    %cst_79 = arith.constant dense<0.000000e+00> : vector<16xf32>
    %347 = vector.multi_reduction <add>, %346, %cst_79 [1] : vector<16x32xf32> to vector<16xf32>
    %348 = vector.shape_cast %347 : vector<16xf32> to vector<16x1xf32>
    %cst_80 = arith.constant 3.200000e+01 : f32
    %349 = vector.broadcast %cst_80 : f32 to vector<16x1xf32>
    %350 = arith.divf %348, %349 : vector<16x1xf32>
    %cst_81 = arith.constant 9.99999974E-6 : f32
    %351 = vector.broadcast %cst_81 : f32 to vector<16x1xf32>
    %352 = arith.addf %350, %351 : vector<16x1xf32>
    %353 = math.rsqrt %352 : vector<16x1xf32>
    %354 = vector.broadcast %353 : vector<16x1xf32> to vector<16x32xf32>
    %355 = arith.mulf %345, %354 : vector<16x32xf32>
    %356 = vector.broadcast %338 : vector<1x32xf32> to vector<16x32xf32>
    %357 = arith.mulf %355, %356 : vector<16x32xf32>
    %358 = vector.broadcast %339 : vector<1x32xf32> to vector<16x32xf32>
    %359 = arith.addf %357, %358 : vector<16x32xf32>
    %360 = vector.extract_strided_slice %4 {offsets = [1, 0], sizes = [1, 32], strides = [1, 1]} : vector<8x128xf32> to vector<1x32xf32>
    %361 = vector.extract_strided_slice %4 {offsets = [2, 0], sizes = [1, 32], strides = [1, 1]} : vector<8x128xf32> to vector<1x32xf32>
    %cst_82 = arith.constant dense<0.000000e+00> : vector<16xf32>
    %362 = vector.multi_reduction <add>, %359, %cst_82 [1] : vector<16x32xf32> to vector<16xf32>
    %363 = vector.shape_cast %362 : vector<16xf32> to vector<16x1xf32>
    %cst_83 = arith.constant 3.200000e+01 : f32
    %364 = vector.broadcast %cst_83 : f32 to vector<16x1xf32>
    %365 = arith.divf %363, %364 : vector<16x1xf32>
    %366 = vector.broadcast %365 : vector<16x1xf32> to vector<16x32xf32>
    %367 = arith.subf %359, %366 : vector<16x32xf32>
    %368 = arith.mulf %367, %367 : vector<16x32xf32>
    %cst_84 = arith.constant dense<0.000000e+00> : vector<16xf32>
    %369 = vector.multi_reduction <add>, %368, %cst_84 [1] : vector<16x32xf32> to vector<16xf32>
    %370 = vector.shape_cast %369 : vector<16xf32> to vector<16x1xf32>
    %cst_85 = arith.constant 3.200000e+01 : f32
    %371 = vector.broadcast %cst_85 : f32 to vector<16x1xf32>
    %372 = arith.divf %370, %371 : vector<16x1xf32>
    %cst_86 = arith.constant 9.99999974E-6 : f32
    %373 = vector.broadcast %cst_86 : f32 to vector<16x1xf32>
    %374 = arith.addf %372, %373 : vector<16x1xf32>
    %375 = math.rsqrt %374 : vector<16x1xf32>
    %376 = vector.broadcast %375 : vector<16x1xf32> to vector<16x32xf32>
    %377 = arith.mulf %367, %376 : vector<16x32xf32>
    %378 = vector.broadcast %360 : vector<1x32xf32> to vector<16x32xf32>
    %379 = arith.mulf %377, %378 : vector<16x32xf32>
    %380 = vector.broadcast %361 : vector<1x32xf32> to vector<16x32xf32>
    %381 = arith.addf %379, %380 : vector<16x32xf32>
    %382 = vector.extract_strided_slice %381 {offsets = [0, 0], sizes = [8, 32], strides = [1, 1]} : vector<16x32xf32> to vector<8x32xf32>
    %c0_87 = arith.constant 0 : index
    %c0_88 = arith.constant 0 : index
    %383 = vector.load %arg6[%c0_87, %c0_88] : memref<8x64xf32, #tpu.memory_space<vmem>>, vector<8x32xf32>
    tpu.vector_store %arg6[%c0_87, %c0_88], %382 {strides = array<i32>} : memref<8x64xf32, #tpu.memory_space<vmem>>, vector<8x32xf32>,
    %384 = vector.extract_strided_slice %381 {offsets = [8, 0], sizes = [8, 32], strides = [1, 1]} : vector<16x32xf32> to vector<8x32xf32>
    %c0_89 = arith.constant 0 : index
    %c32_90 = arith.constant 32 : index
    %385 = vector.load %arg6[%c0_89, %c32_90] : memref<8x64xf32, #tpu.memory_space<vmem>>, vector<8x32xf32>
    tpu.vector_store %arg6[%c0_89, %c32_90], %384 {strides = array<i32>} : memref<8x64xf32, #tpu.memory_space<vmem>>, vector<8x32xf32>,
    return
  }
  func.func @transform_0(%arg0: i32) -> (i32, i32) {
    %c0_i32 = arith.constant 0 : i32
    %c0_i32_0 = arith.constant 0 : i32
    %c0_i32_1 = arith.constant 0 : i32
    return %c0_i32, %c0_i32_0 : i32, i32
  }
  func.func @transform_1(%arg0: i32) -> (i32, i32) {
    %c0_i32 = arith.constant 0 : i32
    %c0_i32_0 = arith.constant 0 : i32
    %c0_i32_1 = arith.constant 0 : i32
    return %c0_i32, %c0_i32_0 : i32, i32
  }
  func.func @transform_2(%arg0: i32) -> (i32, i32) {
    %c0_i32 = arith.constant 0 : i32
    %c0_i32_0 = arith.constant 0 : i32
    %c0_i32_1 = arith.constant 0 : i32
    return %c0_i32, %c0_i32_0 : i32, i32
  }
  func.func @transform_3(%arg0: i32) -> (i32, i32) {
    %c0_i32 = arith.constant 0 : i32
    %c0_i32_0 = arith.constant 0 : i32
    %c0_i32_1 = arith.constant 0 : i32
    return %c0_i32, %c0_i32_0 : i32, i32
  }
  func.func @transform_4(%arg0: i32) -> (i32, i32) {
    %c0_i32 = arith.constant 0 : i32
    %c0_i32_0 = arith.constant 0 : i32
    %c0_i32_1 = arith.constant 0 : i32
    return %c0_i32, %c0_i32_0 : i32, i32
  }
  func.func @transform_5(%arg0: i32) -> (i32, i32) {
    %c0_i32 = arith.constant 0 : i32
    %c0_i32_0 = arith.constant 0 : i32
    %c0_i32_1 = arith.constant 0 : i32
    return %c0_i32, %c0_i32_0 : i32, i32
  }
}

</mosaic_0001>

<bundles_post_ra>
// kernel: skip_transformer_forward.1
= control target key start
LH: loop header
LB: loop body
LE: loop exit
PB: predicated region body
PF: predicated region fallthrough
CT: control target
= control target key end

     0   :  { %10 = vsyncpa [#allocation3], 0  ;;  %s4024_s0 = inlined_call_operand.vmem [shape: f32[16,32], index: 0, kind: input, shape index: {}]   ;;  %s4025_s1 = inlined_call_operand.hbm [shape: f32[16,64], index: 1, kind: input, shape index: {}]   ;;  %s4026_s2 = inlined_call_operand.hbm [shape: f32[64,64], index: 2, kind: input, shape index: {}]   ;;  %s4027_s3 = inlined_call_operand.hbm [shape: bf16[736,128], index: 3, kind: input, shape index: {}]   ;;  %s4028_s4 = inlined_call_operand.hbm [shape: f32[32,128], index: 4, kind: input, shape index: {}]   ;;  %s4029_s5 = inlined_call_operand.vmem [shape: f32[8,64], index: 5, kind: output, shape index: {}]  }
   0x1   :  { %11 = vsyncpa [#allocation5], 0 }
   0x2   :  { %12 = vsyncpa [#allocation8], 0  ;;  %s3356_s18 = smov [#allocation4]   ;;  %s3357_s20 = smov [#allocation2]  }
   0x3   :  { %s32_s19 = sshll.u32 %s3356_s18, 4  ;;  %s20_s21 = sshll.u32 %s3357_s20, 4  ;;  %s33_s19 = int_to_ptr.vmem [resolvable:$true] %s32_s19  ;;  %s3403_s21 = int_to_ptr.vmem [resolvable:$true] %s20_s21 }
   0x4   :  { %s3262_s24 = scalar_lea.hbm %s4026_s2, 1024 }
   0x5   :  { %p3263_p0 = scmp.ne.s32.totalorder %s4026_s2, %s3262_s24  ;;  %p3266_p1 = scmp.lt.u32.totalorder %s3262_s24, %s4026_s2 }
   0x7   :  { %p3268_p2 = pnand %p3266_p1, %p3263_p0 }
   0x9   :  { %3271 = shalt.err (!%p3268_p2)
}
   0xa   :  { %s3272_s29 = scalar_lea.vmem %s33_s19, 1024  ;;  %p3277_p4 = scmp.lt.s32.totalorder %s33_s19, %s33_s19 }
   0xb   :  { %p3273_p3 = scmp.ne.s32.totalorder %s33_s19, %s3272_s29  ;;  %p3278_p5 = scmp.lt.s32.totalorder %s3272_s29, %s3272_s29 }
   0xd   :  { %p3279_p6 = por %p3278_p5, %p3277_p4 }
   0xf   :  { %p3280_p7 = pnand %p3279_p6, %p3273_p3 }
  0x11   :  { %3283 = shalt.err (!%p3280_p7)
}
  0x12   :  { %s3358_s30 = smov 128   ;;  %s3359_s6 = smov 8  }
  0x13   :  { %38 = dma.hbm_to_vmem [thread:$0]  %s4026_s2, 1024, %s33_s19, [#allocation5], %s3358_s30, %s3358_s30, %s3359_s6  }
  0x14   :  { %s3284_s11 = scalar_lea.hbm %s4025_s1, 256 }
  0x15   :  { %p3285_p8 = scmp.ne.s32.totalorder %s4025_s1, %s3284_s11  ;;  %p3288_p9 = scmp.lt.u32.totalorder %s3284_s11, %s4025_s1 }
  0x17   :  { %p3290_p10 = pnand %p3288_p9, %p3285_p8 }
  0x19   :  { %3293 = shalt.err (!%p3290_p10)
}
  0x1a   :  { %s3294_s16 = scalar_lea.vmem %s3403_s21, 256  ;;  %p3299_p12 = scmp.lt.s32.totalorder %s3403_s21, %s3403_s21 }
  0x1b   :  { %p3295_p11 = scmp.ne.s32.totalorder %s3403_s21, %s3294_s16  ;;  %p3300_p13 = scmp.lt.s32.totalorder %s3294_s16, %s3294_s16 }
  0x1d   :  { %p3301_p0 = por %p3300_p13, %p3299_p12 }
  0x1f   :  { %p3302_p1 = pnand %p3301_p0, %p3295_p11 }
  0x21   :  { %3305 = shalt.err (!%p3302_p1)
}
  0x22   :  { %26 = dma.hbm_to_vmem [thread:$0]  %s4025_s1, 256, %s3403_s21, [#allocation3], %s3358_s30, %s3358_s30, %s3359_s6  }
  0x23   :  { %s3360_s18 = smov [#allocation6]   ;;  %s3306_s23 = scalar_lea.hbm %s4027_s3, 5888 }
  0x24   :  { %s44_s19 = sshll.u32 %s3360_s18, 4  ;;  %p3307_p2 = scmp.ne.s32.totalorder %s4027_s3, %s3306_s23  ;;  %s45_s19 = int_to_ptr.vmem [resolvable:$true] %s44_s19 }
  0x25   :  { %p3310_p3 = scmp.lt.u32.totalorder %s3306_s23, %s4027_s3 }
  0x27   :  { %p3312_p4 = pnand %p3310_p3, %p3307_p2 }
  0x29   :  { %3315 = shalt.err (!%p3312_p4)
}
  0x2a   :  { %s3316_s28 = scalar_lea.vmem %s45_s19, 5888  ;;  %p3321_p6 = scmp.lt.s32.totalorder %s45_s19, %s45_s19 }
  0x2b   :  { %p3317_p5 = scmp.ne.s32.totalorder %s45_s19, %s3316_s28  ;;  %p3322_p7 = scmp.lt.s32.totalorder %s3316_s28, %s3316_s28 }
  0x2d   :  { %p3323_p8 = por %p3322_p7, %p3321_p6 }
  0x2f   :  { %p3324_p9 = pnand %p3323_p8, %p3317_p5 }
  0x31   :  { %3327 = shalt.err (!%p3324_p9)
}
  0x32   :  { %s3361_s1 = smov 64   ;;  %s3362_s21 = smov 4  }
  0x33   :  { %50 = dma.hbm_to_vmem [thread:$0]  %s4027_s3, 5888, %s45_s19, [#allocation5], %s3361_s1, %s3361_s1, %s3362_s21  }
  0x34   :  { %s3363_s8 = smov [#allocation7]   ;;  %s3328_s12 = scalar_lea.hbm %s4028_s4, 512 }
  0x35   :  { %s56_s9 = sshll.u32 %s3363_s8, 4  ;;  %p3329_p10 = scmp.ne.s32.totalorder %s4028_s4, %s3328_s12  ;;  %s57_s9 = int_to_ptr.vmem [resolvable:$true] %s56_s9 }
  0x36   :  { %p3332_p11 = scmp.lt.u32.totalorder %s3328_s12, %s4028_s4 }
  0x38   :  { %p3334_p12 = pnand %p3332_p11, %p3329_p10 }
  0x3a   :  { %3337 = shalt.err (!%p3334_p12)
}
  0x3b   :  { %s3338_s2 = scalar_lea.vmem %s57_s9, 512  ;;  %p3343_p0 = scmp.lt.s32.totalorder %s57_s9, %s57_s9 }
  0x3c   :  { %p3339_p13 = scmp.ne.s32.totalorder %s57_s9, %s3338_s2  ;;  %p3344_p1 = scmp.lt.s32.totalorder %s3338_s2, %s3338_s2 }
  0x3e   :  { %p3345_p2 = por %p3344_p1, %p3343_p0 }
  0x40   :  { %p3346_p3 = pnand %p3345_p2, %p3339_p13 }
  0x42   :  { %3349 = shalt.err (!%p3346_p3)
}
  0x43   :  { %62 = dma.hbm_to_vmem [thread:$0]  %s4028_s4, 512, %s57_s9, [#allocation8], %s3358_s30, %s3358_s30, %s3359_s6  }
  0x44   :  { %3350 = dma.done.wait [#allocation3], 256  }
  0x45   :  { %3351 = vsyncadd [#allocation3], 4294967040 }
  0x46   :  { %3352 = dma.done.wait [#allocation5], 6912  }
  0x47   :  { %3353 = vsyncadd [#allocation5], 4294960384 }
  0x48   :  { %3354 = dma.done.wait [#allocation8], 512  }
  0x49   :  { %3355 = vsyncadd [#allocation8], 4294966784  ;;  %v78_v0 = vld [vmem:[#allocation2] sm:$0xff]  ;;  %s3364_s18 = smov 96   ;;  %v79_v1 = vld [vmem:[#allocation2 + $0x8] sm:$0xff]  ;;  %v3365_v2 = vmov 0.0   ;;  %v137_v30 = vlaneseq }
  0x4a   :  { %94 = vrot.lane.b32.xlu0 %v78_v0, %s3364_s18  ;;  %2688 = vmatprep.subr.bf16.mxu0 %v3365_v2  ;;  %v3082_v3 = vld [vmem:[#allocation6] sm:$0xff]   ;;  %v3083_v4 = vld [vmem:[#allocation6 + $0x8] sm:$0xff]   ;;  %v3084_v5 = vld [vmem:[#allocation6 + $0x10] sm:$0xff]   ;;  %vm3366_vm0 = vmmov 0   ;;  %s3367_s22 = smov 32   ;;  %vm118_vm1 = vcmask 261120  }
  0x4b   :  { %2689 = vmatpush3.bf16.msra.mxu0 %v3082_v3  ;;  %v3085_v6 = vld [vmem:[#allocation6 + $0x18] sm:$0xff]   ;;  %v3086_v7 = vld [vmem:[#allocation6 + $0x20] sm:$0xff]   ;;  %v3087_v9 = vld [vmem:[#allocation6 + $0x28] sm:$0xff]   ;;  %2700 = vmatprep.mubr.msk.bf16.mxu0 %vm3366_vm0, %v3365_v2  ;;  %vm121_vm2 = vcmask 523264   ;;  %vm177_vm3 = vcmask 785408   ;;  %v3508_v31 = vshrl.u32 %v137_v30, 7 }
  0x4c   :  { %2690 = vmatprep.subr.bf16.mxu0 %v3365_v2  ;;  %v3482_v10 = vld [vmem:[%s4024_s0] sm:$0xff]  ;;  %v3487_v11 = vld [vmem:[%s4024_s0 + $0x8] sm:$0xff]  ;;  %vm258_vm4 = vcmask 64512   ;;  %s3368_s0 = smov 112   ;;  %s3369_s23 = smov 120   ;;  %v3555_v63 = vld [vmem:[#allocation4] sm:$0xff] }
  0x4d   :  { %v2962_v16 = vpack.i.bf16 %v3487_v11, %v3482_v10  ;;  %v90_v18 = vmul.f32 %v78_v0, %v3482_v10  ;;  %v91_v19 = vmul.f32 %v79_v1, %v3487_v11  ;;  %v3511_v32 = vsub.s32 0, %v3508_v31  ;;  %v3513_v33 = vld [vmem:[#allocation7] sm:$0xff]  ;;  %s3370_s24 = smov 104   ;;  %v3557_v3 = vld [vmem:[#allocation4 + $0x18] sm:$0xff]  ;;  %s3371_s25 = smov 24  }
  0x4e   :  { %96 = vrot.lane.b32.xlu0 %v79_v1, %s3364_s18  ;;  %s3372_s26 = smov 16   ;;  %vm555_vm5 = vcmask 130048   ;;  %vm558_vm6 = vcmask 195584   ;;  %vm2489_vm7 = vcmask 523520  }
  0x4f   :  { %2691 = vmatpush3.bf16.msra.mxu0 %v3083_v4  ;;  %v140_v34 = vrot.slane %v3513_v33, %v3511_v32  ;;  %v3559_v4 = vld [vmem:[#allocation4 + $0x8] sm:$0xff] }
  0x50   :  { %2692 = vmatprep.subr.bf16.mxu0 %v3365_v2 }
  0x53   :  { %2693 = vmatpush3.bf16.msra.mxu0 %v3084_v5 }
  0x54   :  { %2694 = vmatprep.subr.bf16.mxu0 %v3365_v2 }
  0x57   :  { %2695 = vmatpush3.bf16.msra.mxu0 %v3085_v6 }
  0x58   :  { %2696 = vmatprep.subr.bf16.mxu0 %v3365_v2 }
  0x5b   :  { %2697 = vmatpush3.bf16.msra.mxu0 %v3086_v7  ;;  %v3562_v7 = vld [vmem:[#allocation4 + $0x10] sm:$0xff] }
  0x5c   :  { %2698 = vmatprep.subr.bf16.mxu0 %v3365_v2 }
  0x5f   :  { %2699 = vmatpush3.bf16.msra.mxu0 %v3087_v9 }
  0xbc   :  { %v3477_v8 = vpop.permute.xlu0 %94 }
  0xbd   :  { %v100_v13 = vmul.f32 %v3477_v8, %v3482_v10 }
  0xc0   :  { %v3491_v12 = vpop.permute.xlu0 %96 }
  0xc1   :  { %v101_v14 = vmul.f32 %v3491_v12, %v3487_v11 }
  0xc3   :  { %v2957_v15 = vpack.i.bf16 %v101_v14, %v100_v13 }
  0xc5   :  { %2958 = vrot.lane.b32.xlu1 %v2957_v15, %s3367_s22 }
  0xc9   :  { %2963 = vrot.lane.b32.xlu1 %v2962_v16, %s3361_s1 }
 0x137   :  { %v2959_v17 = vpop.permute.xlu1 %2958 }
 0x138   :  { %v2961_v20 = vunpack.i.h.bf16 %v2959_v17  ;;  %v2960_v21 = vunpack.i.l.bf16 %v2959_v17 }
 0x13a   :  { %v120_v25 = vsel %vm118_vm1, %v91_v19, %v2961_v20  ;;  %v119_v26 = vsel %vm118_vm1, %v90_v18, %v2960_v21  ;;  %v3569_v18 = vld [vmem:[#allocation4 + $0x20] sm:$0xff] }
 0x13b   :  { %v2964_v22 = vpop.permute.xlu1 %2963 }
 0x13c   :  { %v2966_v23 = vunpack.i.h.bf16 %v2964_v22  ;;  %v2965_v24 = vunpack.i.l.bf16 %v2964_v22  ;;  %v3572_v22 = vld [vmem:[#allocation4 + $0x28] sm:$0xff] }
 0x13e   :  { %v122_v27 = vsel %vm121_vm2, %v119_v26, %v2965_v24  ;;  %v123_v28 = vsel %vm121_vm2, %v120_v25, %v2966_v23  ;;  %v3576_v26 = vld [vmem:[#allocation4 + $0x30] sm:$0xff] }
 0x13f   :  { %v136_v29 = vpack.c.bf16 %v123_v28, %v122_v27  ;;  %v3578_v27 = vld [vmem:[#allocation4 + $0x38] sm:$0xff] }
 0x141   :  { %2701 = vmatmul.mubr.msk.bf16.vlgmr.msra.gmra.mrb[0].mxu0 %vm177_vm3, %v136_v29 }
 0x214   :  { %v215_v35 = vpop.f32.mrb[0].mxu0 }
 0x215   :  { %v2702_v36 = vpop.f32.mrb[1].mxu0  ;;  %v216_v38 = vadd.f32 %v215_v35, %v140_v34 }
 0x216   :  { %v218_v37 = vpop.f32.mrb[2].mxu0 }
 0x217   :  { %v219_v39 = vadd.f32 %v218_v37, %v140_v34  ;;  %v2703_v40 = vpop.f32.mrb[3].mxu0 }
 0x219   :  { %v2972_v41 = vpack.i.bf16 %v219_v39, %v216_v38  ;;  %v3517_v42 = vpack.c.bf16 %v219_v39, %v216_v38 }
 0x21b   :  { %2973 = vrot.lane.b32.xlu1 %v2972_v41, %s3368_s0  ;;  %2968 = vrot.lane.b32.xlu0 %v2972_v41, %s3369_s23 }
 0x21c   :  { %2712 = vmatprep.mubr.msk.bf16.mxu1 %vm258_vm4, %v3517_v42 }
 0x21f   :  { %2978 = vrot.lane.b32.xlu0 %v2972_v41, %s3370_s24  ;;  %250 = vrot.lane.b32.xlu1 %v3517_v42, %s3364_s18 }
 0x28d   :  { %v2974_v43 = vpop.permute.xlu1 %2973  ;;  %v2969_v44 = vpop.permute.xlu0 %2968 }
 0x28e   :  { %v2976_v45 = vunpack.i.h.bf16 %v2974_v43  ;;  %v2975_v46 = vunpack.i.l.bf16 %v2974_v43  ;;  %v2971_v47 = vunpack.i.h.bf16 %v2969_v44  ;;  %v2970_v48 = vunpack.i.l.bf16 %v2969_v44 }
 0x290   :  { %v3526_v49 = vpack.c.bf16 %v2971_v47, %v2970_v48  ;;  %v3528_v50 = vpack.c.bf16 %v2976_v45, %v2975_v46 }
 0x291   :  { %v2979_v51 = vpop.permute.xlu0 %2978  ;;  %v251_v52 = vpop.permute.xlu1 %250 }
 0x292   :  { %v2981_v53 = vunpack.i.h.bf16 %v2979_v51  ;;  %v2980_v54 = vunpack.i.l.bf16 %v2979_v51  ;;  %252 = vrot.lane.b32.xlu0 %v3526_v49, %s3364_s18  ;;  %254 = vrot.lane.b32.xlu1 %v3528_v50, %s3364_s18  ;;  %v272_v55 = vsel %vm258_vm4, %v251_v52, 0 }
 0x293   :  { %2928 = vmatprep.subr.msk.bf16.mxu1 %vm258_vm4, %v251_v52 }
 0x294   :  { %2705 = vmatpush3.bf16.xpose.msra.mxu1 %v272_v55  ;;  %v3536_v56 = vpack.c.bf16 %v2981_v53, %v2980_v54 }
 0x296   :  { %256 = vrot.lane.b32.xlu0 %v3536_v56, %s3364_s18 }
 0x304   :  { %v253_v57 = vpop.permute.xlu0 %252  ;;  %v255_v59 = vpop.permute.xlu1 %254 }
 0x305   :  { %2929 = vmatprep.subr.msk.bf16.mxu1 %vm258_vm4, %v253_v57  ;;  %v275_v58 = vsel %vm258_vm4, %v253_v57, 0  ;;  %v278_v60 = vsel %vm258_vm4, %v255_v59, 0 }
 0x306   :  { %2707 = vmatpush3.bf16.xpose.msra.mxu1 %v275_v58 }
 0x307   :  { %2930 = vmatprep.subr.msk.bf16.mxu1 %vm258_vm4, %v255_v59 }
 0x308   :  { %v257_v61 = vpop.permute.xlu0 %256 }
 0x309   :  { %v281_v62 = vsel %vm258_vm4, %v257_v61, 0 }
 0x30e   :  { %2709 = vmatpush3.bf16.xpose.msra.mxu1 %v278_v60 }
 0x30f   :  { %2931 = vmatprep.subr.msk.bf16.mxu1 %vm258_vm4, %v257_v61 }
 0x316   :  { %2711 = vmatpush3.bf16.xpose.msra.mxu1 %v281_v62 }
 0x317   :  { %2736 = vmatprep.subr.bf16.mxu1 %v3365_v2 }
 0x31d   :  { %2713 = vmatmul.mubr.msk.bf16.vlgmr.msra.gmra.mrb[0].mxu1 %vm258_vm4, %v3526_v49 }
 0x31e   :  { %2716 = vmatprep.mubr.msk.bf16.mxu1 %vm258_vm4, %v3528_v50 }
 0x325   :  { %2717 = vmatmul.mubr.msk.bf16.gmra.mrb[4].mxu1 %vm258_vm4, %v3536_v56 }
 0x326   :  { %2740 = vmatprep.mubr.msk.bf16.mxu1 %vm3366_vm0, %v3365_v2 }
 0x3f0   :  { %v2714_v0 = vpop.f32.mrb[0].mxu1 }
 0x3f1   :  { %v317_v1 = vpop.f32.mrb[1].mxu1  ;;  %v326_v16 = vadd.f32 %v2714_v0, %v3562_v7 }
 0x3f2   :  { %v318_v5 = vadd.f32 %v317_v1, %v3555_v63  ;;  %v2715_v6 = vpop.f32.mrb[2].mxu1 }
 0x3f3   :  { %v320_v9 = vpop.f32.mrb[3].mxu1  ;;  %v329_v13 = vadd.f32 %v2715_v6, %v3557_v3  ;;  %v354_v25 = vsel %vm121_vm2, %v326_v16, -inf }
 0x3f4   :  { %v321_v14 = vadd.f32 %v320_v9, %v3559_v4  ;;  %v348_v15 = vsel %vm121_vm2, %v318_v5, -inf }
 0x3f5   :  { %349 = vmax.xlane.f32.xlu1 %v348_v15  ;;  %v357_v20 = vsel %vm121_vm2, %v329_v13, -inf }
 0x3f6   :  { %v351_v17 = vsel %vm121_vm2, %v321_v14, -inf }
 0x3f7   :  { %352 = vmax.xlane.f32.xlu0 %v351_v17 }
 0x3f8   :  { %v2718_v19 = vpop.f32.mrb[4].mxu1 }
 0x3f9   :  { %v333_v21 = vpop.f32.mrb[5].mxu1  ;;  %358 = vmax.xlane.f32.xlu1 %v357_v20  ;;  %v342_v30 = vadd.f32 %v2718_v19, %v3576_v26 }
 0x3fa   :  { %v334_v23 = vadd.f32 %v333_v21, %v3569_v18  ;;  %v2719_v24 = vpop.f32.mrb[6].mxu1 }
 0x3fb   :  { %v336_v28 = vpop.f32.mrb[7].mxu1  ;;  %355 = vmax.xlane.f32.xlu0 %v354_v25  ;;  %v345_v34 = vadd.f32 %v2719_v24, %v3578_v27  ;;  %v366_v37 = vsel %vm121_vm2, %v342_v30, -inf }
 0x3fc   :  { %v337_v29 = vadd.f32 %v336_v28, %v3572_v22  ;;  %v360_v35 = vsel %vm121_vm2, %v334_v23, -inf }
 0x3fd   :  { %v369_v38 = vsel %vm121_vm2, %v345_v34, -inf }
 0x3fe   :  { %v363_v36 = vsel %vm121_vm2, %v337_v29, -inf }
 0x3ff   :  { %361 = vmax.xlane.f32.xlu0 %v360_v35  ;;  %364 = vmax.xlane.f32.xlu1 %v363_v36 }
 0x403   :  { %367 = vmax.xlane.f32.xlu0 %v366_v37  ;;  %370 = vmax.xlane.f32.xlu1 %v369_v38 }
 0x414   :  { %442 = vrot.lane.b32.xlu1 %v3526_v49, %s3361_s1 }
 0x419   :  { %440 = vrot.lane.b32.xlu0 %v3517_v42, %s3361_s1 }
 0x482   :  { %v350_v39 = vpop.xlane.xlu1 %349 }
 0x483   :  { %v372_v44 = vsub.f32 %v318_v5, %v350_v39 }
 0x484   :  { %v353_v40 = vpop.xlane.xlu0 %352 }
 0x485   :  { %v373_v41 = vsub.f32 %v321_v14, %v353_v40  ;;  %v380_v52 = vmul.f32 1.442695, %v372_v44 }
 0x486   :  { %v359_v43 = vpop.xlane.xlu1 %358 }
 0x487   :  { %v375_v45 = vsub.f32 %v329_v13, %v359_v43  ;;  %v382_v46 = vmul.f32 1.442695, %v373_v41 }
 0x488   :  { %v356_v47 = vpop.xlane.xlu0 %355 }
 0x489   :  { %v386_v48 = vmul.f32 1.442695, %v375_v45  ;;  %v374_v51 = vsub.f32 %v326_v16, %v356_v47 }
 0x48b   :  { %3128 = vpow2.f32 %v386_v48  ;;  %v384_v53 = vmul.f32 1.442695, %v374_v51 }
 0x48c   :  { %3130 = vpow2.f32 %v382_v46  ;;  %v362_v54 = vpop.xlane.xlu0 %361  ;;  %v365_v55 = vpop.xlane.xlu1 %364 }
 0x48d   :  { %3132 = vpow2.f32 %v384_v53  ;;  %v376_v49 = vsub.f32 %v334_v23, %v362_v54  ;;  %v377_v42 = vsub.f32 %v337_v29, %v365_v55 }
 0x48e   :  { %3134 = vpow2.f32 %v380_v52 }
 0x48f   :  { %v388_v61 = vmul.f32 1.442695, %v376_v49  ;;  %v390_v1 = vmul.f32 1.442695, %v377_v42 }
 0x490   :  { %v368_v57 = vpop.xlane.xlu0 %367  ;;  %v371_v58 = vpop.xlane.xlu1 %370 }
 0x491   :  { %v378_v59 = vsub.f32 %v342_v30, %v368_v57  ;;  %v379_v60 = vsub.f32 %v345_v34, %v371_v58 }
 0x493   :  { %v392_v62 = vmul.f32 1.442695, %v378_v59  ;;  %v394_v0 = vmul.f32 1.442695, %v379_v60 }
 0x494   :  { %v441_v5 = vpop.permute.xlu0 %440  ;;  %v443_v13 = vpop.permute.xlu1 %442 }
 0x495   :  { %v3591_v6 = vpop.eup %3128  ;;  %3136 = vpow2.f32 %v392_v62  ;;  %2720 = vmatprep.subr.bf16.mxu0 %v441_v5 }
 0x496   :  { %v3131_v9 = vpop.eup %3130  ;;  %3138 = vpow2.f32 %v394_v0  ;;  %2721 = vmatpush3.bf16.msra.mxu0 %v441_v5  ;;  %v405_v14 = vsel %vm121_vm2, %v3591_v6, 0.0  ;;  %v3088_v5 = vld [vmem:[#allocation6 + $0x30] sm:$0xff]  }
 0x497   :  { %v3133_v15 = vpop.eup %3132  ;;  %3140 = vpow2.f32 %v388_v61  ;;  %406 = vadd.xlane.f32.xlu1 %v405_v14  ;;  %2722 = vmatprep.subr.bf16.mxu0 %v443_v13  ;;  %v399_v19 = vsel %vm121_vm2, %v3131_v9, 0.0 }
 0x498   :  { %3142 = vpow2.f32 %v390_v1  ;;  %v402_v16 = vsel %vm121_vm2, %v3133_v15, 0.0  ;;  %v3135_v17 = vpop.eup %3134  ;;  %2737 = vmatpush3.bf16.msra.mxu1 %v3088_v5 }
 0x499   :  { %403 = vadd.xlane.f32.xlu0 %v402_v16  ;;  %v396_v20 = vsel %vm121_vm2, %v3135_v17, 0.0  ;;  %2738 = vmatprep.subr.bf16.mxu1 %v3365_v2 }
 0x49a   :  { %2723 = vmatpush3.bf16.msra.mxu0 %v443_v13 }
 0x49b   :  { %400 = vadd.xlane.f32.xlu1 %v399_v19 }
 0x49d   :  { %397 = vadd.xlane.f32.xlu0 %v396_v20 }
 0x49f   :  { %v3137_v21 = vpop.eup %3136 }
 0x4a0   :  { %v3139_v23 = vpop.eup %3138  ;;  %v414_v24 = vsel %vm121_vm2, %v3137_v21, 0.0 }
 0x4a1   :  { %v3141_v25 = vpop.eup %3140  ;;  %415 = vadd.xlane.f32.xlu0 %v414_v24  ;;  %v417_v28 = vsel %vm121_vm2, %v3139_v23, 0.0 }
 0x4a2   :  { %v3143_v29 = vpop.eup %3142  ;;  %418 = vadd.xlane.f32.xlu1 %v417_v28  ;;  %v408_v30 = vsel %vm121_vm2, %v3141_v25, 0.0 }
 0x4a3   :  { %v411_v34 = vsel %vm121_vm2, %v3143_v29, 0.0 }
 0x4a5   :  { %409 = vadd.xlane.f32.xlu0 %v408_v30 }
 0x4a6   :  { %412 = vadd.xlane.f32.xlu1 %v411_v34 }
 0x4b7   :  { %444 = vrot.lane.b32.xlu1 %v3528_v50, %s3361_s1 }
 0x4bb   :  { %446 = vrot.lane.b32.xlu0 %v3536_v56, %s3361_s1 }
 0x524   :  { %v407_v35 = vpop.xlane.xlu1 %406 }
 0x526   :  { %v404_v36 = vpop.xlane.xlu0 %403 }
 0x528   :  { %v401_v37 = vpop.xlane.xlu1 %400 }
 0x529   :  { %3144 = vrcp.f32 %v401_v37 }
 0x52a   :  { %v398_v38 = vpop.xlane.xlu0 %397 }
 0x52b   :  { %3146 = vrcp.f32 %v398_v38 }
 0x52c   :  { %3148 = vrcp.f32 %v404_v36 }
 0x52d   :  { %3150 = vrcp.f32 %v407_v35 }
 0x52e   :  { %v416_v39 = vpop.xlane.xlu0 %415 }
 0x52f   :  { %v419_v40 = vpop.xlane.xlu1 %418  ;;  %3152 = vrcp.f32 %v416_v39 }
 0x532   :  { %v410_v41 = vpop.xlane.xlu0 %409 }
 0x533   :  { %v3145_v43 = vpop.eup %3144  ;;  %3154 = vrcp.f32 %v410_v41  ;;  %v413_v44 = vpop.xlane.xlu1 %412 }
 0x534   :  { %3156 = vrcp.f32 %v413_v44  ;;  %v429_v56 = vmul.f32 %v3145_v43, %v3131_v9 }
 0x535   :  { %v3147_v50 = vpop.eup %3146  ;;  %3158 = vrcp.f32 %v419_v40 }
 0x536   :  { %v428_v45 = vmul.f32 %v3147_v50, %v3135_v17  ;;  %v3149_v46 = vpop.eup %3148  ;;  %v447_v52 = vpop.permute.xlu0 %446 }
 0x537   :  { %v445_v47 = vpop.permute.xlu1 %444  ;;  %v3151_v51 = vpop.eup %3150  ;;  %v430_v53 = vmul.f32 %v3149_v46, %v3133_v15 }
 0x538   :  { %2724 = vmatprep.subr.bf16.mxu0 %v445_v47  ;;  %v436_v48 = vpack.c.bf16 %v429_v56, %v428_v45  ;;  %v431_v55 = vmul.f32 %v3151_v51, %v3591_v6  ;;  %v3089_v6 = vld [vmem:[#allocation6 + $0x38] sm:$0xff]   ;;  %v3629_v56 = vsub.s32 1, %v3508_v31 }
 0x539   :  { %2725 = vmatpush3.bf16.msra.mxu0 %v445_v47  ;;  %v3153_v54 = vpop.eup %3152  ;;  %2739 = vmatpush3.bf16.msra.mxu1 %v3089_v6 }
 0x53a   :  { %2726 = vmatprep.subr.bf16.mxu0 %v447_v52  ;;  %2728 = vmatprep.mubr.msk.bf16.mxu0 %vm121_vm2, %v436_v48  ;;  %v437_v57 = vpack.c.bf16 %v431_v55, %v430_v53  ;;  %v434_v62 = vmul.f32 %v3153_v54, %v3137_v21  ;;  %v569_v46 = vrot.slane %v3513_v33, %v3629_v56 }
 0x53b   :  { %2752 = vmatprep.subr.bf16.mxu1 %v3365_v2 }
 0x53d   :  { %v3155_v49 = vpop.eup %3154  ;;  %2727 = vmatpush3.bf16.msra.mxu0 %v447_v52 }
 0x53e   :  { %v3157_v42 = vpop.eup %3156  ;;  %v432_v58 = vmul.f32 %v3155_v49, %v3141_v25  ;;  %2744 = vmatprep.subr.bf16.mxu0 %v3365_v2 }
 0x53f   :  { %v3159_v59 = vpop.eup %3158  ;;  %v433_v60 = vmul.f32 %v3157_v42, %v3143_v29 }
 0x540   :  { %2729 = vmatmul.mubr.msk.bf16.vlgmr.msra.gmra.mrb[4].mxu0 %vm121_vm2, %v437_v57  ;;  %v435_v0 = vmul.f32 %v3159_v59, %v3139_v23 }
 0x541   :  { %v438_v61 = vpack.c.bf16 %v433_v60, %v432_v58 }
 0x542   :  { %v439_v1 = vpack.c.bf16 %v435_v0, %v434_v62 }
 0x543   :  { %2732 = vmatprep.mubr.msk.bf16.mxu0 %vm121_vm2, %v438_v61 }
 0x548   :  { %2733 = vmatmul.mubr.msk.bf16.gmra.mrb[8].mxu0 %vm121_vm2, %v439_v1 }
 0x549   :  { %2748 = vmatprep.mubr.msk.bf16.mxu0 %vm3366_vm0, %v3365_v2 }
 0x613   :  { %v2730_v9 = vpop.f32.mrb[4].mxu0 }
 0x614   :  { %v498_v13 = vpop.f32.mrb[5].mxu0 }
 0x615   :  { %v2731_v14 = vpop.f32.mrb[6].mxu0 }
 0x616   :  { %v2982_v15 = vpack.i.bf16 %v2731_v14, %v2730_v9  ;;  %v501_v16 = vpop.f32.mrb[7].mxu0  ;;  %v3090_v9 = vld [vmem:[#allocation6 + $0x40] sm:$0xff]   ;;  %v3093_v14 = vld [vmem:[#allocation6 + $0x58] sm:$0xff]  }
 0x617   :  { %2745 = vmatpush3.bf16.msra.mxu0 %v3090_v9 }
 0x618   :  { %2983 = vrot.lane.b32.xlu1 %v2982_v15, %s3359_s6  ;;  %2746 = vmatprep.subr.bf16.mxu0 %v3365_v2 }
 0x61b   :  { %v2734_v17 = vpop.f32.mrb[8].mxu0 }
 0x61c   :  { %v514_v19 = vpop.f32.mrb[9].mxu0 }
 0x61d   :  { %v2735_v20 = vpop.f32.mrb[10].mxu0 }
 0x61e   :  { %v2992_v21 = vpack.i.bf16 %v2735_v20, %v2734_v17  ;;  %v517_v23 = vpop.f32.mrb[11].mxu0 }
 0x61f   :  { %v2987_v24 = vpack.i.bf16 %v517_v23, %v514_v19  ;;  %v3644_v23 = vsub.s32 2, %v3508_v31 }
 0x620   :  { %2993 = vrot.lane.b32.xlu1 %v2992_v21, %s3371_s25 }
 0x621   :  { %2988 = vrot.lane.b32.xlu0 %v2987_v24, %s3372_s26 }
 0x68a   :  { %v2984_v25 = vpop.permute.xlu1 %2983 }
 0x68b   :  { %v2986_v28 = vunpack.i.h.bf16 %v2984_v25  ;;  %v2985_v29 = vunpack.i.l.bf16 %v2984_v25  ;;  %v658_v25 = vrot.slane %v3513_v33, %v3644_v23 }
 0x68d   :  { %v553_v37 = vsel %vm258_vm4, %v498_v13, %v2985_v29  ;;  %v554_v38 = vsel %vm258_vm4, %v501_v16, %v2986_v28  ;;  %v3092_v13 = vld [vmem:[#allocation6 + $0x50] sm:$0xff]   ;;  %v3649_v28 = vsub.s32 3, %v3508_v31 }
 0x692   :  { %v2994_v30 = vpop.permute.xlu1 %2993 }
 0x693   :  { %v2989_v34 = vpop.permute.xlu0 %2988  ;;  %v2996_v39 = vunpack.i.h.bf16 %v2994_v30  ;;  %v2995_v40 = vunpack.i.l.bf16 %v2994_v30 }
 0x694   :  { %v2991_v35 = vunpack.i.h.bf16 %v2989_v34  ;;  %v2990_v36 = vunpack.i.l.bf16 %v2989_v34  ;;  %v664_v34 = vrot.slane %v3513_v33, %v3649_v28 }
 0x696   :  { %v557_v41 = vsel %vm555_vm5, %v554_v38, %v2991_v35  ;;  %v556_v43 = vsel %vm555_vm5, %v553_v37, %v2990_v36 }
 0x697   :  { %v560_v44 = vsel %vm558_vm6, %v557_v41, %v2996_v39  ;;  %v559_v50 = vsel %vm558_vm6, %v556_v43, %v2995_v40  ;;  %v3094_v41 = vld [vmem:[#allocation6 + $0x60] sm:$0xff]   ;;  %v3095_v43 = vld [vmem:[#allocation6 + $0x68] sm:$0xff]  }
 0x698   :  { %v565_v45 = vpack.c.bf16 %v560_v44, %v559_v50  ;;  %v3658_v44 = vsub.s32 4, %v3508_v31 }
 0x69a   :  { %2741 = vmatmul.mubr.msk.bf16.vlgmr.msra.gmra.mrb[8].mxu1 %vm118_vm1, %v565_v45  ;;  %v675_v50 = vrot.slane %v3513_v33, %v3658_v44 }
 0x69b   :  { %2760 = vmatprep.mubr.msk.bf16.mxu1 %vm3366_vm0, %v3365_v2  ;;  %2753 = vmatpush3.bf16.msra.mxu1 %v3092_v13 }
 0x69c   :  { %2754 = vmatprep.subr.bf16.mxu1 %v3365_v2 }
 0x69f   :  { %2755 = vmatpush3.bf16.msra.mxu1 %v3093_v14 }
 0x6a0   :  { %2756 = vmatprep.subr.bf16.mxu1 %v3365_v2 }
 0x6a3   :  { %2757 = vmatpush3.bf16.msra.mxu1 %v3094_v41  ;;  %v3100_v41 = vld [vmem:[#allocation6 + $0x90] sm:$0xff]  }
 0x6a4   :  { %2758 = vmatprep.subr.bf16.mxu1 %v3365_v2 }
 0x6a7   :  { %2759 = vmatpush3.bf16.msra.mxu1 %v3095_v43 }
 0x76d   :  { %v619_v47 = vpop.f32.mrb[8].mxu1 }
 0x76e   :  { %v620_v48 = vadd.f32 %v619_v47, %v569_v46  ;;  %v2742_v51 = vpop.f32.mrb[9].mxu1 }
 0x76f   :  { %v622_v52 = vpop.f32.mrb[10].mxu1 }
 0x770   :  { %v623_v53 = vadd.f32 %v622_v52, %v569_v46  ;;  %v2743_v54 = vpop.f32.mrb[11].mxu1  ;;  %v626_v55 = vadd.f32 %v620_v48, %v3482_v10 }
 0x772   :  { %v628_v49 = vsel %vm118_vm1, %v626_v55, 0.0  ;;  %v627_v42 = vadd.f32 %v623_v53, %v3487_v11  ;;  %v3091_v11 = vld [vmem:[#allocation6 + $0x48] sm:$0xff]  }
 0x773   :  { %629 = vadd.xlane.f32.xlu0 %v628_v49  ;;  %2747 = vmatpush3.bf16.msra.mxu0 %v3091_v11  ;;  %v3664_v49 = vsub.s32 5, %v3508_v31 }
 0x774   :  { %v631_v57 = vsel %vm118_vm1, %v627_v42, 0.0  ;;  %2764 = vmatprep.subr.bf16.mxu0 %v3365_v2 }
 0x775   :  { %632 = vadd.xlane.f32.xlu1 %v631_v57 }
 0x800   :  { %v630_v58 = vpop.xlane.xlu0 %629 }
 0x801   :  { %v635_v59 = vmul.f32 0.03125, %v630_v58 }
 0x802   :  { %v633_v60 = vpop.xlane.xlu1 %632 }
 0x803   :  { %v637_v61 = vsub.f32 %v626_v55, %v635_v59  ;;  %v636_v62 = vmul.f32 0.03125, %v633_v60 }
 0x805   :  { %v638_v0 = vsub.f32 %v627_v42, %v636_v62  ;;  %v639_v1 = vmul.f32 %v637_v61, %v637_v61  ;;  %v746_v42 = vrot.slane %v3513_v33, %v3664_v49 }
 0x807   :  { %v641_v5 = vsel %vm118_vm1, %v639_v1, 0.0  ;;  %v640_v6 = vmul.f32 %v638_v0, %v638_v0 }
 0x808   :  { %642 = vadd.xlane.f32.xlu0 %v641_v5 }
 0x809   :  { %v644_v10 = vsel %vm118_vm1, %v640_v6, 0.0 }
 0x80c   :  { %645 = vadd.xlane.f32.xlu0 %v644_v10 }
 0x895   :  { %v643_v15 = vpop.xlane.xlu0 %642 }
 0x896   :  { %v647_v16 = vmul.f32 0.03125, %v643_v15 }
 0x898   :  { %v649_v17 = vadd.f32 1e-05, %v647_v16 }
 0x899   :  { %v646_v19 = vpop.xlane.xlu0 %645 }
 0x89a   :  { %3160 = vrsqrt.f32 %v649_v17  ;;  %v648_v20 = vmul.f32 0.03125, %v646_v19 }
 0x89c   :  { %v650_v21 = vadd.f32 1e-05, %v648_v20 }
 0x89e   :  { %3162 = vrsqrt.f32 %v650_v21  ;;  %v3096_v21 = vld [vmem:[#allocation6 + $0x70] sm:$0xff]  }
 0x8a4   :  { %v3161_v24 = vpop.eup %3160 }
 0x8a5   :  { %v653_v29 = vmul.f32 %v3161_v24, %v637_v61  ;;  %v3097_v24 = vld [vmem:[#allocation6 + $0x78] sm:$0xff]  }
 0x8a7   :  { %v659_v35 = vmul.f32 %v658_v25, %v653_v29  ;;  %v3099_v29 = vld [vmem:[#allocation6 + $0x88] sm:$0xff]  }
 0x8a8   :  { %v3163_v30 = vpop.eup %3162 }
 0x8a9   :  { %v654_v36 = vmul.f32 %v3163_v30, %v638_v0  ;;  %v665_v38 = vadd.f32 %v664_v34, %v659_v35 }
 0x8ab   :  { %v660_v37 = vmul.f32 %v658_v25, %v654_v36  ;;  %v3098_v25 = vld [vmem:[#allocation6 + $0x80] sm:$0xff]  }
 0x8ad   :  { %v666_v39 = vadd.f32 %v664_v34, %v660_v37 }
 0x8af   :  { %v671_v40 = vpack.c.bf16 %v666_v39, %v665_v38 }
 0x8b1   :  { %2749 = vmatmul.mubr.msk.bf16.vlgmr.msra.gmra.mrb[12].mxu0 %vm118_vm1, %v671_v40  ;;  %v3680_v40 = vsub.s32 7, %v3508_v31 }
 0x8b2   :  { %2776 = vmatprep.mubr.msk.bf16.mxu0 %vm3366_vm0, %v3365_v2  ;;  %2765 = vmatpush3.bf16.msra.mxu0 %v3096_v21 }
 0x8b3   :  { %2766 = vmatprep.subr.bf16.mxu0 %v3365_v2 }
 0x8b6   :  { %2767 = vmatpush3.bf16.msra.mxu0 %v3097_v24 }
 0x8b7   :  { %2768 = vmatprep.subr.bf16.mxu0 %v3365_v2 }
 0x8ba   :  { %2769 = vmatpush3.bf16.msra.mxu0 %v3098_v25 }
 0x8bb   :  { %2770 = vmatprep.subr.bf16.mxu0 %v3365_v2 }
 0x8be   :  { %2771 = vmatpush3.bf16.msra.mxu0 %v3099_v29 }
 0x8bf   :  { %2772 = vmatprep.subr.bf16.mxu0 %v3365_v2 }
 0x8c2   :  { %2773 = vmatpush3.bf16.msra.mxu0 %v3100_v41 }
 0x8c3   :  { %2774 = vmatprep.subr.bf16.mxu0 %v3365_v2 }
 0x984   :  { %v725_v45 = vpop.f32.mrb[12].mxu0 }
 0x985   :  { %v726_v46 = vadd.f32 %v725_v45, %v675_v50  ;;  %v2750_v47 = vpop.f32.mrb[13].mxu0 }
 0x986   :  { %v728_v48 = vpop.f32.mrb[14].mxu0  ;;  %v3101_v47 = vld [vmem:[#allocation6 + $0x98] sm:$0xff]  }
 0x987   :  { %v729_v51 = vadd.f32 %v728_v48, %v675_v50  ;;  %v2751_v52 = vpop.f32.mrb[15].mxu0  ;;  %v732_v53 = vmax.f32 %v726_v46, 0.0  ;;  %v852_v46 = vrot.slane %v3513_v33, %v3680_v40  ;;  %2775 = vmatpush3.bf16.msra.mxu0 %v3101_v47 }
 0x989   :  { %v733_v54 = vmax.f32 %v729_v51, 0.0 }
 0x98b   :  { %v742_v55 = vpack.c.bf16 %v733_v54, %v732_v53 }
 0x98d   :  { %2761 = vmatmul.mubr.msk.bf16.vlgmr.msra.gmra.mrb[12].mxu1 %vm121_vm2, %v742_v55 }
 0xa60   :  { %v808_v57 = vpop.f32.mrb[12].mxu1 }
 0xa61   :  { %v809_v58 = vadd.f32 %v808_v57, %v746_v42  ;;  %v2762_v59 = vpop.f32.mrb[13].mxu1 }
 0xa62   :  { %v811_v60 = vpop.f32.mrb[14].mxu1 }
 0xa63   :  { %v812_v61 = vadd.f32 %v811_v60, %v746_v42  ;;  %v2763_v62 = vpop.f32.mrb[15].mxu1  ;;  %v815_v0 = vadd.f32 %v809_v58, %v665_v38  ;;  %v3702_v60 = vld [vmem:[#allocation2] sm:$0xff] }
 0xa65   :  { %v817_v1 = vsel %vm118_vm1, %v815_v0, 0.0  ;;  %v816_v5 = vadd.f32 %v812_v61, %v666_v39  ;;  %v3677_v39 = vsub.s32 6, %v3508_v31 }
 0xa66   :  { %818 = vadd.xlane.f32.xlu1 %v817_v1  ;;  %v3706_v1 = vld [vmem:[#allocation2 + $0x8] sm:$0xff] }
 0xa67   :  { %v820_v6 = vsel %vm118_vm1, %v816_v5, 0.0  ;;  %v846_v43 = vrot.slane %v3513_v33, %v3677_v39 }
 0xa68   :  { %821 = vadd.xlane.f32.xlu0 %v820_v6 }
 0xaf3   :  { %v819_v10 = vpop.xlane.xlu1 %818 }
 0xaf4   :  { %v823_v9 = vmul.f32 0.03125, %v819_v10 }
 0xaf5   :  { %v822_v11 = vpop.xlane.xlu0 %821 }
 0xaf6   :  { %v825_v13 = vsub.f32 %v815_v0, %v823_v9  ;;  %v824_v14 = vmul.f32 0.03125, %v822_v11 }
 0xaf8   :  { %v826_v15 = vsub.f32 %v816_v5, %v824_v14  ;;  %v827_v16 = vmul.f32 %v825_v13, %v825_v13 }
 0xafa   :  { %v829_v17 = vsel %vm118_vm1, %v827_v16, 0.0  ;;  %v828_v19 = vmul.f32 %v826_v15, %v826_v15  ;;  %v3715_v16 = vld [vmem:[#allocation7 + $0x8] sm:$0xff] }
 0xafb   :  { %830 = vadd.xlane.f32.xlu1 %v829_v17  ;;  %v896_v17 = vrot.slane %v3715_v16, %v3511_v32 }
 0xafc   :  { %v832_v20 = vsel %vm118_vm1, %v828_v19, 0.0 }
 0xafd   :  { %833 = vadd.xlane.f32.xlu0 %v832_v20 }
 0xb88   :  { %v831_v30 = vpop.xlane.xlu1 %830 }
 0xb89   :  { %v835_v34 = vmul.f32 0.03125, %v831_v30 }
 0xb8a   :  { %v834_v35 = vpop.xlane.xlu0 %833 }
 0xb8b   :  { %v837_v36 = vadd.f32 1e-05, %v835_v34  ;;  %v836_v37 = vmul.f32 0.03125, %v834_v35 }
 0xb8d   :  { %3164 = vrsqrt.f32 %v837_v36  ;;  %v838_v38 = vadd.f32 1e-05, %v836_v37 }
 0xb8f   :  { %3166 = vrsqrt.f32 %v838_v38 }
 0xb97   :  { %v3165_v50 = vpop.eup %3164 }
 0xb98   :  { %v841_v45 = vmul.f32 %v3165_v50, %v825_v13 }
 0xb99   :  { %v3167_v48 = vpop.eup %3166 }
 0xb9a   :  { %v847_v51 = vmul.f32 %v846_v43, %v841_v45  ;;  %v842_v52 = vmul.f32 %v3167_v48, %v826_v15 }
 0xb9c   :  { %v848_v53 = vmul.f32 %v846_v43, %v842_v52  ;;  %v3687_v31 = vadd.f32 %v852_v46, %v847_v51 }
 0xb9e   :  { %v3689_v54 = vadd.f32 %v852_v46, %v848_v53  ;;  %v858_v42 = vmul.f32 %v3687_v31, %v3477_v8  ;;  %v856_v61 = vmul.f32 %v3702_v60, %v3687_v31 }
 0xba0   :  { %v3693_v55 = vpack.i.bf16 %v3689_v54, %v3687_v31  ;;  %v859_v33 = vmul.f32 %v3689_v54, %v3491_v12  ;;  %v857_v5 = vmul.f32 %v3706_v1, %v3689_v54 }
 0xba2   :  { %3003 = vrot.lane.b32.xlu0 %v3693_v55, %s3361_s1  ;;  %v2997_v57 = vpack.i.bf16 %v859_v33, %v858_v42 }
 0xba4   :  { %2998 = vrot.lane.b32.xlu1 %v2997_v57, %s3367_s22 }
 0xc14   :  { %v3004_v58 = vpop.permute.xlu0 %3003 }
 0xc15   :  { %v3006_v6 = vunpack.i.h.bf16 %v3004_v58  ;;  %v3005_v10 = vunpack.i.l.bf16 %v3004_v58 }
 0xc16   :  { %v2999_v59 = vpop.permute.xlu1 %2998 }
 0xc17   :  { %v3001_v62 = vunpack.i.h.bf16 %v2999_v59  ;;  %v3000_v0 = vunpack.i.l.bf16 %v2999_v59 }
 0xc19   :  { %v876_v9 = vsel %vm118_vm1, %v856_v61, %v3000_v0  ;;  %v877_v11 = vsel %vm118_vm1, %v857_v5, %v3001_v62 }
 0xc1a   :  { %v878_v13 = vsel %vm121_vm2, %v876_v9, %v3005_v10  ;;  %v879_v14 = vsel %vm121_vm2, %v877_v11, %v3006_v6 }
 0xc1b   :  { %v892_v15 = vpack.c.bf16 %v879_v14, %v878_v13 }
 0xc1d   :  { %2777 = vmatmul.mubr.msk.bf16.vlgmr.msra.gmra.mrb[16].mxu0 %vm177_vm3, %v892_v15 }
 0xcf0   :  { %v970_v19 = vpop.f32.mrb[16].mxu0 }
 0xcf1   :  { %v2778_v20 = vpop.f32.mrb[17].mxu0  ;;  %v971_v24 = vadd.f32 %v970_v19, %v896_v17 }
 0xcf2   :  { %v973_v21 = vpop.f32.mrb[18].mxu0 }
 0xcf3   :  { %v974_v25 = vadd.f32 %v973_v21, %v896_v17  ;;  %v2779_v29 = vpop.f32.mrb[19].mxu0 }
 0xcf5   :  { %v3017_v30 = vpack.i.bf16 %v974_v25, %v971_v24  ;;  %v3719_v34 = vpack.c.bf16 %v974_v25, %v971_v24 }
 0xcf7   :  { %3018 = vrot.lane.b32.xlu0 %v3017_v30, %s3370_s24  ;;  %3008 = vrot.lane.b32.xlu1 %v3017_v30, %s3369_s23 }
 0xcf8   :  { %2788 = vmatprep.mubr.msk.bf16.mxu1 %vm258_vm4, %v3719_v34 }
 0xcfb   :  { %3013 = vrot.lane.b32.xlu1 %v3017_v30, %s3368_s0 }
 0xcff   :  { %1005 = vrot.lane.b32.xlu1 %v3719_v34, %s3364_s18 }
 0xd69   :  { %v3019_v35 = vpop.permute.xlu0 %3018  ;;  %v3009_v36 = vpop.permute.xlu1 %3008 }
 0xd6a   :  { %v3011_v37 = vunpack.i.h.bf16 %v3009_v36  ;;  %v3010_v38 = vunpack.i.l.bf16 %v3009_v36  ;;  %v3021_v41 = vunpack.i.h.bf16 %v3019_v35  ;;  %v3020_v43 = vunpack.i.l.bf16 %v3019_v35 }
 0xd6c   :  { %v998_v50 = vpack.c.bf16 %v3011_v37, %v3010_v38  ;;  %v3729_v48 = vpack.c.bf16 %v3021_v41, %v3020_v43 }
 0xd6d   :  { %v3014_v45 = vpop.permute.xlu1 %3013 }
 0xd6e   :  { %v3016_v46 = vunpack.i.h.bf16 %v3014_v45  ;;  %v3015_v47 = vunpack.i.l.bf16 %v3014_v45  ;;  %1007 = vrot.lane.b32.xlu0 %v998_v50, %s3364_s18 }
 0xd70   :  { %v3731_v51 = vpack.c.bf16 %v3016_v46, %v3015_v47 }
 0xd71   :  { %v1006_v52 = vpop.permute.xlu1 %1005 }
 0xd72   :  { %v1026_v53 = vsel %vm258_vm4, %v1006_v52, 0  ;;  %1011 = vrot.lane.b32.xlu0 %v3729_v48, %s3364_s18  ;;  %1009 = vrot.lane.b32.xlu1 %v3731_v51, %s3364_s18 }
 0xd73   :  { %2932 = vmatprep.subr.msk.bf16.mxu1 %vm258_vm4, %v1006_v52 }
 0xd74   :  { %2781 = vmatpush3.bf16.xpose.msra.mxu1 %v1026_v53 }
 0xde0   :  { %v1008_v42 = vpop.permute.xlu0 %1007 }
 0xde1   :  { %v1029_v33 = vsel %vm258_vm4, %v1008_v42, 0  ;;  %2933 = vmatprep.subr.msk.bf16.mxu1 %vm258_vm4, %v1008_v42 }
 0xde2   :  { %2783 = vmatpush3.bf16.xpose.msra.mxu1 %v1029_v33 }
 0xde4   :  { %v1010_v57 = vpop.permute.xlu1 %1009  ;;  %v1012_v59 = vpop.permute.xlu0 %1011 }
 0xde5   :  { %2934 = vmatprep.subr.msk.bf16.mxu1 %vm258_vm4, %v1010_v57  ;;  %v1032_v58 = vsel %vm258_vm4, %v1010_v57, 0  ;;  %v1035_v61 = vsel %vm258_vm4, %v1012_v59, 0 }
 0xdea   :  { %2785 = vmatpush3.bf16.xpose.msra.mxu1 %v1032_v58 }
 0xdeb   :  { %2935 = vmatprep.subr.msk.bf16.mxu1 %vm258_vm4, %v1012_v59 }
 0xdf2   :  { %2787 = vmatpush3.bf16.xpose.msra.mxu1 %v1035_v61 }
 0xdf3   :  { %2820 = vmatprep.subr.bf16.mxu1 %v3365_v2 }
 0xdf9   :  { %2789 = vmatmul.mubr.msk.bf16.vlgmr.msra.gmra.mrb[16].mxu1 %vm258_vm4, %v998_v50 }
 0xdfa   :  { %2792 = vmatprep.mubr.msk.bf16.mxu1 %vm258_vm4, %v3731_v51 }
 0xe01   :  { %2793 = vmatmul.mubr.msk.bf16.gmra.mrb[20].mxu1 %vm258_vm4, %v3729_v48 }
 0xe02   :  { %2824 = vmatprep.mubr.msk.bf16.mxu1 %vm3366_vm0, %v3365_v2 }
 0xecc   :  { %v2790_v62 = vpop.f32.mrb[16].mxu1 }
 0xecd   :  { %v1071_v0 = vpop.f32.mrb[17].mxu1  ;;  %v1080_v14 = vadd.f32 %v2790_v62, %v3562_v7 }
 0xece   :  { %v1072_v5 = vadd.f32 %v1071_v0, %v3555_v63  ;;  %v2791_v6 = vpop.f32.mrb[18].mxu1 }
 0xecf   :  { %v1074_v10 = vpop.f32.mrb[19].mxu1  ;;  %v1083_v9 = vadd.f32 %v2791_v6, %v3557_v3  ;;  %v1108_v3 = vsel %vm121_vm2, %v1080_v14, -inf }
 0xed0   :  { %v1075_v11 = vadd.f32 %v1074_v10, %v3559_v4  ;;  %v1102_v13 = vsel %vm121_vm2, %v1072_v5, -inf }
 0xed1   :  { %1103 = vmax.xlane.f32.xlu1 %v1102_v13  ;;  %v1111_v19 = vsel %vm121_vm2, %v1083_v9, -inf }
 0xed2   :  { %v1105_v15 = vsel %vm121_vm2, %v1075_v11, -inf }
 0xed3   :  { %1106 = vmax.xlane.f32.xlu0 %v1105_v15 }
 0xed4   :  { %v2794_v17 = vpop.f32.mrb[20].mxu1 }
 0xed5   :  { %v1087_v20 = vpop.f32.mrb[21].mxu1  ;;  %1112 = vmax.xlane.f32.xlu1 %v1111_v19  ;;  %v1096_v25 = vadd.f32 %v2794_v17, %v3576_v26 }
 0xed6   :  { %v1088_v63 = vadd.f32 %v1087_v20, %v3569_v18  ;;  %v2795_v21 = vpop.f32.mrb[22].mxu1 }
 0xed7   :  { %v1090_v24 = vpop.f32.mrb[23].mxu1  ;;  %1109 = vmax.xlane.f32.xlu0 %v1108_v3  ;;  %v1099_v7 = vadd.f32 %v2795_v21, %v3578_v27  ;;  %v1120_v35 = vsel %vm121_vm2, %v1096_v25, -inf }
 0xed8   :  { %v1091_v4 = vadd.f32 %v1090_v24, %v3572_v22  ;;  %v1114_v29 = vsel %vm121_vm2, %v1088_v63, -inf }
 0xed9   :  { %v1123_v18 = vsel %vm121_vm2, %v1099_v7, -inf }
 0xeda   :  { %v1117_v30 = vsel %vm121_vm2, %v1091_v4, -inf }
 0xedb   :  { %1115 = vmax.xlane.f32.xlu0 %v1114_v29  ;;  %1118 = vmax.xlane.f32.xlu1 %v1117_v30 }
 0xedf   :  { %1121 = vmax.xlane.f32.xlu0 %v1120_v35  ;;  %1124 = vmax.xlane.f32.xlu1 %v1123_v18 }
 0xef0   :  { %1196 = vrot.lane.b32.xlu1 %v998_v50, %s3361_s1 }
 0xef5   :  { %1194 = vrot.lane.b32.xlu0 %v3719_v34, %s3361_s1 }
 0xf5e   :  { %v1104_v22 = vpop.xlane.xlu1 %1103 }
 0xf5f   :  { %v1126_v37 = vsub.f32 %v1072_v5, %v1104_v22 }
 0xf60   :  { %v1107_v26 = vpop.xlane.xlu0 %1106 }
 0xf61   :  { %v1127_v27 = vsub.f32 %v1075_v11, %v1107_v26  ;;  %v1134_v47 = vmul.f32 1.442695, %v1126_v37 }
 0xf62   :  { %v1113_v36 = vpop.xlane.xlu1 %1112 }
 0xf63   :  { %v1129_v38 = vsub.f32 %v1083_v9, %v1113_v36  ;;  %v1136_v41 = vmul.f32 1.442695, %v1127_v27 }
 0xf64   :  { %v1110_v43 = vpop.xlane.xlu0 %1109 }
 0xf65   :  { %v1140_v45 = vmul.f32 1.442695, %v1129_v38  ;;  %v1128_v46 = vsub.f32 %v1080_v14, %v1110_v43 }
 0xf67   :  { %3168 = vpow2.f32 %v1140_v45  ;;  %v1138_v52 = vmul.f32 1.442695, %v1128_v46 }
 0xf68   :  { %3170 = vpow2.f32 %v1136_v41  ;;  %v1116_v53 = vpop.xlane.xlu0 %1115  ;;  %v1119_v42 = vpop.xlane.xlu1 %1118 }
 0xf69   :  { %3172 = vpow2.f32 %v1138_v52  ;;  %v1130_v50 = vsub.f32 %v1088_v63, %v1116_v53  ;;  %v1131_v34 = vsub.f32 %v1091_v4, %v1119_v42 }
 0xf6a   :  { %3174 = vpow2.f32 %v1134_v47 }
 0xf6b   :  { %v1142_v61 = vmul.f32 1.442695, %v1130_v50  ;;  %v1144_v5 = vmul.f32 1.442695, %v1131_v34 }
 0xf6c   :  { %v1122_v33 = vpop.xlane.xlu0 %1121  ;;  %v1125_v57 = vpop.xlane.xlu1 %1124 }
 0xf6d   :  { %v1132_v58 = vsub.f32 %v1096_v25, %v1122_v33  ;;  %v1133_v59 = vsub.f32 %v1099_v7, %v1125_v57 }
 0xf6f   :  { %v1146_v62 = vmul.f32 1.442695, %v1132_v58  ;;  %v1148_v0 = vmul.f32 1.442695, %v1133_v59 }
 0xf70   :  { %v1195_v6 = vpop.permute.xlu0 %1194  ;;  %v1197_v11 = vpop.permute.xlu1 %1196 }
 0xf71   :  { %v3772_v10 = vpop.eup %3168  ;;  %3176 = vpow2.f32 %v1146_v62  ;;  %2796 = vmatprep.subr.bf16.mxu0 %v1195_v6 }
 0xf72   :  { %v3171_v9 = vpop.eup %3170  ;;  %3178 = vpow2.f32 %v1148_v0  ;;  %2797 = vmatpush3.bf16.msra.mxu0 %v1195_v6  ;;  %v1159_v13 = vsel %vm121_vm2, %v3772_v10, 0.0 }
 0xf73   :  { %v3173_v14 = vpop.eup %3172  ;;  %3180 = vpow2.f32 %v1142_v61  ;;  %1160 = vadd.xlane.f32.xlu1 %v1159_v13  ;;  %2798 = vmatprep.subr.bf16.mxu0 %v1197_v11  ;;  %v1153_v19 = vsel %vm121_vm2, %v3171_v9, 0.0 }
 0xf74   :  { %3182 = vpow2.f32 %v1144_v5  ;;  %v1156_v15 = vsel %vm121_vm2, %v3173_v14, 0.0  ;;  %v3175_v17 = vpop.eup %3174 }
 0xf75   :  { %1157 = vadd.xlane.f32.xlu0 %v1156_v15  ;;  %v1150_v20 = vsel %vm121_vm2, %v3175_v17, 0.0 }
 0xf76   :  { %2799 = vmatpush3.bf16.msra.mxu0 %v1197_v11 }
 0xf77   :  { %1154 = vadd.xlane.f32.xlu1 %v1153_v19 }
 0xf79   :  { %1151 = vadd.xlane.f32.xlu0 %v1150_v20 }
 0xf7b   :  { %v3177_v63 = vpop.eup %3176 }
 0xf7c   :  { %v3179_v21 = vpop.eup %3178  ;;  %v1168_v3 = vsel %vm121_vm2, %v3177_v63, 0.0 }
 0xf7d   :  { %v3181_v24 = vpop.eup %3180  ;;  %1169 = vadd.xlane.f32.xlu0 %v1168_v3  ;;  %v1171_v4 = vsel %vm121_vm2, %v3179_v21, 0.0 }
 0xf7e   :  { %v3183_v25 = vpop.eup %3182  ;;  %1172 = vadd.xlane.f32.xlu1 %v1171_v4  ;;  %v1162_v7 = vsel %vm121_vm2, %v3181_v24, 0.0 }
 0xf7f   :  { %v1165_v29 = vsel %vm121_vm2, %v3183_v25, 0.0 }
 0xf81   :  { %1163 = vadd.xlane.f32.xlu0 %v1162_v7 }
 0xf82   :  { %1166 = vadd.xlane.f32.xlu1 %v1165_v29 }
 0xf93   :  { %1198 = vrot.lane.b32.xlu1 %v3731_v51, %s3361_s1 }
 0xf97   :  { %1200 = vrot.lane.b32.xlu0 %v3729_v48, %s3361_s1 }
0x1000   :  { %v1161_v30 = vpop.xlane.xlu1 %1160 }
0x1002   :  { %v1158_v35 = vpop.xlane.xlu0 %1157 }
0x1004   :  { %v1155_v18 = vpop.xlane.xlu1 %1154 }
0x1005   :  { %3184 = vrcp.f32 %v1155_v18 }
0x1006   :  { %v1152_v22 = vpop.xlane.xlu0 %1151 }
0x1007   :  { %3186 = vrcp.f32 %v1152_v22 }
0x1008   :  { %3188 = vrcp.f32 %v1158_v35 }
0x1009   :  { %3190 = vrcp.f32 %v1161_v30 }
0x100a   :  { %v1170_v26 = vpop.xlane.xlu0 %1169 }
0x100b   :  { %v1173_v27 = vpop.xlane.xlu1 %1172  ;;  %3192 = vrcp.f32 %v1170_v26 }
0x100e   :  { %v1164_v36 = vpop.xlane.xlu0 %1163 }
0x100f   :  { %v3185_v37 = vpop.eup %3184  ;;  %3194 = vrcp.f32 %v1164_v36  ;;  %v1167_v38 = vpop.xlane.xlu1 %1166 }
0x1010   :  { %3196 = vrcp.f32 %v1167_v38  ;;  %v1183_v48 = vmul.f32 %v3185_v37, %v3171_v9  ;;  %v3103_v9 = vld [vmem:[#allocation6 + $0xa8] sm:$0xff]  }
0x1011   :  { %v3187_v51 = vpop.eup %3186  ;;  %3198 = vrcp.f32 %v1173_v27 }
0x1012   :  { %v1182_v41 = vmul.f32 %v3187_v51, %v3175_v17  ;;  %v3189_v43 = vpop.eup %3188  ;;  %v1201_v52 = vpop.permute.xlu0 %1200 }
0x1013   :  { %v1199_v45 = vpop.permute.xlu1 %1198  ;;  %v3191_v47 = vpop.eup %3190  ;;  %v1184_v53 = vmul.f32 %v3189_v43, %v3173_v14  ;;  %v1321_v43 = vrot.slane %v3715_v16, %v3629_v56 }
0x1014   :  { %2800 = vmatprep.subr.bf16.mxu0 %v1199_v45  ;;  %v1190_v46 = vpack.c.bf16 %v1183_v48, %v1182_v41  ;;  %v1185_v50 = vmul.f32 %v3191_v47, %v3772_v10  ;;  %v3102_v10 = vld [vmem:[#allocation6 + $0xa0] sm:$0xff]  }
0x1015   :  { %2801 = vmatpush3.bf16.msra.mxu0 %v1199_v45  ;;  %v3193_v42 = vpop.eup %3192 }
0x1016   :  { %2802 = vmatprep.subr.bf16.mxu0 %v1201_v52  ;;  %2804 = vmatprep.mubr.msk.bf16.mxu0 %vm121_vm2, %v1190_v46  ;;  %v1191_v57 = vpack.c.bf16 %v1185_v50, %v1184_v53  ;;  %v1188_v0 = vmul.f32 %v3193_v42, %v3177_v63 }
0x1019   :  { %v3195_v34 = vpop.eup %3194  ;;  %2803 = vmatpush3.bf16.msra.mxu0 %v1201_v52 }
0x101a   :  { %v3197_v33 = vpop.eup %3196  ;;  %v1186_v58 = vmul.f32 %v3195_v34, %v3181_v24  ;;  %2812 = vmatprep.subr.bf16.mxu0 %v3365_v2 }
0x101b   :  { %v3199_v59 = vpop.eup %3198  ;;  %v1187_v61 = vmul.f32 %v3197_v33, %v3183_v25 }
0x101c   :  { %2805 = vmatmul.mubr.msk.bf16.vlgmr.msra.gmra.mrb[20].mxu0 %vm121_vm2, %v1191_v57  ;;  %v1189_v5 = vmul.f32 %v3199_v59, %v3179_v21 }
0x101d   :  { %v1192_v62 = vpack.c.bf16 %v1187_v61, %v1186_v58  ;;  %2813 = vmatpush3.bf16.msra.mxu0 %v3102_v10 }
0x101e   :  { %v1193_v6 = vpack.c.bf16 %v1189_v5, %v1188_v0  ;;  %2814 = vmatprep.subr.bf16.mxu0 %v3365_v2 }
0x101f   :  { %2808 = vmatprep.mubr.msk.bf16.mxu0 %vm121_vm2, %v1192_v62 }
0x1021   :  { %2815 = vmatpush3.bf16.msra.mxu0 %v3103_v9 }
0x1022   :  { %2828 = vmatprep.subr.bf16.mxu0 %v3365_v2 }
0x1024   :  { %2809 = vmatmul.mubr.msk.bf16.gmra.mrb[24].mxu0 %vm121_vm2, %v1193_v6 }
0x1025   :  { %2816 = vmatprep.mubr.msk.bf16.mxu0 %vm3366_vm0, %v3365_v2 }
0x10ef   :  { %v2806_v11 = vpop.f32.mrb[20].mxu0 }
0x10f0   :  { %v1252_v13 = vpop.f32.mrb[21].mxu0 }
0x10f1   :  { %v2807_v14 = vpop.f32.mrb[22].mxu0 }
0x10f2   :  { %v3022_v15 = vpack.i.bf16 %v2807_v14, %v2806_v11  ;;  %v1255_v17 = vpop.f32.mrb[23].mxu0  ;;  %v3104_v11 = vld [vmem:[#allocation6 + $0xb0] sm:$0xff]   ;;  %v3107_v14 = vld [vmem:[#allocation6 + $0xc8] sm:$0xff]  }
0x10f3   :  { %2821 = vmatpush3.bf16.msra.mxu1 %v3104_v11 }
0x10f4   :  { %3023 = vrot.lane.b32.xlu1 %v3022_v15, %s3359_s6  ;;  %2822 = vmatprep.subr.bf16.mxu1 %v3365_v2 }
0x10f7   :  { %v2810_v19 = vpop.f32.mrb[24].mxu0 }
0x10f8   :  { %v1268_v20 = vpop.f32.mrb[25].mxu0 }
0x10f9   :  { %v2811_v63 = vpop.f32.mrb[26].mxu0 }
0x10fa   :  { %v3032_v21 = vpack.i.bf16 %v2811_v63, %v2810_v19  ;;  %v1271_v3 = vpop.f32.mrb[27].mxu0 }
0x10fb   :  { %v3027_v24 = vpack.i.bf16 %v1271_v3, %v1268_v20 }
0x10fc   :  { %3033 = vrot.lane.b32.xlu1 %v3032_v21, %s3371_s25 }
0x10fd   :  { %3028 = vrot.lane.b32.xlu0 %v3027_v24, %s3372_s26  ;;  %v1409_v24 = vrot.slane %v3715_v16, %v3644_v23 }
0x1166   :  { %v3024_v4 = vpop.permute.xlu1 %3023 }
0x1167   :  { %v3026_v25 = vunpack.i.h.bf16 %v3024_v4  ;;  %v3025_v7 = vunpack.i.l.bf16 %v3024_v4 }
0x1169   :  { %v1307_v22 = vsel %vm258_vm4, %v1252_v13, %v3025_v7  ;;  %v1308_v26 = vsel %vm258_vm4, %v1255_v17, %v3026_v25  ;;  %v3106_v13 = vld [vmem:[#allocation6 + $0xc0] sm:$0xff]   ;;  %v1415_v7 = vrot.slane %v3715_v16, %v3649_v28 }
0x116e   :  { %v3034_v29 = vpop.permute.xlu1 %3033 }
0x116f   :  { %v3029_v30 = vpop.permute.xlu0 %3028  ;;  %v3036_v27 = vunpack.i.h.bf16 %v3034_v29  ;;  %v3035_v36 = vunpack.i.l.bf16 %v3034_v29 }
0x1170   :  { %v3031_v35 = vunpack.i.h.bf16 %v3029_v30  ;;  %v3030_v18 = vunpack.i.l.bf16 %v3029_v30 }
0x1172   :  { %v1310_v37 = vsel %vm555_vm5, %v1308_v26, %v3031_v35  ;;  %v1309_v38 = vsel %vm555_vm5, %v1307_v22, %v3030_v18 }
0x1173   :  { %v1312_v51 = vsel %vm558_vm6, %v1310_v37, %v3036_v27  ;;  %v1311_v41 = vsel %vm558_vm6, %v1309_v38, %v3035_v36  ;;  %v3108_v27 = vld [vmem:[#allocation6 + $0xd0] sm:$0xff]   ;;  %v3109_v36 = vld [vmem:[#allocation6 + $0xd8] sm:$0xff]   ;;  %v1426_v37 = vrot.slane %v3715_v16, %v3658_v44 }
0x1174   :  { %v1317_v48 = vpack.c.bf16 %v1312_v51, %v1311_v41 }
0x1176   :  { %2817 = vmatmul.mubr.msk.bf16.vlgmr.msra.gmra.mrb[28].mxu0 %vm118_vm1, %v1317_v48 }
0x1177   :  { %2836 = vmatprep.mubr.msk.bf16.mxu0 %vm3366_vm0, %v3365_v2  ;;  %2829 = vmatpush3.bf16.msra.mxu0 %v3106_v13 }
0x1178   :  { %2830 = vmatprep.subr.bf16.mxu0 %v3365_v2 }
0x117b   :  { %2831 = vmatpush3.bf16.msra.mxu0 %v3107_v14 }
0x117c   :  { %2832 = vmatprep.subr.bf16.mxu0 %v3365_v2 }
0x117f   :  { %2833 = vmatpush3.bf16.msra.mxu0 %v3108_v27 }
0x1180   :  { %2834 = vmatprep.subr.bf16.mxu0 %v3365_v2 }
0x1183   :  { %2835 = vmatpush3.bf16.msra.mxu0 %v3109_v36 }
0x1184   :  { %2852 = vmatprep.subr.bf16.mxu0 %v3365_v2 }
0x1249   :  { %v1371_v45 = vpop.f32.mrb[28].mxu0 }
0x124a   :  { %v1372_v46 = vadd.f32 %v1371_v45, %v1321_v43  ;;  %v2818_v47 = vpop.f32.mrb[29].mxu0 }
0x124b   :  { %v1374_v52 = vpop.f32.mrb[30].mxu0 }
0x124c   :  { %v1375_v53 = vadd.f32 %v1374_v52, %v1321_v43  ;;  %v2819_v42 = vpop.f32.mrb[31].mxu0  ;;  %v1378_v50 = vadd.f32 %v1372_v46, %v3687_v31 }
0x124e   :  { %v1380_v34 = vsel %vm118_vm1, %v1378_v50, 0.0  ;;  %v1379_v33 = vadd.f32 %v1375_v53, %v3689_v54  ;;  %v3105_v54 = vld [vmem:[#allocation6 + $0xb8] sm:$0xff]   ;;  %v1497_v53 = vrot.slane %v3715_v16, %v3664_v49 }
0x124f   :  { %1381 = vadd.xlane.f32.xlu0 %v1380_v34  ;;  %2823 = vmatpush3.bf16.msra.mxu1 %v3105_v54 }
0x1250   :  { %v1383_v57 = vsel %vm118_vm1, %v1379_v33, 0.0  ;;  %2840 = vmatprep.subr.bf16.mxu1 %v3365_v2 }
0x1251   :  { %1384 = vadd.xlane.f32.xlu1 %v1383_v57 }
0x12dc   :  { %v1382_v58 = vpop.xlane.xlu0 %1381 }
0x12dd   :  { %v1386_v59 = vmul.f32 0.03125, %v1382_v58 }
0x12de   :  { %v1385_v61 = vpop.xlane.xlu1 %1384 }
0x12df   :  { %v1388_v62 = vsub.f32 %v1378_v50, %v1386_v59  ;;  %v1387_v0 = vmul.f32 0.03125, %v1385_v61 }
0x12e1   :  { %v1389_v5 = vsub.f32 %v1379_v33, %v1387_v0  ;;  %v1390_v6 = vmul.f32 %v1388_v62, %v1388_v62 }
0x12e3   :  { %v1392_v10 = vsel %vm118_vm1, %v1390_v6, 0.0  ;;  %v1391_v9 = vmul.f32 %v1389_v5, %v1389_v5 }
0x12e4   :  { %1393 = vadd.xlane.f32.xlu0 %v1392_v10 }
0x12e5   :  { %v1395_v31 = vsel %vm118_vm1, %v1391_v9, 0.0 }
0x12e8   :  { %1396 = vadd.xlane.f32.xlu0 %v1395_v31 }
0x1371   :  { %v1394_v15 = vpop.xlane.xlu0 %1393 }
0x1372   :  { %v1398_v17 = vmul.f32 0.03125, %v1394_v15 }
0x1374   :  { %v1400_v19 = vadd.f32 1e-05, %v1398_v17  ;;  %v3110_v17 = vld [vmem:[#allocation6 + $0x150] sm:$0xff]  }
0x1375   :  { %v1397_v20 = vpop.xlane.xlu0 %1396 }
0x1376   :  { %3200 = vrsqrt.f32 %v1400_v19  ;;  %v1399_v63 = vmul.f32 0.03125, %v1397_v20  ;;  %v3111_v19 = vld [vmem:[#allocation6 + $0x158] sm:$0xff]   ;;  %v3112_v20 = vld [vmem:[#allocation6 + $0x160] sm:$0xff]  }
0x1378   :  { %v1401_v21 = vadd.f32 1e-05, %v1399_v63  ;;  %v3113_v63 = vld [vmem:[#allocation6 + $0x168] sm:$0xff]  }
0x137a   :  { %3202 = vrsqrt.f32 %v1401_v21 }
0x1380   :  { %v3201_v3 = vpop.eup %3200 }
0x1381   :  { %v1404_v4 = vmul.f32 %v3201_v3, %v1388_v62 }
0x1383   :  { %v1410_v29 = vmul.f32 %v1409_v24, %v1404_v4 }
0x1384   :  { %v3203_v25 = vpop.eup %3202 }
0x1385   :  { %v1405_v30 = vmul.f32 %v3203_v25, %v1389_v5  ;;  %v1416_v18 = vadd.f32 %v1415_v7, %v1410_v29 }
0x1387   :  { %v1411_v35 = vmul.f32 %v1409_v24, %v1405_v30 }
0x1389   :  { %v1417_v22 = vadd.f32 %v1415_v7, %v1411_v35  ;;  %v1597_v7 = vrot.slane %v3715_v16, %v3677_v39  ;;  %v1603_v35 = vrot.slane %v3715_v16, %v3680_v40  ;;  %v3116_v16 = vld [vmem:[#allocation6 + $0xf0] sm:$0xff]  }
0x138b   :  { %v1422_v26 = vpack.c.bf16 %v1417_v22, %v1416_v18 }
0x138d   :  { %2825 = vmatmul.mubr.msk.bf16.vlgmr.msra.gmra.mrb[24].mxu1 %vm118_vm1, %v1422_v26 }
0x138e   :  { %2848 = vmatprep.mubr.msk.bf16.mxu1 %vm3366_vm0, %v3365_v2  ;;  %2841 = vmatpush3.bf16.msra.mxu1 %v3110_v17 }
0x138f   :  { %2842 = vmatprep.subr.bf16.mxu1 %v3365_v2 }
0x1392   :  { %2843 = vmatpush3.bf16.msra.mxu1 %v3111_v19 }
0x1393   :  { %2844 = vmatprep.subr.bf16.mxu1 %v3365_v2 }
0x1396   :  { %2845 = vmatpush3.bf16.msra.mxu1 %v3112_v20 }
0x1397   :  { %2846 = vmatprep.subr.bf16.mxu1 %v3365_v2 }
0x139a   :  { %2847 = vmatpush3.bf16.msra.mxu1 %v3113_v63 }
0x1460   :  { %v1476_v38 = vpop.f32.mrb[24].mxu1 }
0x1461   :  { %v1477_v51 = vadd.f32 %v1476_v38, %v1426_v37  ;;  %v2826_v41 = vpop.f32.mrb[25].mxu1 }
0x1462   :  { %v1479_v48 = vpop.f32.mrb[26].mxu1 }
0x1463   :  { %v1480_v43 = vadd.f32 %v1479_v48, %v1426_v37  ;;  %v2827_v45 = vpop.f32.mrb[27].mxu1  ;;  %v1483_v46 = vmax.f32 %v1477_v51, 0.0 }
0x1465   :  { %v1484_v47 = vmax.f32 %v1480_v43, 0.0 }
0x1467   :  { %v1493_v52 = vpack.c.bf16 %v1484_v47, %v1483_v46  ;;  %v3114_v46 = vld [vmem:[#allocation6 + $0xe0] sm:$0xff]   ;;  %v3115_v47 = vld [vmem:[#allocation6 + $0xe8] sm:$0xff]  }
0x1469   :  { %2837 = vmatmul.mubr.msk.bf16.vlgmr.msra.gmra.mrb[32].mxu0 %vm121_vm2, %v1493_v52  ;;  %v3117_v52 = vld [vmem:[#allocation6 + $0xf8] sm:$0xff]  }
0x146a   :  { %2864 = vmatprep.mubr.msk.bf16.mxu0 %vm3366_vm0, %v3365_v2  ;;  %2853 = vmatpush3.bf16.msra.mxu0 %v3114_v46 }
0x146b   :  { %2854 = vmatprep.subr.bf16.mxu0 %v3365_v2 }
0x146e   :  { %2855 = vmatpush3.bf16.msra.mxu0 %v3115_v47 }
0x146f   :  { %2856 = vmatprep.subr.bf16.mxu0 %v3365_v2 }
0x1472   :  { %2857 = vmatpush3.bf16.msra.mxu0 %v3116_v16 }
0x1473   :  { %2858 = vmatprep.subr.bf16.mxu0 %v3365_v2 }
0x1476   :  { %2859 = vmatpush3.bf16.msra.mxu0 %v3117_v52 }
0x1477   :  { %2860 = vmatprep.subr.bf16.mxu0 %v3365_v2 }
0x153c   :  { %v1559_v42 = vpop.f32.mrb[32].mxu0 }
0x153d   :  { %v1560_v50 = vadd.f32 %v1559_v42, %v1497_v53  ;;  %v2838_v34 = vpop.f32.mrb[33].mxu0  ;;  %v3857_v42 = vld [vmem:[#allocation7 + $0x18] sm:$0xff] }
0x153e   :  { %v1562_v33 = vpop.f32.mrb[34].mxu0  ;;  %v3119_v34 = vld [vmem:[#allocation6 + $0x108] sm:$0xff]  }
0x153f   :  { %v1563_v57 = vadd.f32 %v1562_v33, %v1497_v53  ;;  %v2839_v58 = vpop.f32.mrb[35].mxu0  ;;  %v1566_v59 = vadd.f32 %v1560_v50, %v1416_v18  ;;  %v3118_v53 = vld [vmem:[#allocation6 + $0x100] sm:$0xff]   ;;  %v1626_v50 = vrot.slane %v3857_v42, %v3511_v32 }
0x1540   :  { %2861 = vmatpush3.bf16.msra.mxu0 %v3118_v53 }
0x1541   :  { %v1568_v61 = vsel %vm118_vm1, %v1566_v59, 0.0  ;;  %v1567_v62 = vadd.f32 %v1563_v57, %v1417_v22  ;;  %2862 = vmatprep.subr.bf16.mxu0 %v3365_v2 }
0x1542   :  { %1569 = vadd.xlane.f32.xlu1 %v1568_v61 }
0x1543   :  { %v1571_v0 = vsel %vm118_vm1, %v1567_v62, 0.0 }
0x1544   :  { %1572 = vadd.xlane.f32.xlu0 %v1571_v0  ;;  %2863 = vmatpush3.bf16.msra.mxu0 %v3119_v34 }
0x15cf   :  { %v1570_v5 = vpop.xlane.xlu1 %1569 }
0x15d0   :  { %v1574_v6 = vmul.f32 0.03125, %v1570_v5 }
0x15d1   :  { %v1573_v10 = vpop.xlane.xlu0 %1572 }
0x15d2   :  { %v1576_v9 = vsub.f32 %v1566_v59, %v1574_v6  ;;  %v1575_v31 = vmul.f32 0.03125, %v1573_v10 }
0x15d4   :  { %v1577_v11 = vsub.f32 %v1567_v62, %v1575_v31  ;;  %v1578_v54 = vmul.f32 %v1576_v9, %v1576_v9 }
0x15d6   :  { %v1580_v13 = vsel %vm118_vm1, %v1578_v54, 0.0  ;;  %v1579_v14 = vmul.f32 %v1577_v11, %v1577_v11 }
0x15d7   :  { %1581 = vadd.xlane.f32.xlu1 %v1580_v13 }
0x15d8   :  { %v1583_v15 = vsel %vm118_vm1, %v1579_v14, 0.0 }
0x15d9   :  { %1584 = vadd.xlane.f32.xlu0 %v1583_v15 }
0x15e8   :  { %3038 = vrot.lane.b32.xlu1 %v3693_v55, %s3367_s22 }
0x1664   :  { %v1582_v21 = vpop.xlane.xlu1 %1581 }
0x1665   :  { %v1586_v3 = vmul.f32 0.03125, %v1582_v21  ;;  %v3883_v21 = vld [vmem:[#allocation7 + $0x10] sm:$0xff] }
0x1666   :  { %v1585_v24 = vpop.xlane.xlu0 %1584 }
0x1667   :  { %v1588_v4 = vadd.f32 1e-05, %v1586_v3  ;;  %v1587_v25 = vmul.f32 0.03125, %v1585_v24 }
0x1668   :  { %v3039_v27 = vpop.permute.xlu1 %3038 }
0x1669   :  { %3204 = vrsqrt.f32 %v1588_v4  ;;  %v1589_v55 = vadd.f32 1e-05, %v1587_v25  ;;  %v3041_v38 = vunpack.i.h.bf16 %v3039_v27  ;;  %v3040_v51 = vunpack.i.l.bf16 %v3039_v27 }
0x166b   :  { %3206 = vrsqrt.f32 %v1589_v55 }
0x1673   :  { %v3205_v29 = vpop.eup %3204 }
0x1674   :  { %v1592_v30 = vmul.f32 %v3205_v29, %v1576_v9 }
0x1675   :  { %v3207_v18 = vpop.eup %3206 }
0x1676   :  { %v1593_v22 = vmul.f32 %v3207_v18, %v1577_v11  ;;  %v1598_v26 = vmul.f32 %v1597_v7, %v1592_v30 }
0x1678   :  { %v1604_v36 = vadd.f32 %v1603_v35, %v1598_v26  ;;  %v1599_v37 = vmul.f32 %v1597_v7, %v1593_v22 }
0x167a   :  { %v1605_v41 = vadd.f32 %v1603_v35, %v1599_v37  ;;  %v1612_v48 = vsel %vm118_vm1, %v1604_v36, %v3040_v51 }
0x167c   :  { %v1613_v43 = vsel %vm118_vm1, %v1605_v41, %v3041_v38 }
0x167d   :  { %v1622_v45 = vpack.c.bf16 %v1613_v43, %v1612_v48 }
0x167f   :  { %2849 = vmatmul.mubr.msk.bf16.vlgmr.msra.gmra.mrb[28].mxu1 %vm121_vm2, %v1622_v45 }
0x1752   :  { %v1688_v33 = vpop.f32.mrb[28].mxu1 }
0x1753   :  { %v3862_v57 = vadd.f32 %v1688_v33, %v1626_v50  ;;  %v2850_v58 = vpop.f32.mrb[29].mxu1  ;;  %v3254_v33 = vld [vmem:[#allocation4] sm:$0xff] }
0x1754   :  { %v1691_v59 = vpop.f32.mrb[30].mxu1 }
0x1755   :  { %v3864_v61 = vadd.f32 %v1691_v59, %v1626_v50  ;;  %v2851_v62 = vpop.f32.mrb[31].mxu1  ;;  %v1698_v5 = vmul.f32 %v3862_v57, %v3477_v8  ;;  %v1696_v11 = vmul.f32 %v3702_v60, %v3862_v57  ;;  %v1736_v60 = vrot.slane %v3883_v21, %v3511_v32 }
0x1757   :  { %v3047_v0 = vpack.i.bf16 %v3864_v61, %v3862_v57  ;;  %v1699_v6 = vmul.f32 %v3864_v61, %v3491_v12  ;;  %v1697_v54 = vmul.f32 %v3706_v1, %v3864_v61 }
0x1759   :  { %3048 = vrot.lane.b32.xlu1 %v3047_v0, %s3361_s1  ;;  %v3042_v10 = vpack.i.bf16 %v1699_v6, %v1698_v5  ;;  %v3255_v0 = vld [vmem:[#allocation4 + $0x10] sm:$0xff]  ;;  %v3256_v6 = vld [vmem:[#allocation4 + $0x8] sm:$0xff] }
0x175b   :  { %3043 = vrot.lane.b32.xlu0 %v3042_v10, %s3367_s22 }
0x17cb   :  { %v3049_v9 = vpop.permute.xlu1 %3048 }
0x17cc   :  { %v3051_v15 = vunpack.i.h.bf16 %v3049_v9  ;;  %v3050_v8 = vunpack.i.l.bf16 %v3049_v9 }
0x17cd   :  { %v3044_v31 = vpop.permute.xlu0 %3043 }
0x17ce   :  { %v3046_v13 = vunpack.i.h.bf16 %v3044_v31  ;;  %v3045_v14 = vunpack.i.l.bf16 %v3044_v31 }
0x17d0   :  { %v1716_v17 = vsel %vm118_vm1, %v1696_v11, %v3045_v14  ;;  %v1717_v12 = vsel %vm118_vm1, %v1697_v54, %v3046_v13  ;;  %v3257_v11 = vld [vmem:[#allocation4 + $0x18] sm:$0xff] }
0x17d1   :  { %v1718_v19 = vsel %vm121_vm2, %v1716_v17, %v3050_v8  ;;  %v1719_v20 = vsel %vm121_vm2, %v1717_v12, %v3051_v15  ;;  %v3258_v8 = vld [vmem:[#allocation4 + $0x20] sm:$0xff] }
0x17d2   :  { %v1732_v63 = vpack.c.bf16 %v1719_v20, %v1718_v19  ;;  %v3259_v20 = vld [vmem:[#allocation4 + $0x30] sm:$0xff] }
0x17d4   :  { %2865 = vmatmul.mubr.msk.bf16.vlgmr.msra.gmra.mrb[36].mxu0 %vm177_vm3, %v1732_v63 }
0x18a7   :  { %v1810_v1 = vpop.f32.mrb[36].mxu0 }
0x18a8   :  { %v2866_v3 = vpop.f32.mrb[37].mxu0  ;;  %v1811_v4 = vadd.f32 %v1810_v1, %v1736_v60 }
0x18a9   :  { %v1813_v24 = vpop.f32.mrb[38].mxu0 }
0x18aa   :  { %v1814_v25 = vadd.f32 %v1813_v24, %v1736_v60  ;;  %v2867_v55 = vpop.f32.mrb[39].mxu0  ;;  %v3260_v60 = vld [vmem:[#allocation4 + $0x28] sm:$0xff] }
0x18ac   :  { %v3057_v7 = vpack.i.bf16 %v1814_v25, %v1811_v4  ;;  %v3887_v29 = vpack.c.bf16 %v1814_v25, %v1811_v4  ;;  %v3261_v4 = vld [vmem:[#allocation4 + $0x38] sm:$0xff] }
0x18ae   :  { %3058 = vrot.lane.b32.xlu0 %v3057_v7, %s3368_s0  ;;  %3053 = vrot.lane.b32.xlu1 %v3057_v7, %s3369_s23 }
0x18af   :  { %2876 = vmatprep.mubr.msk.bf16.mxu1 %vm258_vm4, %v3887_v29 }
0x18b2   :  { %3063 = vrot.lane.b32.xlu1 %v3057_v7, %s3370_s24  ;;  %1845 = vrot.lane.b32.xlu0 %v3887_v29, %s3364_s18 }
0x1920   :  { %v3059_v32 = vpop.permute.xlu0 %3058  ;;  %v3054_v30 = vpop.permute.xlu1 %3053 }
0x1921   :  { %v3061_v35 = vunpack.i.h.bf16 %v3059_v32  ;;  %v3060_v18 = vunpack.i.l.bf16 %v3059_v32  ;;  %v3056_v22 = vunpack.i.h.bf16 %v3054_v30  ;;  %v3055_v26 = vunpack.i.l.bf16 %v3054_v30 }
0x1923   :  { %v3896_v27 = vpack.c.bf16 %v3061_v35, %v3060_v18  ;;  %v3898_v36 = vpack.c.bf16 %v3056_v22, %v3055_v26 }
0x1924   :  { %v3064_v37 = vpop.permute.xlu1 %3063  ;;  %v1846_v38 = vpop.permute.xlu0 %1845 }
0x1925   :  { %v3066_v51 = vunpack.i.h.bf16 %v3064_v37  ;;  %v3065_v41 = vunpack.i.l.bf16 %v3064_v37  ;;  %v1866_v48 = vsel %vm258_vm4, %v1846_v38, 0  ;;  %1847 = vrot.lane.b32.xlu1 %v3898_v36, %s3364_s18  ;;  %1849 = vrot.lane.b32.xlu0 %v3896_v27, %s3364_s18 }
0x1926   :  { %2936 = vmatprep.subr.msk.bf16.mxu1 %vm258_vm4, %v1846_v38 }
0x1927   :  { %v3906_v43 = vpack.c.bf16 %v3066_v51, %v3065_v41  ;;  %2869 = vmatpush3.bf16.xpose.msra.mxu1 %v1866_v48 }
0x1929   :  { %1851 = vrot.lane.b32.xlu1 %v3906_v43, %s3364_s18 }
0x1997   :  { %v1848_v45 = vpop.permute.xlu1 %1847  ;;  %v1850_v47 = vpop.permute.xlu0 %1849 }
0x1998   :  { %v1869_v46 = vsel %vm258_vm4, %v1848_v45, 0  ;;  %2937 = vmatprep.subr.msk.bf16.mxu1 %vm258_vm4, %v1848_v45  ;;  %v1872_v16 = vsel %vm258_vm4, %v1850_v47, 0 }
0x1999   :  { %2871 = vmatpush3.bf16.xpose.msra.mxu1 %v1869_v46 }
0x199a   :  { %2938 = vmatprep.subr.msk.bf16.mxu1 %vm258_vm4, %v1850_v47 }
0x199b   :  { %v1852_v52 = vpop.permute.xlu1 %1851 }
0x199c   :  { %v1875_v53 = vsel %vm258_vm4, %v1852_v52, 0 }
0x19a1   :  { %2873 = vmatpush3.bf16.xpose.msra.mxu1 %v1872_v16 }
0x19a2   :  { %2939 = vmatprep.subr.msk.bf16.mxu1 %vm258_vm4, %v1852_v52 }
0x19a9   :  { %2875 = vmatpush3.bf16.xpose.msra.mxu1 %v1875_v53 }
0x19aa   :  { %2900 = vmatprep.subr.bf16.mxu1 %v3365_v2 }
0x19b0   :  { %2877 = vmatmul.mubr.msk.bf16.vlgmr.msra.gmra.mrb[32].mxu1 %vm258_vm4, %v3898_v36 }
0x19b1   :  { %2880 = vmatprep.mubr.msk.bf16.mxu1 %vm258_vm4, %v3896_v27 }
0x19b8   :  { %2881 = vmatmul.mubr.msk.bf16.gmra.mrb[36].mxu1 %vm258_vm4, %v3906_v43 }
0x19b9   :  { %2904 = vmatprep.mubr.msk.bf16.mxu1 %vm3366_vm0, %v3365_v2 }
0x1a83   :  { %v2878_v50 = vpop.f32.mrb[32].mxu1 }
0x1a84   :  { %v1911_v34 = vpop.f32.mrb[33].mxu1  ;;  %v1920_v5 = vadd.f32 %v3255_v0, %v2878_v50 }
0x1a85   :  { %v1912_v58 = vadd.f32 %v3254_v33, %v1911_v34  ;;  %v2879_v59 = vpop.f32.mrb[34].mxu1 }
0x1a86   :  { %v1914_v62 = vpop.f32.mrb[35].mxu1  ;;  %v1923_v54 = vadd.f32 %v3257_v11, %v2879_v59  ;;  %v1948_v14 = vsel %vm121_vm2, %v1920_v5, -inf }
0x1a87   :  { %v1915_v10 = vadd.f32 %v3256_v6, %v1914_v62  ;;  %v1942_v9 = vsel %vm121_vm2, %v1912_v58, -inf }
0x1a88   :  { %1943 = vmax.xlane.f32.xlu0 %v1942_v9  ;;  %v1951_v24 = vsel %vm121_vm2, %v1923_v54, -inf }
0x1a89   :  { %v1945_v31 = vsel %vm121_vm2, %v1915_v10, -inf }
0x1a8a   :  { %1946 = vmax.xlane.f32.xlu1 %v1945_v31 }
0x1a8b   :  { %v2882_v13 = vpop.f32.mrb[36].mxu1 }
0x1a8c   :  { %v1927_v15 = vpop.f32.mrb[37].mxu1  ;;  %1949 = vmax.xlane.f32.xlu0 %v1948_v14  ;;  %v1936_v63 = vadd.f32 %v3259_v20, %v2882_v13 }
0x1a8d   :  { %v1928_v17 = vadd.f32 %v3258_v8, %v1927_v15  ;;  %v2883_v12 = vpop.f32.mrb[38].mxu1 }
0x1a8e   :  { %v1930_v19 = vpop.f32.mrb[39].mxu1  ;;  %v1939_v25 = vadd.f32 %v3261_v4, %v2883_v12  ;;  %v1960_v55 = vsel %vm121_vm2, %v1936_v63, -inf }
0x1a8f   :  { %v1931_v1 = vadd.f32 %v3260_v60, %v1930_v19  ;;  %v1954_v3 = vsel %vm121_vm2, %v1928_v17, -inf }
0x1a90   :  { %1955 = vmax.xlane.f32.xlu1 %v1954_v3  ;;  %1952 = vmax.xlane.f32.xlu0 %v1951_v24  ;;  %v1963_v32 = vsel %vm121_vm2, %v1939_v25, -inf }
0x1a91   :  { %v1957_v7 = vsel %vm121_vm2, %v1931_v1, -inf }
0x1a94   :  { %1961 = vmax.xlane.f32.xlu1 %v1960_v55  ;;  %1958 = vmax.xlane.f32.xlu0 %v1957_v7 }
0x1a98   :  { %1964 = vmax.xlane.f32.xlu0 %v1963_v32 }
0x1aa5   :  { %2034 = vrot.lane.b32.xlu1 %v3887_v29, %s3361_s1 }
0x1b15   :  { %v1944_v30 = vpop.xlane.xlu0 %1943 }
0x1b16   :  { %v1966_v35 = vsub.f32 %v1912_v58, %v1944_v30 }
0x1b17   :  { %v1947_v18 = vpop.xlane.xlu1 %1946 }
0x1b18   :  { %v1974_v37 = vmul.f32 1.442695, %v1966_v35  ;;  %v1967_v51 = vsub.f32 %v1915_v10, %v1947_v18 }
0x1b19   :  { %v1950_v22 = vpop.xlane.xlu0 %1949 }
0x1b1a   :  { %v1968_v26 = vsub.f32 %v1920_v5, %v1950_v22  ;;  %v1976_v16 = vmul.f32 1.442695, %v1967_v51 }
0x1b1c   :  { %v1978_v38 = vmul.f32 1.442695, %v1968_v26 }
0x1b1d   :  { %v1956_v41 = vpop.xlane.xlu1 %1955  ;;  %v1953_v48 = vpop.xlane.xlu0 %1952 }
0x1b1e   :  { %3208 = vpow2.f32 %v1978_v38  ;;  %v1969_v45 = vsub.f32 %v1923_v54, %v1953_v48  ;;  %v1970_v46 = vsub.f32 %v1928_v17, %v1956_v41 }
0x1b1f   :  { %3210 = vpow2.f32 %v1974_v37 }
0x1b20   :  { %v1980_v47 = vmul.f32 1.442695, %v1969_v45  ;;  %v1982_v29 = vmul.f32 1.442695, %v1970_v46 }
0x1b21   :  { %v1962_v52 = vpop.xlane.xlu1 %1961  ;;  %v1959_v53 = vpop.xlane.xlu0 %1958 }
0x1b22   :  { %v1972_v50 = vsub.f32 %v1936_v63, %v1962_v52  ;;  %3212 = vpow2.f32 %v1980_v47  ;;  %v1971_v33 = vsub.f32 %v1931_v1, %v1959_v53 }
0x1b23   :  { %3214 = vpow2.f32 %v1976_v16 }
0x1b24   :  { %v1986_v34 = vmul.f32 1.442695, %v1972_v50  ;;  %v1984_v6 = vmul.f32 1.442695, %v1971_v33 }
0x1b25   :  { %v2035_v58 = vpop.permute.xlu1 %2034  ;;  %v1965_v59 = vpop.xlane.xlu0 %1964 }
0x1b26   :  { %3216 = vpow2.f32 %v1986_v34  ;;  %v1973_v62 = vsub.f32 %v1939_v25, %v1965_v59  ;;  %2884 = vmatprep.subr.bf16.mxu0 %v2035_v58  ;;  %v3121_v59 = vld [vmem:[#allocation6 + $0x118] sm:$0xff]  }
0x1b27   :  { %2885 = vmatpush3.bf16.msra.mxu0 %v2035_v58  ;;  %3218 = vpow2.f32 %v1982_v29  ;;  %v3120_v58 = vld [vmem:[#allocation6 + $0x110] sm:$0xff]  }
0x1b28   :  { %v3935_v0 = vpop.eup %3208  ;;  %v1988_v5 = vmul.f32 1.442695, %v1973_v62  ;;  %2901 = vmatpush3.bf16.msra.mxu1 %v3120_v58 }
0x1b29   :  { %v1996_v10 = vsel %vm121_vm2, %v3935_v0, 0.0  ;;  %v3211_v9 = vpop.eup %3210  ;;  %2902 = vmatprep.subr.bf16.mxu1 %v3365_v2 }
0x1b2a   :  { %3220 = vpow2.f32 %v1988_v5  ;;  %1997 = vadd.xlane.f32.xlu1 %v1996_v10  ;;  %v1990_v11 = vsel %vm121_vm2, %v3211_v9, 0.0 }
0x1b2b   :  { %3222 = vpow2.f32 %v1984_v6 }
0x1b2c   :  { %v3213_v31 = vpop.eup %3212  ;;  %2903 = vmatpush3.bf16.msra.mxu1 %v3121_v59 }
0x1b2d   :  { %v1999_v54 = vsel %vm121_vm2, %v3213_v31, 0.0  ;;  %v3215_v13 = vpop.eup %3214  ;;  %2916 = vmatprep.subr.bf16.mxu1 %v3365_v2 }
0x1b2e   :  { %1991 = vadd.xlane.f32.xlu1 %v1990_v11  ;;  %2000 = vadd.xlane.f32.xlu0 %v1999_v54  ;;  %v1993_v17 = vsel %vm121_vm2, %v3215_v13, 0.0 }
0x1b30   :  { %v3941_v14 = vpop.eup %3216 }
0x1b31   :  { %v2008_v15 = vsel %vm121_vm2, %v3941_v14, 0.0  ;;  %v3219_v8 = vpop.eup %3218 }
0x1b32   :  { %2009 = vadd.xlane.f32.xlu1 %v2008_v15  ;;  %1994 = vadd.xlane.f32.xlu0 %v1993_v17  ;;  %v2002_v19 = vsel %vm121_vm2, %v3219_v8, 0.0 }
0x1b34   :  { %v3221_v12 = vpop.eup %3220 }
0x1b35   :  { %v2011_v20 = vsel %vm121_vm2, %v3221_v12, 0.0  ;;  %v3223_v63 = vpop.eup %3222 }
0x1b36   :  { %2003 = vadd.xlane.f32.xlu1 %v2002_v19  ;;  %2012 = vadd.xlane.f32.xlu0 %v2011_v20  ;;  %v2005_v60 = vsel %vm121_vm2, %v3223_v63, 0.0 }
0x1b3a   :  { %2006 = vadd.xlane.f32.xlu0 %v2005_v60 }
0x1b47   :  { %2038 = vrot.lane.b32.xlu1 %v3896_v27, %s3361_s1 }
0x1b4b   :  { %2040 = vrot.lane.b32.xlu1 %v3906_v43, %s3361_s1 }
0x1b50   :  { %2036 = vrot.lane.b32.xlu0 %v3898_v36, %s3361_s1 }
0x1bb7   :  { %v1998_v1 = vpop.xlane.xlu1 %1997 }
0x1bbb   :  { %v1992_v3 = vpop.xlane.xlu1 %1991  ;;  %v2001_v24 = vpop.xlane.xlu0 %2000 }
0x1bbc   :  { %3224 = vrcp.f32 %v1992_v3 }
0x1bbf   :  { %v2010_v4 = vpop.xlane.xlu1 %2009  ;;  %v1995_v25 = vpop.xlane.xlu0 %1994 }
0x1bc0   :  { %3226 = vrcp.f32 %v1995_v25 }
0x1bc1   :  { %3228 = vrcp.f32 %v2001_v24 }
0x1bc2   :  { %3230 = vrcp.f32 %v1998_v1 }
0x1bc3   :  { %v2013_v55 = vpop.xlane.xlu0 %2012  ;;  %v2004_v7 = vpop.xlane.xlu1 %2003 }
0x1bc4   :  { %3232 = vrcp.f32 %v2004_v7 }
0x1bc6   :  { %v3225_v27 = vpop.eup %3224 }
0x1bc7   :  { %v2007_v32 = vpop.xlane.xlu0 %2006  ;;  %v2039_v43 = vpop.permute.xlu1 %2038  ;;  %v2022_v18 = vmul.f32 %v3225_v27, %v3211_v9  ;;  %v2161_v27 = vrot.slane %v3883_v21, %v3629_v56 }
0x1bc8   :  { %3234 = vrcp.f32 %v2007_v32 }
0x1bc9   :  { %3236 = vrcp.f32 %v2013_v55 }
0x1bca   :  { %v3227_v30 = vpop.eup %3226  ;;  %3238 = vrcp.f32 %v2010_v4 }
0x1bcb   :  { %v2037_v35 = vpop.permute.xlu0 %2036  ;;  %v2023_v36 = vmul.f32 %v3227_v30, %v3215_v13  ;;  %v3229_v26 = vpop.eup %3228 }
0x1bcc   :  { %2886 = vmatprep.subr.bf16.mxu0 %v2037_v35  ;;  %v3231_v37 = vpop.eup %3230  ;;  %v2041_v51 = vpop.permute.xlu1 %2040  ;;  %v2025_v48 = vmul.f32 %v3229_v26, %v3213_v31 }
0x1bcd   :  { %2887 = vmatpush3.bf16.msra.mxu0 %v2037_v35  ;;  %v2030_v22 = vpack.c.bf16 %v2023_v36, %v2022_v18  ;;  %v2024_v46 = vmul.f32 %v3231_v37, %v3935_v0 }
0x1bce   :  { %2888 = vmatprep.subr.bf16.mxu0 %v2039_v43  ;;  %v3233_v38 = vpop.eup %3232 }
0x1bcf   :  { %2892 = vmatprep.mubr.msk.bf16.mxu0 %vm121_vm2, %v2030_v22  ;;  %v2026_v47 = vmul.f32 %v3233_v38, %v3219_v8  ;;  %v2031_v16 = vpack.c.bf16 %v2025_v48, %v2024_v46 }
0x1bd1   :  { %2889 = vmatpush3.bf16.msra.mxu0 %v2039_v43 }
0x1bd2   :  { %v3235_v41 = vpop.eup %3234  ;;  %2890 = vmatprep.subr.bf16.mxu0 %v2041_v51 }
0x1bd3   :  { %v2027_v45 = vmul.f32 %v3235_v41, %v3223_v63  ;;  %v3237_v52 = vpop.eup %3236 }
0x1bd4   :  { %v3239_v50 = vpop.eup %3238  ;;  %v2029_v29 = vmul.f32 %v3237_v52, %v3221_v12 }
0x1bd5   :  { %2891 = vmatpush3.bf16.msra.mxu0 %v2041_v51  ;;  %v2032_v53 = vpack.c.bf16 %v2027_v45, %v2026_v47  ;;  %v2028_v34 = vmul.f32 %v3239_v50, %v3941_v14 }
0x1bd6   :  { %2908 = vmatprep.subr.bf16.mxu0 %v3365_v2 }
0x1bd7   :  { %v2033_v33 = vpack.c.bf16 %v2029_v29, %v2028_v34  ;;  %v3123_v29 = vld [vmem:[#allocation6 + $0x128] sm:$0xff]   ;;  %v3124_v34 = vld [vmem:[#allocation6 + $0x130] sm:$0xff]  }
0x1bd8   :  { %2893 = vmatmul.mubr.msk.bf16.vlgmr.msra.gmra.mrb[40].mxu0 %vm121_vm2, %v2031_v16 }
0x1bd9   :  { %2896 = vmatprep.mubr.msk.bf16.mxu0 %vm121_vm2, %v2032_v53 }
0x1be0   :  { %2897 = vmatmul.mubr.msk.bf16.gmra.mrb[44].mxu0 %vm121_vm2, %v2033_v33  ;;  %v3125_v33 = vld [vmem:[#allocation6 + $0x138] sm:$0xff]  }
0x1be1   :  { %2912 = vmatprep.mubr.msk.bf16.mxu0 %vm3366_vm0, %v3365_v2 }
0x1cab   :  { %v2894_v62 = vpop.f32.mrb[40].mxu0 }
0x1cac   :  { %v2092_v0 = vpop.f32.mrb[41].mxu0 }
0x1cad   :  { %v2895_v5 = vpop.f32.mrb[42].mxu0 }
0x1cae   :  { %v3067_v6 = vpack.i.bf16 %v2895_v5, %v2894_v62  ;;  %v2095_v10 = vpop.f32.mrb[43].mxu0 }
0x1cb0   :  { %3068 = vrot.lane.b32.xlu0 %v3067_v6, %s3359_s6 }
0x1cb3   :  { %v2898_v9 = vpop.f32.mrb[44].mxu0 }
0x1cb4   :  { %v2108_v31 = vpop.f32.mrb[45].mxu0 }
0x1cb5   :  { %v2899_v11 = vpop.f32.mrb[46].mxu0 }
0x1cb6   :  { %v3077_v54 = vpack.i.bf16 %v2899_v11, %v2898_v9  ;;  %v2111_v13 = vpop.f32.mrb[47].mxu0 }
0x1cb7   :  { %v3072_v14 = vpack.i.bf16 %v2111_v13, %v2108_v31 }
0x1cb8   :  { %3078 = vrot.lane.b32.xlu0 %v3077_v54, %s3371_s25  ;;  %v2255_v54 = vrot.slane %v3883_v21, %v3649_v28 }
0x1cb9   :  { %3073 = vrot.lane.b32.xlu1 %v3072_v14, %s3372_s26 }
0x1d22   :  { %v3069_v15 = vpop.permute.xlu0 %3068 }
0x1d23   :  { %v3071_v8 = vunpack.i.h.bf16 %v3069_v15  ;;  %v3070_v17 = vunpack.i.l.bf16 %v3069_v15 }
0x1d25   :  { %v2147_v60 = vsel %vm258_vm4, %v2092_v0, %v3070_v17  ;;  %v2148_v1 = vsel %vm258_vm4, %v2095_v10, %v3071_v8  ;;  %v2249_v10 = vrot.slane %v3883_v21, %v3644_v23 }
0x1d2a   :  { %v3079_v12 = vpop.permute.xlu0 %3078 }
0x1d2b   :  { %v3074_v19 = vpop.permute.xlu1 %3073  ;;  %v3081_v3 = vunpack.i.h.bf16 %v3079_v12  ;;  %v3080_v24 = vunpack.i.l.bf16 %v3079_v12 }
0x1d2c   :  { %v3076_v20 = vunpack.i.h.bf16 %v3074_v19  ;;  %v3075_v63 = vunpack.i.l.bf16 %v3074_v19  ;;  %v3126_v19 = vld [vmem:[#allocation6 + $0x140] sm:$0xff]  }
0x1d2e   :  { %v2150_v4 = vsel %vm555_vm5, %v2148_v1, %v3076_v20  ;;  %v2149_v25 = vsel %vm555_vm5, %v2147_v60, %v3075_v63  ;;  %v3127_v20 = vld [vmem:[#allocation6 + $0x148] sm:$0xff]   ;;  %v2266_v63 = vrot.slane %v3883_v21, %v3658_v44 }
0x1d2f   :  { %v2152_v55 = vsel %vm558_vm6, %v2150_v4, %v3081_v3  ;;  %v2151_v7 = vsel %vm558_vm6, %v2149_v25, %v3080_v24 }
0x1d30   :  { %v2157_v32 = vpack.c.bf16 %v2152_v55, %v2151_v7 }
0x1d32   :  { %2905 = vmatmul.mubr.msk.bf16.vlgmr.msra.gmra.mrb[40].mxu1 %vm118_vm1, %v2157_v32  ;;  %v2337_v32 = vrot.slane %v3883_v21, %v3664_v49 }
0x1d33   :  { %2924 = vmatprep.mubr.msk.bf16.mxu1 %vm3366_vm0, %v3365_v2  ;;  %2917 = vmatpush3.bf16.msra.mxu1 %v3124_v34  ;;  %v2437_v34 = vrot.slane %v3883_v21, %v3677_v39 }
0x1d34   :  { %2918 = vmatprep.subr.bf16.mxu1 %v3365_v2 }
0x1d37   :  { %2919 = vmatpush3.bf16.msra.mxu1 %v3125_v33 }
0x1d38   :  { %2920 = vmatprep.subr.bf16.mxu1 %v3365_v2 }
0x1d3b   :  { %2921 = vmatpush3.bf16.msra.mxu1 %v3126_v19 }
0x1d3c   :  { %2922 = vmatprep.subr.bf16.mxu1 %v3365_v2 }
0x1d3f   :  { %2923 = vmatpush3.bf16.msra.mxu1 %v3127_v20 }
0x1e05   :  { %v2211_v30 = vpop.f32.mrb[40].mxu1 }
0x1e06   :  { %v2212_v43 = vadd.f32 %v2211_v30, %v2161_v27  ;;  %v2906_v35 = vpop.f32.mrb[41].mxu1 }
0x1e07   :  { %v2214_v18 = vpop.f32.mrb[42].mxu1 }
0x1e08   :  { %v2218_v36 = vadd.f32 %v2212_v43, %v3862_v57  ;;  %v2215_v22 = vadd.f32 %v2214_v18, %v2161_v27  ;;  %v2907_v26 = vpop.f32.mrb[43].mxu1 }
0x1e0a   :  { %v2219_v37 = vadd.f32 %v2215_v22, %v3864_v61  ;;  %v2220_v38 = vsel %vm118_vm1, %v2218_v36, 0.0  ;;  %v3122_v61 = vld [vmem:[#allocation6 + $0x120] sm:$0xff]  }
0x1e0b   :  { %2221 = vadd.xlane.f32.xlu1 %v2220_v38  ;;  %2909 = vmatpush3.bf16.msra.mxu0 %v3122_v61 }
0x1e0c   :  { %v2223_v51 = vsel %vm118_vm1, %v2219_v37, 0.0  ;;  %2910 = vmatprep.subr.bf16.mxu0 %v3365_v2 }
0x1e0d   :  { %2224 = vadd.xlane.f32.xlu0 %v2223_v51 }
0x1e0f   :  { %2911 = vmatpush3.bf16.msra.mxu0 %v3123_v29 }
0x1e98   :  { %v2222_v41 = vpop.xlane.xlu1 %2221 }
0x1e99   :  { %v2226_v48 = vmul.f32 0.03125, %v2222_v41 }
0x1e9a   :  { %v2225_v45 = vpop.xlane.xlu0 %2224 }
0x1e9b   :  { %v2228_v46 = vsub.f32 %v2218_v36, %v2226_v48  ;;  %v2227_v47 = vmul.f32 0.03125, %v2225_v45 }
0x1e9d   :  { %v2229_v16 = vsub.f32 %v2219_v37, %v2227_v47  ;;  %v2230_v52 = vmul.f32 %v2228_v46, %v2228_v46 }
0x1e9f   :  { %v2232_v53 = vsel %vm118_vm1, %v2230_v52, 0.0  ;;  %v2231_v57 = vmul.f32 %v2229_v16, %v2229_v16 }
0x1ea0   :  { %2233 = vadd.xlane.f32.xlu0 %v2232_v53 }
0x1ea1   :  { %v2235_v50 = vsel %vm118_vm1, %v2231_v57, 0.0 }
0x1ea2   :  { %2236 = vadd.xlane.f32.xlu1 %v2235_v50 }
0x1f2d   :  { %v2234_v58 = vpop.xlane.xlu0 %2233 }
0x1f2e   :  { %v2238_v59 = vmul.f32 0.03125, %v2234_v58 }
0x1f2f   :  { %v2237_v62 = vpop.xlane.xlu1 %2236 }
0x1f30   :  { %v2240_v0 = vadd.f32 1e-05, %v2238_v59  ;;  %v2239_v5 = vmul.f32 0.03125, %v2237_v62  ;;  %v2443_v59 = vrot.slane %v3883_v21, %v3680_v40 }
0x1f32   :  { %3240 = vrsqrt.f32 %v2240_v0  ;;  %v2241_v6 = vadd.f32 1e-05, %v2239_v5 }
0x1f34   :  { %3242 = vrsqrt.f32 %v2241_v6 }
0x1f3c   :  { %v3241_v9 = vpop.eup %3240 }
0x1f3d   :  { %v2244_v31 = vmul.f32 %v3241_v9, %v2228_v46 }
0x1f3e   :  { %v3243_v11 = vpop.eup %3242 }
0x1f3f   :  { %v2250_v13 = vmul.f32 %v2249_v10, %v2244_v31  ;;  %v2245_v14 = vmul.f32 %v3243_v11, %v2229_v16 }
0x1f41   :  { %v2251_v15 = vmul.f32 %v2249_v10, %v2245_v14  ;;  %v2256_v8 = vadd.f32 %v2255_v54, %v2250_v13 }
0x1f43   :  { %v2257_v17 = vadd.f32 %v2255_v54, %v2251_v15 }
0x1f45   :  { %v2262_v12 = vpack.c.bf16 %v2257_v17, %v2256_v8 }
0x1f47   :  { %2913 = vmatmul.mubr.msk.bf16.vlgmr.msra.gmra.mrb[48].mxu0 %vm118_vm1, %v2262_v12 }
0x201a   :  { %v2316_v60 = vpop.f32.mrb[48].mxu0 }
0x201b   :  { %v2317_v1 = vadd.f32 %v2316_v60, %v2266_v63  ;;  %v2914_v28 = vpop.f32.mrb[49].mxu0 }
0x201c   :  { %v2319_v3 = vpop.f32.mrb[50].mxu0 }
0x201d   :  { %v2320_v24 = vadd.f32 %v2319_v3, %v2266_v63  ;;  %v2915_v4 = vpop.f32.mrb[51].mxu0  ;;  %v2323_v25 = vmax.f32 %v2317_v1, 0.0  ;;  %v2475_v3 = vrot.slane %v3857_v42, %v3629_v56 }
0x201e   :  { %v2481_v4 = vrot.slane %v3857_v42, %v3644_v23 }
0x201f   :  { %v2324_v55 = vmax.f32 %v2320_v24, 0.0 }
0x2021   :  { %v2333_v7 = vpack.c.bf16 %v2324_v55, %v2323_v25 }
0x2023   :  { %2925 = vmatmul.mubr.msk.bf16.vlgmr.msra.gmra.mrb[44].mxu1 %vm121_vm2, %v2333_v7 }
0x20f6   :  { %v2399_v2 = vpop.f32.mrb[44].mxu1 }
0x20f7   :  { %v2400_v27 = vadd.f32 %v2399_v2, %v2337_v32  ;;  %v2926_v30 = vpop.f32.mrb[45].mxu1 }
0x20f8   :  { %v2402_v43 = vpop.f32.mrb[46].mxu1 }
0x20f9   :  { %v2406_v35 = vadd.f32 %v2400_v27, %v2256_v8  ;;  %v2403_v44 = vadd.f32 %v2402_v43, %v2337_v32  ;;  %v2927_v18 = vpop.f32.mrb[47].mxu1 }
0x20fb   :  { %v2407_v36 = vadd.f32 %v2403_v44, %v2257_v17  ;;  %v2408_v22 = vsel %vm118_vm1, %v2406_v35, 0.0 }
0x20fc   :  { %2409 = vadd.xlane.f32.xlu1 %v2408_v22 }
0x20fd   :  { %v2411_v26 = vsel %vm118_vm1, %v2407_v36, 0.0 }
0x20fe   :  { %2412 = vadd.xlane.f32.xlu0 %v2411_v26 }
0x2189   :  { %v2410_v37 = vpop.xlane.xlu1 %2409 }
0x218a   :  { %v2414_v38 = vmul.f32 0.03125, %v2410_v37 }
0x218b   :  { %v2413_v51 = vpop.xlane.xlu0 %2412 }
0x218c   :  { %v2416_v41 = vsub.f32 %v2406_v35, %v2414_v38  ;;  %v2415_v48 = vmul.f32 0.03125, %v2413_v51 }
0x218e   :  { %v2417_v49 = vsub.f32 %v2407_v36, %v2415_v48  ;;  %v2418_v45 = vmul.f32 %v2416_v41, %v2416_v41 }
0x2190   :  { %v2420_v46 = vsel %vm118_vm1, %v2418_v45, 0.0  ;;  %v2419_v47 = vmul.f32 %v2417_v49, %v2417_v49 }
0x2191   :  { %2421 = vadd.xlane.f32.xlu1 %v2420_v46 }
0x2192   :  { %v2423_v16 = vsel %vm118_vm1, %v2419_v47, 0.0 }
0x2193   :  { %2424 = vadd.xlane.f32.xlu0 %v2423_v16 }
0x221e   :  { %v2422_v52 = vpop.xlane.xlu1 %2421 }
0x221f   :  { %v2426_v53 = vmul.f32 0.03125, %v2422_v52 }
0x2220   :  { %v2425_v57 = vpop.xlane.xlu0 %2424 }
0x2221   :  { %v2428_v50 = vadd.f32 1e-05, %v2426_v53  ;;  %v2427_v61 = vmul.f32 0.03125, %v2425_v57 }
0x2223   :  { %3244 = vrsqrt.f32 %v2428_v50  ;;  %v2429_v29 = vadd.f32 1e-05, %v2427_v61 }
0x2225   :  { %3246 = vrsqrt.f32 %v2429_v29 }
0x222d   :  { %v3245_v33 = vpop.eup %3244 }
0x222e   :  { %v2432_v58 = vmul.f32 %v3245_v33, %v2416_v41 }
0x222f   :  { %v3247_v62 = vpop.eup %3246 }
0x2230   :  { %v2438_v0 = vmul.f32 %v2437_v34, %v2432_v58  ;;  %v2433_v5 = vmul.f32 %v3247_v62, %v2417_v49 }
0x2232   :  { %v2444_v6 = vadd.f32 %v2443_v59, %v2438_v0  ;;  %v2439_v10 = vmul.f32 %v2437_v34, %v2433_v5 }
0x2234   :  { %v2446_v9 = vsel %vm118_vm1, %v2444_v6, 0.0  ;;  %v2445_v31 = vadd.f32 %v2443_v59, %v2439_v10 }
0x2235   :  { %2447 = vadd.xlane.f32.xlu1 %v2446_v9 }
0x2236   :  { %v2449_v11 = vsel %vm118_vm1, %v2445_v31, 0.0 }
0x2237   :  { %2450 = vadd.xlane.f32.xlu0 %v2449_v11 }
0x22c2   :  { %v2448_v54 = vpop.xlane.xlu1 %2447 }
0x22c3   :  { %v2452_v13 = vmul.f32 0.03125, %v2448_v54 }
0x22c4   :  { %v2451_v39 = vpop.xlane.xlu0 %2450 }
0x22c5   :  { %v2454_v14 = vsub.f32 %v2444_v6, %v2452_v13  ;;  %v2453_v15 = vmul.f32 0.03125, %v2451_v39 }
0x22c7   :  { %v2455_v8 = vsub.f32 %v2445_v31, %v2453_v15  ;;  %v2456_v17 = vmul.f32 %v2454_v14, %v2454_v14 }
0x22c9   :  { %v2458_v40 = vsel %vm118_vm1, %v2456_v17, 0.0  ;;  %v2457_v21 = vmul.f32 %v2455_v8, %v2455_v8 }
0x22ca   :  { %2459 = vadd.xlane.f32.xlu1 %v2458_v40 }
0x22cb   :  { %v2461_v12 = vsel %vm118_vm1, %v2457_v21, 0.0 }
0x22cc   :  { %2462 = vadd.xlane.f32.xlu0 %v2461_v12 }
0x2357   :  { %v2460_v19 = vpop.xlane.xlu1 %2459 }
0x2358   :  { %v2464_v20 = vmul.f32 0.03125, %v2460_v19 }
0x2359   :  { %v2463_v63 = vpop.xlane.xlu0 %2462 }
0x235a   :  { %v2466_v60 = vadd.f32 1e-05, %v2464_v20  ;;  %v2465_v1 = vmul.f32 0.03125, %v2463_v63 }
0x235c   :  { %3248 = vrsqrt.f32 %v2466_v60  ;;  %v2467_v28 = vadd.f32 1e-05, %v2465_v1 }
0x235e   :  { %3250 = vrsqrt.f32 %v2467_v28 }
0x2366   :  { %v3249_v24 = vpop.eup %3248 }
0x2367   :  { %v2470_v25 = vmul.f32 %v3249_v24, %v2454_v14 }
0x2368   :  { %v3251_v55 = vpop.eup %3250 }
0x2369   :  { %v2476_v7 = vmul.f32 %v2475_v3, %v2470_v25  ;;  %v2471_v32 = vmul.f32 %v3251_v55, %v2455_v8 }
0x236b   :  { %v2477_v2 = vmul.f32 %v2475_v3, %v2471_v32  ;;  %v2482_v27 = vadd.f32 %v2481_v4, %v2476_v7 }
0x236d   :  { %v2483_v30 = vadd.f32 %v2481_v4, %v2477_v2  ;;  %2484 = vst.msk [vmem:[%s4029_s5] sm:$0xff] %vm118_vm1, %v2482_v27 }
0x236f   :  { %2486 = vrot.lane.b32.xlu0 %v2483_v30, %s3367_s22 }
0x23e1   :  { %v2487_v56 = vpop.permute.xlu0 %2486 }
0x23e2   :  { %2490 = vst.msk [vmem:[%s4029_s5] sm:$0xff] %vm2489_vm7, %v2487_v56 }
0x23e3   :  { %2495 = vsyncpa [#allocation3], 1 }
0x23e4   :  { %2496 = vsyncpa [#allocation5], 1 }
0x23e5   :  { %2497 = vsyncpa [#allocation8], 1 }

</bundles_post_ra>
